<compile_context>
chip_gen: v6e
topology: v6e:2x2x1
jax: 0.10.0
libtpu: 0.0.40
codegen_flags: <defaults>
</compile_context>

<pallas_src>
import math
import functools

import jax
import jax.numpy as jnp
from jax.experimental import pallas as pl
from jax.experimental.pallas import tpu as pltpu


# ----------------------------- kernel-side helpers ----------------------------------

def _layer_norm(v, gamma, beta, feat_mask, inv_n, eps=1e-5):
    """LayerNorm over the true (unpadded) feature lanes; padded lanes stay 0."""
    mu = jnp.sum(v, axis=-1, keepdims=True) * inv_n          # padded lanes of v are 0
    d = jnp.where(feat_mask, v - mu, 0.0)
    var = jnp.sum(d * d, axis=-1, keepdims=True) * inv_n
    return d * jax.lax.rsqrt(var + eps) * gamma + beta


def _gelu_tanh(u):
    # tanh approximation: runs in the EUP slot instead of a long erf VALU polynomial.
    c = math.sqrt(2.0 / math.pi)
    return 0.5 * u * (1.0 + jnp.tanh(c * (u + 0.044715 * u * u * u)))


def encode_block_kernel(
    x_ref,
    wqkv_ref, bqkv_ref,
    wo_ref, bo_ref,
    g0_ref, be0_ref,
    w0_ref, b0_ref, w1_ref, b1_ref,
    g1_ref, be1_ref,
    o_ref,
    *, num_heads, feature, seq,
):
    bt, s_pad, f_pad = x_ref.shape
    rows = bt * s_pad
    dh = feature // num_heads

    # ---- hoisted parameter loads (JAX does not CSE re-broadcasts) ---------------
    bqkv = bqkv_ref[...]
    bo = bo_ref[...]
    g0, be0 = g0_ref[...], be0_ref[...]
    b0, b1 = b0_ref[...], b1_ref[...]
    g1, be1 = g1_ref[...], be1_ref[...]

    lane = jax.lax.broadcasted_iota(jnp.int32, (rows, f_pad), 1)
    feat_mask = lane < feature                # true-feature lanes (padding is zero)
    inv_f = 1.0 / feature

    # s_pad % 8 == 0 (wrapper guarantees it) => these reshapes are layout-free.
    x = x_ref[...].reshape(rows, f_pad).astype(jnp.float32)

    # ---- fused QKV projection: one (rows, Fp) x (Fp, 3Fp) bf16 MXU matmul -------
    qkv = jnp.dot(x.astype(jnp.bfloat16), wqkv_ref[...],
                  preferred_element_type=jnp.float32) + bqkv
    # 1/sqrt(dh) is already folded into the Q weights/bias by the wrapper.
    q = qkv[:, 0 * f_pad:1 * f_pad].reshape(bt, s_pad, f_pad).astype(jnp.bfloat16)
    k = qkv[:, 1 * f_pad:2 * f_pad].reshape(bt, s_pad, f_pad).astype(jnp.bfloat16)
    v = qkv[:, 2 * f_pad:3 * f_pad].reshape(bt, s_pad, f_pad).astype(jnp.bfloat16)

    # Padded key rows (seq padded up to a sublane multiple) must get ~0 weight:
    # biases make padded-token K nonzero, so mask scores to a large negative value.
    if s_pad != seq:
        kidx = jax.lax.broadcasted_iota(jnp.int32, (bt, s_pad, s_pad), 2)
        key_bias = jnp.where(kidx < seq, 0.0, -1e30).astype(jnp.float32)
    else:
        key_bias = None

    # ---- multi-head self-attention, batched over the batch tile ------------------
    # Per-head rank-3 einsums (known-good Mosaic lowering); contexts are assembled
    # once and projected with a single full-width bf16 Wo matmul.
    ctx_heads = []
    for h in range(num_heads):                # static unroll, num_heads is small
        lo = h * dh
        qh = q[:, :, lo:lo + dh]
        kh = k[:, :, lo:lo + dh]
        vh = v[:, :, lo:lo + dh]
        s = jnp.einsum("bqd,bkd->bqk", qh, kh,
                       preferred_element_type=jnp.float32)
        if key_bias is not None:
            s = s + key_bias
        s = s - jnp.max(s, axis=-1, keepdims=True)
        p = jnp.exp(s)
        p = p * pl.reciprocal(jnp.sum(p, axis=-1, keepdims=True), approx=True)
        ctx = jnp.einsum("bqk,bkd->bqd", p.astype(jnp.bfloat16), vh,
                         preferred_element_type=jnp.float32)
        ctx_heads.append(ctx.reshape(rows, dh).astype(jnp.bfloat16))
    if f_pad != feature:
        ctx_heads.append(jnp.zeros((rows, f_pad - feature), jnp.bfloat16))
    ctx_all = jnp.concatenate(ctx_heads, axis=-1)        # one concat, lane-dense width
    attn = jnp.dot(ctx_all, wo_ref[...],                  # single bf16 MXU matmul
                   preferred_element_type=jnp.float32) + bo
    # dropout(p=0.2) is identity in eval mode.

    y = _layer_norm(x + attn, g0, be0, feat_mask, inv_f)

    # ---- pointwise "conv" feed-forward (Conv1d kernel_size=1 == Linear) ----------
    h1 = jnp.dot(y.astype(jnp.bfloat16), w0_ref[...],
                 preferred_element_type=jnp.float32) + b0
    h1 = _gelu_tanh(h1)
    h2 = jnp.dot(h1.astype(jnp.bfloat16), w1_ref[...],
                 preferred_element_type=jnp.float32) + b1

    out = _layer_norm(y + h2, g1, be1, feat_mask, inv_f)
    o_ref[...] = out.reshape(bt, s_pad, f_pad).astype(o_ref.dtype)


# ------------------------------ host-side helpers ------------------------------------

def _round_up(x, m):
    return (x + m - 1) // m * m


def _vmem_capacity_bytes():
    """Per-core VMEM capacity; conservative fallback (v7x per-TC = 64 MiB)."""
    try:
        cap = int(pltpu.get_tpu_info().vmem_capacity_bytes)
        if cap > 0:
            return cap
    except Exception:
        pass
    return 64 * 1024 * 1024


def _vmem_step_bytes(bt, s_pad, f_pad, out_bytes):
    """Rough per-grid-step VMEM footprint estimate (double-buffered I/O + weights
    + f32/bf16 temporaries + per-head score/prob buffers)."""
    rows = bt * s_pad
    io = rows * f_pad * (2 * 4 + 2 * out_bytes)                 # x (f32) + out, x2 buffers
    weights = 2 * (6 * f_pad * f_pad * 2 + 16 * f_pad * 4)      # bf16 mats + f32 vecs (slack x2)
    scratch = rows * f_pad * 48 + rows * s_pad * 16             # qkv/q/k/v/ctx/h1 + scores/probs
    return io + weights + scratch


def _pick_batch_tile(batch, s_pad, f_pad, out_bytes, vmem_budget, rows_target=1024):
    """Largest batch tile that fits the VMEM budget, preferring >= 2 (even) grid
    steps so v7x can shard the parallel axis across both TensorCores."""
    divisors = [t for t in range(1, batch + 1) if batch % t == 0]
    feasible = [t for t in divisors
                if _vmem_step_bytes(t, s_pad, f_pad, out_bytes) <= vmem_budget]
    if not feasible:
        feasible = [1]
    capped = [t for t in feasible if t * s_pad <= rows_target] or [feasible[0]]
    even = [t for t in capped if batch // t >= 2 and (batch // t) % 2 == 0]
    multi = [t for t in capped if batch // t >= 2]
    pool = even or multi or capped
    return max(pool)


def _pack_params(params, feature, num_heads, f_pad):
    """Fuse QKV, fold the 1/sqrt(dh) score scale into Q, zero-pad the feature axis to
    f_pad, and down-cast the big weight matrices to bf16 (biases/LN params stay f32)."""
    dh = feature // num_heads
    scale = 1.0 / math.sqrt(dh)
    pad = f_pad - feature

    def pm(w):   # (F, F) -> (Fp, Fp), zero padding
        return jnp.pad(w.astype(jnp.float32), ((0, pad), (0, pad)))

    def pv(b):   # (1, F) -> (1, Fp), zero padding
        return jnp.pad(b.astype(jnp.float32), ((0, 0), (0, pad)))

    wq, bq = pm(params["wq"] * scale), pv(params["bq"] * scale)
    wk, bk = pm(params["wk"]), pv(params["bk"])
    wv, bv = pm(params["wv"]), pv(params["bv"])
    return dict(
        wqkv=jnp.concatenate([wq, wk, wv], axis=1).astype(jnp.bfloat16),
        bqkv=jnp.concatenate([bq, bk, bv], axis=1),
        wo=pm(params["wo"]).astype(jnp.bfloat16),
        bo=pv(params["bo"]),
        w0=pm(params["w0"]).astype(jnp.bfloat16),
        b0=pv(params["b0"]),
        w1=pm(params["w1"]).astype(jnp.bfloat16),
        b1=pv(params["b1"]),
        ln0_g=pv(params["ln0_g"]), ln0_b=pv(params["ln0_b"]),
        ln1_g=pv(params["ln1_g"]), ln1_b=pv(params["ln1_b"]),
    )


def encode_block(x, params, num_heads, batch_tile=None, out_dtype=None,
                 keep_padded=False):
    batch, seq, feature = x.shape
    assert feature % num_heads == 0
    f_pad = _round_up(feature, 128)   # lane-dense feature axis
    s_pad = _round_up(seq, 8)         # sublane-aligned token axis (layout-free reshape)
    out_dtype = x.dtype if out_dtype is None else jnp.dtype(out_dtype)
    out_bytes = jnp.dtype(out_dtype).itemsize

    cap = _vmem_capacity_bytes()
    tile_budget = cap // 2                              # headroom for pipeline buffers
    vmem_limit = min(int(cap * 0.8), 100 * 1024 * 1024)

    bt = batch_tile if batch_tile is not None else _pick_batch_tile(
        batch, s_pad, f_pad, out_bytes, tile_budget)
    assert batch % bt == 0, "batch tile must divide batch"

    packed = _pack_params(params, feature, num_heads, f_pad)
    x_p = x
    if s_pad != seq or f_pad != feature:
        x_p = jnp.pad(x, ((0, 0), (0, s_pad - seq), (0, f_pad - feature)))

    kernel = functools.partial(encode_block_kernel, num_heads=num_heads,
                               feature=feature, seq=seq)

    def _call(single_buffer):
        # Grid-invariant operands: constant index_map => fetched once and reused.
        # Single-buffer them (pl.Buffered(1)) to free VMEM for the batch tile.
        pm_kw = dict(pipeline_mode=pl.Buffered(1)) if single_buffer else {}
        x_spec = pl.BlockSpec((bt, s_pad, f_pad), lambda b: (b, 0, 0))
        mat3_spec = pl.BlockSpec((f_pad, 3 * f_pad), lambda b: (0, 0), **pm_kw)
        mat_spec = pl.BlockSpec((f_pad, f_pad), lambda b: (0, 0), **pm_kw)
        vec3_spec = pl.BlockSpec((1, 3 * f_pad), lambda b: (0, 0), **pm_kw)
        vec_spec = pl.BlockSpec((1, f_pad), lambda b: (0, 0), **pm_kw)

        in_specs = [
            x_spec,
            mat3_spec, vec3_spec,   # fused Wqkv, bqkv
            mat_spec, vec_spec,     # Wo, bo
            vec_spec, vec_spec,     # LN0 gamma, beta
            mat_spec, vec_spec,     # conv1d0 W, b
            mat_spec, vec_spec,     # conv1d1 W, b
            vec_spec, vec_spec,     # LN1 gamma, beta
        ]

        return pl.pallas_call(
            kernel,
            out_shape=jax.ShapeDtypeStruct((batch, s_pad, f_pad), out_dtype),
            grid_spec=pltpu.PrefetchScalarGridSpec(
                num_scalar_prefetch=0,
                grid=(batch // bt,),
                in_specs=in_specs,
                out_specs=pl.BlockSpec((bt, s_pad, f_pad), lambda b: (b, 0, 0)),
            ),
            compiler_params=pltpu.CompilerParams(
                dimension_semantics=("parallel",),
                vmem_limit_bytes=vmem_limit,
            ),
        )(
            x_p,
            packed["wqkv"], packed["bqkv"],
            packed["wo"], packed["bo"],
            packed["ln0_g"], packed["ln0_b"],
            packed["w0"], packed["b0"],
            packed["w1"], packed["b1"],
            packed["ln1_g"], packed["ln1_b"],
        )

    try:
        out_p = _call(True)       # single-buffered grid-invariant weights
    except Exception:             # pipeline_mode / Buffered(1) unsupported -> default
        out_p = _call(False)

    if keep_padded:
        return out_p
    if s_pad != seq or f_pad != feature:
        out_p = out_p[:, :seq, :feature]
    return out_p


# --------------------------------- reference -----------------------------------------

def encode_block_reference(x, params, num_heads):
    """Pure-JAX f32 reference of the PyTorch forward (eval mode), for validation."""
    batch, seq, feature = x.shape
    dh = feature // num_heads
    hp = jax.lax.Precision.HIGHEST

    def ln(v, g, b, eps=1e-5):
        mu = jnp.mean(v, axis=-1, keepdims=True)
        var = jnp.mean((v - mu) ** 2, axis=-1, keepdims=True)
        return (v - mu) * jax.lax.rsqrt(var + eps) * g + b

    def proj(t, w, b):
        return jnp.einsum("bsf,fg->bsg", t, w, precision=hp) + b

    q = proj(x, params["wq"], params["bq"]).reshape(batch, seq, num_heads, dh)
    k = proj(x, params["wk"], params["bk"]).reshape(batch, seq, num_heads, dh)
    v = proj(x, params["wv"], params["bv"]).reshape(batch, seq, num_heads, dh)
    s = jnp.einsum("bqhd,bkhd->bhqk", q, k, precision=hp) / math.sqrt(dh)
    p = jax.nn.softmax(s, axis=-1)
    ctx = jnp.einsum("bhqk,bkhd->bqhd", p, v,
                     precision=hp).reshape(batch, seq, feature)
    attn = proj(ctx, params["wo"], params["bo"])

    y = ln(x + attn, params["ln0_g"], params["ln0_b"])
    h1 = jax.nn.gelu(proj(y, params["w0"], params["b0"]), approximate=False)
    h2 = proj(h1, params["w1"], params["b1"])
    return ln(y + h2, params["ln1_g"], params["ln1_b"])


def init_params(key, feature):
    ks = jax.random.split(key, 12)
    s = 0.05

    def mat(k):
        return (s * jax.random.normal(k, (feature, feature))).astype(jnp.float32)

    def vec(k):
        return (s * jax.random.normal(k, (1, feature))).astype(jnp.float32)

    return {
        "wq": mat(ks[0]), "bq": vec(ks[1]),
        "wk": mat(ks[2]), "bk": vec(ks[3]),
        "wv": mat(ks[4]), "bv": vec(ks[5]),
        "wo": mat(ks[6]), "bo": vec(ks[7]),
        "w0": mat(ks[8]), "b0": vec(ks[9]),
        "w1": mat(ks[10]), "b1": vec(ks[11]),
        "ln0_g": jnp.ones((1, feature), jnp.float32),
        "ln0_b": jnp.zeros((1, feature), jnp.float32),
        "ln1_g": jnp.ones((1, feature), jnp.float32),
        "ln1_b": jnp.zeros((1, feature), jnp.float32),
    }


if __name__ == "__main__":
    B, S, F, H = 2, 8, 32, 4   # batch, seq (variate tokens), feature, heads (F % H == 0)

    key = jax.random.PRNGKey(0)
    kx, kp = jax.random.split(key)
    x = jax.random.normal(kx, (B, S, F), dtype=jnp.float32)
    params = init_params(kp, F)

    out = encode_block(x, params, num_heads=H)
    out = jax.block_until_ready(out)

    assert out.shape == (B, S, F), out.shape
    assert jnp.all(jnp.isfinite(out)), "non-finite output"

    ref = encode_block_reference(x, params, num_heads=H)
    max_err = jnp.max(jnp.abs(out - ref))
    assert jnp.allclose(out, ref, rtol=5e-2, atol=5e-2), f"max abs err {max_err}"
    print("KERNEL_OK")
</pallas_src>

<mosaic_0001>
module attributes {stable_mosaic.version = 11 : i64} {
  func.func @encode_block_kernel(%arg0: i32, %arg1: memref<1x8x128xf32, #tpu.memory_space<vmem>>, %arg2: memref<128x384xbf16, #tpu.memory_space<vmem>>, %arg3: memref<1x384xf32, #tpu.memory_space<vmem>>, %arg4: memref<128x128xbf16, #tpu.memory_space<vmem>>, %arg5: memref<1x128xf32, #tpu.memory_space<vmem>>, %arg6: memref<1x128xf32, #tpu.memory_space<vmem>>, %arg7: memref<1x128xf32, #tpu.memory_space<vmem>>, %arg8: memref<128x128xbf16, #tpu.memory_space<vmem>>, %arg9: memref<1x128xf32, #tpu.memory_space<vmem>>, %arg10: memref<128x128xbf16, #tpu.memory_space<vmem>>, %arg11: memref<1x128xf32, #tpu.memory_space<vmem>>, %arg12: memref<1x128xf32, #tpu.memory_space<vmem>>, %arg13: memref<1x128xf32, #tpu.memory_space<vmem>>, %arg14: memref<1x8x128xf32, #tpu.memory_space<vmem>>) attributes {dimension_semantics = [#tpu.dimension_semantics<parallel>], iteration_bounds = array<i64: 2>, scalar_prefetch = 0 : i64, scratch_operands = 0 : i64, tpu.core_type = #tpu.core_type<tc>, window_params = [{transform_indices = @transform_0, window_bounds = array<i64: 1, 8, 128>}, {pipeline_mode = #tpu.pipeline_mode<synchronous>, transform_indices = @transform_1, window_bounds = array<i64: 128, 384>}, {pipeline_mode = #tpu.pipeline_mode<synchronous>, transform_indices = @transform_2, window_bounds = array<i64: 1, 384>}, {pipeline_mode = #tpu.pipeline_mode<synchronous>, transform_indices = @transform_3, window_bounds = array<i64: 128, 128>}, {pipeline_mode = #tpu.pipeline_mode<synchronous>, transform_indices = @transform_4, window_bounds = array<i64: 1, 128>}, {pipeline_mode = #tpu.pipeline_mode<synchronous>, transform_indices = @transform_5, window_bounds = array<i64: 1, 128>}, {pipeline_mode = #tpu.pipeline_mode<synchronous>, transform_indices = @transform_6, window_bounds = array<i64: 1, 128>}, {pipeline_mode = #tpu.pipeline_mode<synchronous>, transform_indices = @transform_7, window_bounds = array<i64: 128, 128>}, {pipeline_mode = #tpu.pipeline_mode<synchronous>, transform_indices = @transform_8, window_bounds = array<i64: 1, 128>}, {pipeline_mode = #tpu.pipeline_mode<synchronous>, transform_indices = @transform_9, window_bounds = array<i64: 128, 128>}, {pipeline_mode = #tpu.pipeline_mode<synchronous>, transform_indices = @transform_10, window_bounds = array<i64: 1, 128>}, {pipeline_mode = #tpu.pipeline_mode<synchronous>, transform_indices = @transform_11, window_bounds = array<i64: 1, 128>}, {pipeline_mode = #tpu.pipeline_mode<synchronous>, transform_indices = @transform_12, window_bounds = array<i64: 1, 128>}, {transform_indices = @transform_13, window_bounds = array<i64: 1, 8, 128>}]} {
    %c0 = arith.constant 0 : index
    %c0_0 = arith.constant 0 : index
    %0 = vector.load %arg3[%c0, %c0_0] : memref<1x384xf32, #tpu.memory_space<vmem>>, vector<1x384xf32>
    %c0_1 = arith.constant 0 : index
    %c0_2 = arith.constant 0 : index
    %1 = vector.load %arg5[%c0_1, %c0_2] : memref<1x128xf32, #tpu.memory_space<vmem>>, vector<1x128xf32>
    %c0_3 = arith.constant 0 : index
    %c0_4 = arith.constant 0 : index
    %2 = vector.load %arg6[%c0_3, %c0_4] : memref<1x128xf32, #tpu.memory_space<vmem>>, vector<1x128xf32>
    %c0_5 = arith.constant 0 : index
    %c0_6 = arith.constant 0 : index
    %3 = vector.load %arg7[%c0_5, %c0_6] : memref<1x128xf32, #tpu.memory_space<vmem>>, vector<1x128xf32>
    %c0_7 = arith.constant 0 : index
    %c0_8 = arith.constant 0 : index
    %4 = vector.load %arg9[%c0_7, %c0_8] : memref<1x128xf32, #tpu.memory_space<vmem>>, vector<1x128xf32>
    %c0_9 = arith.constant 0 : index
    %c0_10 = arith.constant 0 : index
    %5 = vector.load %arg11[%c0_9, %c0_10] : memref<1x128xf32, #tpu.memory_space<vmem>>, vector<1x128xf32>
    %c0_11 = arith.constant 0 : index
    %c0_12 = arith.constant 0 : index
    %6 = vector.load %arg12[%c0_11, %c0_12] : memref<1x128xf32, #tpu.memory_space<vmem>>, vector<1x128xf32>
    %c0_13 = arith.constant 0 : index
    %c0_14 = arith.constant 0 : index
    %7 = vector.load %arg13[%c0_13, %c0_14] : memref<1x128xf32, #tpu.memory_space<vmem>>, vector<1x128xf32>
    %8 = tpu.iota {dimensions = array<i32: 1>} : vector<8x128xi32>
    %c32_i32 = arith.constant 32 : i32
    %9 = vector.broadcast %c32_i32 : i32 to vector<8x128xi32>
    %10 = arith.cmpi slt, %8, %9 : vector<8x128xi32>
    %c0_15 = arith.constant 0 : index
    %c0_16 = arith.constant 0 : index
    %c0_17 = arith.constant 0 : index
    %11 = vector.load %arg1[%c0_15, %c0_16, %c0_17] : memref<1x8x128xf32, #tpu.memory_space<vmem>>, vector<1x8x128xf32>
    %12 = vector.shape_cast %11 : vector<1x8x128xf32> to vector<8x128xf32>
    %13 = arith.truncf %12 : vector<8x128xf32> to vector<8x128xbf16>
    %c0_18 = arith.constant 0 : index
    %c0_19 = arith.constant 0 : index
    %14 = vector.load %arg2[%c0_18, %c0_19] : memref<128x384xbf16, #tpu.memory_space<vmem>>, vector<128x384xbf16>
    %cst = arith.constant dense<0.000000e+00> : vector<8x384xf32>
    %15 = tpu.matmul %13, %14, %cst {dimension_numbers = #tpu.dot_dimension_numbers<[1], [0], [0], [1], [0, 0, 1, 1], [], []>} : vector<8x128xbf16>, vector<128x384xbf16>, vector<8x384xf32> -> vector<8x384xf32>
    %16 = vector.broadcast %0 : vector<1x384xf32> to vector<8x384xf32>
    %17 = arith.addf %15, %16 : vector<8x384xf32>
    %18 = vector.extract_strided_slice %17 {offsets = [0, 0], sizes = [8, 128], strides = [1, 1]} : vector<8x384xf32> to vector<8x128xf32>
    %19 = vector.shape_cast %18 : vector<8x128xf32> to vector<1x8x128xf32>
    %20 = arith.truncf %19 : vector<1x8x128xf32> to vector<1x8x128xbf16>
    %21 = vector.extract_strided_slice %17 {offsets = [0, 128], sizes = [8, 128], strides = [1, 1]} : vector<8x384xf32> to vector<8x128xf32>
    %22 = vector.shape_cast %21 : vector<8x128xf32> to vector<1x8x128xf32>
    %23 = arith.truncf %22 : vector<1x8x128xf32> to vector<1x8x128xbf16>
    %24 = vector.extract_strided_slice %17 {offsets = [0, 256], sizes = [8, 128], strides = [1, 1]} : vector<8x384xf32> to vector<8x128xf32>
    %25 = vector.shape_cast %24 : vector<8x128xf32> to vector<1x8x128xf32>
    %26 = arith.truncf %25 : vector<1x8x128xf32> to vector<1x8x128xbf16>
    %27 = vector.extract_strided_slice %20 {offsets = [0, 0, 0], sizes = [1, 8, 8], strides = [1, 1, 1]} : vector<1x8x128xbf16> to vector<1x8x8xbf16>
    %28 = vector.extract_strided_slice %23 {offsets = [0, 0, 0], sizes = [1, 8, 8], strides = [1, 1, 1]} : vector<1x8x128xbf16> to vector<1x8x8xbf16>
    %29 = vector.extract_strided_slice %26 {offsets = [0, 0, 0], sizes = [1, 8, 8], strides = [1, 1, 1]} : vector<1x8x128xbf16> to vector<1x8x8xbf16>
    "tpu.trace_start"() <{level = 10 : i32, message = "bqd,bkd->bqk"}> : () -> ()
    %cst_20 = arith.constant dense<0.000000e+00> : vector<1x8x8xf32>
    %30 = tpu.matmul %27, %28, %cst_20 {dimension_numbers = #tpu.dot_dimension_numbers<[2], [2], [1], [1], [0, 0, 0, 1, 1, 1], [0], [0]>} : vector<1x8x8xbf16>, vector<1x8x8xbf16>, vector<1x8x8xf32> -> vector<1x8x8xf32>
    "tpu.trace_stop"() : () -> ()
    %cst_21 = arith.constant dense<0xFF800000> : vector<1x8xf32>
    %31 = vector.multi_reduction <maximumf>, %30, %cst_21 [2] : vector<1x8x8xf32> to vector<1x8xf32>
    %32 = vector.shape_cast %31 : vector<1x8xf32> to vector<1x8x1xf32>
    %33 = vector.broadcast %32 : vector<1x8x1xf32> to vector<1x8x8xf32>
    %34 = arith.subf %30, %33 : vector<1x8x8xf32>
    %35 = math.exp %34 : vector<1x8x8xf32>
    %cst_22 = arith.constant dense<0.000000e+00> : vector<1x8xf32>
    %36 = vector.multi_reduction <add>, %35, %cst_22 [2] : vector<1x8x8xf32> to vector<1x8xf32>
    %37 = vector.shape_cast %36 : vector<1x8xf32> to vector<1x8x1xf32>
    %38 = tpu.reciprocal %37 {approx = true} : vector<1x8x1xf32> -> vector<1x8x1xf32>
    %39 = vector.broadcast %38 : vector<1x8x1xf32> to vector<1x8x8xf32>
    %40 = arith.mulf %35, %39 : vector<1x8x8xf32>
    %41 = arith.truncf %40 : vector<1x8x8xf32> to vector<1x8x8xbf16>
    "tpu.trace_start"() <{level = 10 : i32, message = "bqk,bkd->bqd"}> : () -> ()
    %cst_23 = arith.constant dense<0.000000e+00> : vector<1x8x8xf32>
    %42 = tpu.matmul %41, %29, %cst_23 {dimension_numbers = #tpu.dot_dimension_numbers<[2], [1], [1], [2], [0, 0, 0, 1, 1, 2], [0], [0]>} : vector<1x8x8xbf16>, vector<1x8x8xbf16>, vector<1x8x8xf32> -> vector<1x8x8xf32>
    "tpu.trace_stop"() : () -> ()
    %43 = vector.shape_cast %42 : vector<1x8x8xf32> to vector<8x8xf32>
    %44 = arith.truncf %43 : vector<8x8xf32> to vector<8x8xbf16>
    %45 = vector.extract_strided_slice %20 {offsets = [0, 0, 8], sizes = [1, 8, 8], strides = [1, 1, 1]} : vector<1x8x128xbf16> to vector<1x8x8xbf16>
    %46 = vector.extract_strided_slice %23 {offsets = [0, 0, 8], sizes = [1, 8, 8], strides = [1, 1, 1]} : vector<1x8x128xbf16> to vector<1x8x8xbf16>
    %47 = vector.extract_strided_slice %26 {offsets = [0, 0, 8], sizes = [1, 8, 8], strides = [1, 1, 1]} : vector<1x8x128xbf16> to vector<1x8x8xbf16>
    "tpu.trace_start"() <{level = 10 : i32, message = "bqd,bkd->bqk"}> : () -> ()
    %cst_24 = arith.constant dense<0.000000e+00> : vector<1x8x8xf32>
    %48 = tpu.matmul %45, %46, %cst_24 {dimension_numbers = #tpu.dot_dimension_numbers<[2], [2], [1], [1], [0, 0, 0, 1, 1, 1], [0], [0]>} : vector<1x8x8xbf16>, vector<1x8x8xbf16>, vector<1x8x8xf32> -> vector<1x8x8xf32>
    "tpu.trace_stop"() : () -> ()
    %cst_25 = arith.constant dense<0xFF800000> : vector<1x8xf32>
    %49 = vector.multi_reduction <maximumf>, %48, %cst_25 [2] : vector<1x8x8xf32> to vector<1x8xf32>
    %50 = vector.shape_cast %49 : vector<1x8xf32> to vector<1x8x1xf32>
    %51 = vector.broadcast %50 : vector<1x8x1xf32> to vector<1x8x8xf32>
    %52 = arith.subf %48, %51 : vector<1x8x8xf32>
    %53 = math.exp %52 : vector<1x8x8xf32>
    %cst_26 = arith.constant dense<0.000000e+00> : vector<1x8xf32>
    %54 = vector.multi_reduction <add>, %53, %cst_26 [2] : vector<1x8x8xf32> to vector<1x8xf32>
    %55 = vector.shape_cast %54 : vector<1x8xf32> to vector<1x8x1xf32>
    %56 = tpu.reciprocal %55 {approx = true} : vector<1x8x1xf32> -> vector<1x8x1xf32>
    %57 = vector.broadcast %56 : vector<1x8x1xf32> to vector<1x8x8xf32>
    %58 = arith.mulf %53, %57 : vector<1x8x8xf32>
    %59 = arith.truncf %58 : vector<1x8x8xf32> to vector<1x8x8xbf16>
    "tpu.trace_start"() <{level = 10 : i32, message = "bqk,bkd->bqd"}> : () -> ()
    %cst_27 = arith.constant dense<0.000000e+00> : vector<1x8x8xf32>
    %60 = tpu.matmul %59, %47, %cst_27 {dimension_numbers = #tpu.dot_dimension_numbers<[2], [1], [1], [2], [0, 0, 0, 1, 1, 2], [0], [0]>} : vector<1x8x8xbf16>, vector<1x8x8xbf16>, vector<1x8x8xf32> -> vector<1x8x8xf32>
    "tpu.trace_stop"() : () -> ()
    %61 = vector.shape_cast %60 : vector<1x8x8xf32> to vector<8x8xf32>
    %62 = arith.truncf %61 : vector<8x8xf32> to vector<8x8xbf16>
    %63 = vector.extract_strided_slice %20 {offsets = [0, 0, 16], sizes = [1, 8, 8], strides = [1, 1, 1]} : vector<1x8x128xbf16> to vector<1x8x8xbf16>
    %64 = vector.extract_strided_slice %23 {offsets = [0, 0, 16], sizes = [1, 8, 8], strides = [1, 1, 1]} : vector<1x8x128xbf16> to vector<1x8x8xbf16>
    %65 = vector.extract_strided_slice %26 {offsets = [0, 0, 16], sizes = [1, 8, 8], strides = [1, 1, 1]} : vector<1x8x128xbf16> to vector<1x8x8xbf16>
    "tpu.trace_start"() <{level = 10 : i32, message = "bqd,bkd->bqk"}> : () -> ()
    %cst_28 = arith.constant dense<0.000000e+00> : vector<1x8x8xf32>
    %66 = tpu.matmul %63, %64, %cst_28 {dimension_numbers = #tpu.dot_dimension_numbers<[2], [2], [1], [1], [0, 0, 0, 1, 1, 1], [0], [0]>} : vector<1x8x8xbf16>, vector<1x8x8xbf16>, vector<1x8x8xf32> -> vector<1x8x8xf32>
    "tpu.trace_stop"() : () -> ()
    %cst_29 = arith.constant dense<0xFF800000> : vector<1x8xf32>
    %67 = vector.multi_reduction <maximumf>, %66, %cst_29 [2] : vector<1x8x8xf32> to vector<1x8xf32>
    %68 = vector.shape_cast %67 : vector<1x8xf32> to vector<1x8x1xf32>
    %69 = vector.broadcast %68 : vector<1x8x1xf32> to vector<1x8x8xf32>
    %70 = arith.subf %66, %69 : vector<1x8x8xf32>
    %71 = math.exp %70 : vector<1x8x8xf32>
    %cst_30 = arith.constant dense<0.000000e+00> : vector<1x8xf32>
    %72 = vector.multi_reduction <add>, %71, %cst_30 [2] : vector<1x8x8xf32> to vector<1x8xf32>
    %73 = vector.shape_cast %72 : vector<1x8xf32> to vector<1x8x1xf32>
    %74 = tpu.reciprocal %73 {approx = true} : vector<1x8x1xf32> -> vector<1x8x1xf32>
    %75 = vector.broadcast %74 : vector<1x8x1xf32> to vector<1x8x8xf32>
    %76 = arith.mulf %71, %75 : vector<1x8x8xf32>
    %77 = arith.truncf %76 : vector<1x8x8xf32> to vector<1x8x8xbf16>
    "tpu.trace_start"() <{level = 10 : i32, message = "bqk,bkd->bqd"}> : () -> ()
    %cst_31 = arith.constant dense<0.000000e+00> : vector<1x8x8xf32>
    %78 = tpu.matmul %77, %65, %cst_31 {dimension_numbers = #tpu.dot_dimension_numbers<[2], [1], [1], [2], [0, 0, 0, 1, 1, 2], [0], [0]>} : vector<1x8x8xbf16>, vector<1x8x8xbf16>, vector<1x8x8xf32> -> vector<1x8x8xf32>
    "tpu.trace_stop"() : () -> ()
    %79 = vector.shape_cast %78 : vector<1x8x8xf32> to vector<8x8xf32>
    %80 = arith.truncf %79 : vector<8x8xf32> to vector<8x8xbf16>
    %81 = vector.extract_strided_slice %20 {offsets = [0, 0, 24], sizes = [1, 8, 8], strides = [1, 1, 1]} : vector<1x8x128xbf16> to vector<1x8x8xbf16>
    %82 = vector.extract_strided_slice %23 {offsets = [0, 0, 24], sizes = [1, 8, 8], strides = [1, 1, 1]} : vector<1x8x128xbf16> to vector<1x8x8xbf16>
    %83 = vector.extract_strided_slice %26 {offsets = [0, 0, 24], sizes = [1, 8, 8], strides = [1, 1, 1]} : vector<1x8x128xbf16> to vector<1x8x8xbf16>
    "tpu.trace_start"() <{level = 10 : i32, message = "bqd,bkd->bqk"}> : () -> ()
    %cst_32 = arith.constant dense<0.000000e+00> : vector<1x8x8xf32>
    %84 = tpu.matmul %81, %82, %cst_32 {dimension_numbers = #tpu.dot_dimension_numbers<[2], [2], [1], [1], [0, 0, 0, 1, 1, 1], [0], [0]>} : vector<1x8x8xbf16>, vector<1x8x8xbf16>, vector<1x8x8xf32> -> vector<1x8x8xf32>
    "tpu.trace_stop"() : () -> ()
    %cst_33 = arith.constant dense<0xFF800000> : vector<1x8xf32>
    %85 = vector.multi_reduction <maximumf>, %84, %cst_33 [2] : vector<1x8x8xf32> to vector<1x8xf32>
    %86 = vector.shape_cast %85 : vector<1x8xf32> to vector<1x8x1xf32>
    %87 = vector.broadcast %86 : vector<1x8x1xf32> to vector<1x8x8xf32>
    %88 = arith.subf %84, %87 : vector<1x8x8xf32>
    %89 = math.exp %88 : vector<1x8x8xf32>
    %cst_34 = arith.constant dense<0.000000e+00> : vector<1x8xf32>
    %90 = vector.multi_reduction <add>, %89, %cst_34 [2] : vector<1x8x8xf32> to vector<1x8xf32>
    %91 = vector.shape_cast %90 : vector<1x8xf32> to vector<1x8x1xf32>
    %92 = tpu.reciprocal %91 {approx = true} : vector<1x8x1xf32> -> vector<1x8x1xf32>
    %93 = vector.broadcast %92 : vector<1x8x1xf32> to vector<1x8x8xf32>
    %94 = arith.mulf %89, %93 : vector<1x8x8xf32>
    %95 = arith.truncf %94 : vector<1x8x8xf32> to vector<1x8x8xbf16>
    "tpu.trace_start"() <{level = 10 : i32, message = "bqk,bkd->bqd"}> : () -> ()
    %cst_35 = arith.constant dense<0.000000e+00> : vector<1x8x8xf32>
    %96 = tpu.matmul %95, %83, %cst_35 {dimension_numbers = #tpu.dot_dimension_numbers<[2], [1], [1], [2], [0, 0, 0, 1, 1, 2], [0], [0]>} : vector<1x8x8xbf16>, vector<1x8x8xbf16>, vector<1x8x8xf32> -> vector<1x8x8xf32>
    "tpu.trace_stop"() : () -> ()
    %97 = vector.shape_cast %96 : vector<1x8x8xf32> to vector<8x8xf32>
    %98 = arith.truncf %97 : vector<8x8xf32> to vector<8x8xbf16>
    %cst_36 = arith.constant 0.000000e+00 : bf16
    %99 = vector.broadcast %cst_36 : bf16 to vector<8x96xbf16>
    %100 = tpu.concatenate %44, %62, %80, %98, %99 in 1 : vector<8x8xbf16>, vector<8x8xbf16>, vector<8x8xbf16>, vector<8x8xbf16>, vector<8x96xbf16> -> vector<8x128xbf16>
    %c0_37 = arith.constant 0 : index
    %c0_38 = arith.constant 0 : index
    %101 = vector.load %arg4[%c0_37, %c0_38] : memref<128x128xbf16, #tpu.memory_space<vmem>>, vector<128x128xbf16>
    %cst_39 = arith.constant dense<0.000000e+00> : vector<8x128xf32>
    %102 = tpu.matmul %100, %101, %cst_39 {dimension_numbers = #tpu.dot_dimension_numbers<[1], [0], [0], [1], [0, 0, 1, 1], [], []>} : vector<8x128xbf16>, vector<128x128xbf16>, vector<8x128xf32> -> vector<8x128xf32>
    %103 = vector.broadcast %1 : vector<1x128xf32> to vector<8x128xf32>
    %104 = arith.addf %102, %103 : vector<8x128xf32>
    %105 = arith.addf %12, %104 : vector<8x128xf32>
    %cst_40 = arith.constant dense<0.000000e+00> : vector<8xf32>
    %106 = vector.multi_reduction <add>, %105, %cst_40 [1] : vector<8x128xf32> to vector<8xf32>
    %107 = vector.shape_cast %106 : vector<8xf32> to vector<8x1xf32>
    %cst_41 = arith.constant 3.125000e-02 : f32
    %108 = vector.broadcast %cst_41 : f32 to vector<8x1xf32>
    %109 = arith.mulf %107, %108 : vector<8x1xf32>
    %110 = vector.broadcast %109 : vector<8x1xf32> to vector<8x128xf32>
    %111 = arith.subf %105, %110 : vector<8x128xf32>
    %cst_42 = arith.constant 0.000000e+00 : f32
    %112 = vector.broadcast %cst_42 : f32 to vector<8x128xf32>
    %113 = arith.select %10, %111, %112 : vector<8x128xi1>, vector<8x128xf32>
    %114 = arith.mulf %113, %113 : vector<8x128xf32>
    %cst_43 = arith.constant dense<0.000000e+00> : vector<8xf32>
    %115 = vector.multi_reduction <add>, %114, %cst_43 [1] : vector<8x128xf32> to vector<8xf32>
    %116 = vector.shape_cast %115 : vector<8xf32> to vector<8x1xf32>
    %cst_44 = arith.constant 3.125000e-02 : f32
    %117 = vector.broadcast %cst_44 : f32 to vector<8x1xf32>
    %118 = arith.mulf %116, %117 : vector<8x1xf32>
    %cst_45 = arith.constant 9.99999974E-6 : f32
    %119 = vector.broadcast %cst_45 : f32 to vector<8x1xf32>
    %120 = arith.addf %118, %119 : vector<8x1xf32>
    %121 = math.rsqrt %120 : vector<8x1xf32>
    %122 = vector.broadcast %121 : vector<8x1xf32> to vector<8x128xf32>
    %123 = arith.mulf %113, %122 : vector<8x128xf32>
    %124 = vector.broadcast %2 : vector<1x128xf32> to vector<8x128xf32>
    %125 = arith.mulf %123, %124 : vector<8x128xf32>
    %126 = vector.broadcast %3 : vector<1x128xf32> to vector<8x128xf32>
    %127 = arith.addf %125, %126 : vector<8x128xf32>
    %128 = arith.truncf %127 : vector<8x128xf32> to vector<8x128xbf16>
    %c0_46 = arith.constant 0 : index
    %c0_47 = arith.constant 0 : index
    %129 = vector.load %arg8[%c0_46, %c0_47] : memref<128x128xbf16, #tpu.memory_space<vmem>>, vector<128x128xbf16>
    %cst_48 = arith.constant dense<0.000000e+00> : vector<8x128xf32>
    %130 = tpu.matmul %128, %129, %cst_48 {dimension_numbers = #tpu.dot_dimension_numbers<[1], [0], [0], [1], [0, 0, 1, 1], [], []>} : vector<8x128xbf16>, vector<128x128xbf16>, vector<8x128xf32> -> vector<8x128xf32>
    %131 = vector.broadcast %4 : vector<1x128xf32> to vector<8x128xf32>
    %132 = arith.addf %130, %131 : vector<8x128xf32>
    %cst_49 = arith.constant 5.000000e-01 : f32
    %133 = vector.broadcast %cst_49 : f32 to vector<8x128xf32>
    %134 = arith.mulf %133, %132 : vector<8x128xf32>
    %cst_50 = arith.constant 4.471500e-02 : f32
    %135 = vector.broadcast %cst_50 : f32 to vector<8x128xf32>
    %136 = arith.mulf %135, %132 : vector<8x128xf32>
    %137 = arith.mulf %136, %132 : vector<8x128xf32>
    %138 = arith.mulf %137, %132 : vector<8x128xf32>
    %139 = arith.addf %132, %138 : vector<8x128xf32>
    %cst_51 = arith.constant 0.797884583 : f32
    %140 = vector.broadcast %cst_51 : f32 to vector<8x128xf32>
    %141 = arith.mulf %140, %139 : vector<8x128xf32>
    %142 = math.tanh %141 : vector<8x128xf32>
    %cst_52 = arith.constant 1.000000e+00 : f32
    %143 = vector.broadcast %cst_52 : f32 to vector<8x128xf32>
    %144 = arith.addf %143, %142 : vector<8x128xf32>
    %145 = arith.mulf %134, %144 : vector<8x128xf32>
    %146 = arith.truncf %145 : vector<8x128xf32> to vector<8x128xbf16>
    %c0_53 = arith.constant 0 : index
    %c0_54 = arith.constant 0 : index
    %147 = vector.load %arg10[%c0_53, %c0_54] : memref<128x128xbf16, #tpu.memory_space<vmem>>, vector<128x128xbf16>
    %cst_55 = arith.constant dense<0.000000e+00> : vector<8x128xf32>
    %148 = tpu.matmul %146, %147, %cst_55 {dimension_numbers = #tpu.dot_dimension_numbers<[1], [0], [0], [1], [0, 0, 1, 1], [], []>} : vector<8x128xbf16>, vector<128x128xbf16>, vector<8x128xf32> -> vector<8x128xf32>
    %149 = vector.broadcast %5 : vector<1x128xf32> to vector<8x128xf32>
    %150 = arith.addf %148, %149 : vector<8x128xf32>
    %151 = arith.addf %127, %150 : vector<8x128xf32>
    %cst_56 = arith.constant dense<0.000000e+00> : vector<8xf32>
    %152 = vector.multi_reduction <add>, %151, %cst_56 [1] : vector<8x128xf32> to vector<8xf32>
    %153 = vector.shape_cast %152 : vector<8xf32> to vector<8x1xf32>
    %cst_57 = arith.constant 3.125000e-02 : f32
    %154 = vector.broadcast %cst_57 : f32 to vector<8x1xf32>
    %155 = arith.mulf %153, %154 : vector<8x1xf32>
    %156 = vector.broadcast %155 : vector<8x1xf32> to vector<8x128xf32>
    %157 = arith.subf %151, %156 : vector<8x128xf32>
    %cst_58 = arith.constant 0.000000e+00 : f32
    %158 = vector.broadcast %cst_58 : f32 to vector<8x128xf32>
    %159 = arith.select %10, %157, %158 : vector<8x128xi1>, vector<8x128xf32>
    %160 = arith.mulf %159, %159 : vector<8x128xf32>
    %cst_59 = arith.constant dense<0.000000e+00> : vector<8xf32>
    %161 = vector.multi_reduction <add>, %160, %cst_59 [1] : vector<8x128xf32> to vector<8xf32>
    %162 = vector.shape_cast %161 : vector<8xf32> to vector<8x1xf32>
    %cst_60 = arith.constant 3.125000e-02 : f32
    %163 = vector.broadcast %cst_60 : f32 to vector<8x1xf32>
    %164 = arith.mulf %162, %163 : vector<8x1xf32>
    %cst_61 = arith.constant 9.99999974E-6 : f32
    %165 = vector.broadcast %cst_61 : f32 to vector<8x1xf32>
    %166 = arith.addf %164, %165 : vector<8x1xf32>
    %167 = math.rsqrt %166 : vector<8x1xf32>
    %168 = vector.broadcast %167 : vector<8x1xf32> to vector<8x128xf32>
    %169 = arith.mulf %159, %168 : vector<8x128xf32>
    %170 = vector.broadcast %6 : vector<1x128xf32> to vector<8x128xf32>
    %171 = arith.mulf %169, %170 : vector<8x128xf32>
    %172 = vector.broadcast %7 : vector<1x128xf32> to vector<8x128xf32>
    %173 = arith.addf %171, %172 : vector<8x128xf32>
    %174 = vector.shape_cast %173 : vector<8x128xf32> to vector<1x8x128xf32>
    %c0_62 = arith.constant 0 : index
    %c0_63 = arith.constant 0 : index
    %c0_64 = arith.constant 0 : index
    %175 = vector.load %arg14[%c0_62, %c0_63, %c0_64] : memref<1x8x128xf32, #tpu.memory_space<vmem>>, vector<1x8x128xf32>
    tpu.vector_store %arg14[%c0_62, %c0_63, %c0_64], %174 {strides = array<i32>} : memref<1x8x128xf32, #tpu.memory_space<vmem>>, vector<1x8x128xf32>,
    return
  }
  func.func @transform_0(%arg0: i32) -> (i32, i32, i32) {
    %c0_i32 = arith.constant 0 : i32
    %c0_i32_0 = arith.constant 0 : i32
    %c0_i32_1 = arith.constant 0 : i32
    return %arg0, %c0_i32, %c0_i32_0 : i32, i32, i32
  }
  func.func @transform_1(%arg0: i32) -> (i32, i32) {
    %c0_i32 = arith.constant 0 : i32
    %c0_i32_0 = arith.constant 0 : i32
    %c0_i32_1 = arith.constant 0 : i32
    return %c0_i32, %c0_i32_0 : i32, i32
  }
  func.func @transform_2(%arg0: i32) -> (i32, i32) {
    %c0_i32 = arith.constant 0 : i32
    %c0_i32_0 = arith.constant 0 : i32
    %c0_i32_1 = arith.constant 0 : i32
    return %c0_i32, %c0_i32_0 : i32, i32
  }
  func.func @transform_3(%arg0: i32) -> (i32, i32) {
    %c0_i32 = arith.constant 0 : i32
    %c0_i32_0 = arith.constant 0 : i32
    %c0_i32_1 = arith.constant 0 : i32
    return %c0_i32, %c0_i32_0 : i32, i32
  }
  func.func @transform_4(%arg0: i32) -> (i32, i32) {
    %c0_i32 = arith.constant 0 : i32
    %c0_i32_0 = arith.constant 0 : i32
    %c0_i32_1 = arith.constant 0 : i32
    return %c0_i32, %c0_i32_0 : i32, i32
  }
  func.func @transform_5(%arg0: i32) -> (i32, i32) {
    %c0_i32 = arith.constant 0 : i32
    %c0_i32_0 = arith.constant 0 : i32
    %c0_i32_1 = arith.constant 0 : i32
    return %c0_i32, %c0_i32_0 : i32, i32
  }
  func.func @transform_6(%arg0: i32) -> (i32, i32) {
    %c0_i32 = arith.constant 0 : i32
    %c0_i32_0 = arith.constant 0 : i32
    %c0_i32_1 = arith.constant 0 : i32
    return %c0_i32, %c0_i32_0 : i32, i32
  }
  func.func @transform_7(%arg0: i32) -> (i32, i32) {
    %c0_i32 = arith.constant 0 : i32
    %c0_i32_0 = arith.constant 0 : i32
    %c0_i32_1 = arith.constant 0 : i32
    return %c0_i32, %c0_i32_0 : i32, i32
  }
  func.func @transform_8(%arg0: i32) -> (i32, i32) {
    %c0_i32 = arith.constant 0 : i32
    %c0_i32_0 = arith.constant 0 : i32
    %c0_i32_1 = arith.constant 0 : i32
    return %c0_i32, %c0_i32_0 : i32, i32
  }
  func.func @transform_9(%arg0: i32) -> (i32, i32) {
    %c0_i32 = arith.constant 0 : i32
    %c0_i32_0 = arith.constant 0 : i32
    %c0_i32_1 = arith.constant 0 : i32
    return %c0_i32, %c0_i32_0 : i32, i32
  }
  func.func @transform_10(%arg0: i32) -> (i32, i32) {
    %c0_i32 = arith.constant 0 : i32
    %c0_i32_0 = arith.constant 0 : i32
    %c0_i32_1 = arith.constant 0 : i32
    return %c0_i32, %c0_i32_0 : i32, i32
  }
  func.func @transform_11(%arg0: i32) -> (i32, i32) {
    %c0_i32 = arith.constant 0 : i32
    %c0_i32_0 = arith.constant 0 : i32
    %c0_i32_1 = arith.constant 0 : i32
    return %c0_i32, %c0_i32_0 : i32, i32
  }
  func.func @transform_12(%arg0: i32) -> (i32, i32) {
    %c0_i32 = arith.constant 0 : i32
    %c0_i32_0 = arith.constant 0 : i32
    %c0_i32_1 = arith.constant 0 : i32
    return %c0_i32, %c0_i32_0 : i32, i32
  }
  func.func @transform_13(%arg0: i32) -> (i32, i32, i32) {
    %c0_i32 = arith.constant 0 : i32
    %c0_i32_0 = arith.constant 0 : i32
    %c0_i32_1 = arith.constant 0 : i32
    return %arg0, %c0_i32, %c0_i32_0 : i32, i32, i32
  }
}

module attributes {stable_mosaic.version = 11 : i64} {
  func.func @encode_block_kernel(%arg0: i32, %arg1: memref<1x8x128xf32, #tpu.memory_space<vmem>>, %arg2: memref<128x384xbf16, #tpu.memory_space<vmem>>, %arg3: memref<1x384xf32, #tpu.memory_space<vmem>>, %arg4: memref<128x128xbf16, #tpu.memory_space<vmem>>, %arg5: memref<1x128xf32, #tpu.memory_space<vmem>>, %arg6: memref<1x128xf32, #tpu.memory_space<vmem>>, %arg7: memref<1x128xf32, #tpu.memory_space<vmem>>, %arg8: memref<128x128xbf16, #tpu.memory_space<vmem>>, %arg9: memref<1x128xf32, #tpu.memory_space<vmem>>, %arg10: memref<128x128xbf16, #tpu.memory_space<vmem>>, %arg11: memref<1x128xf32, #tpu.memory_space<vmem>>, %arg12: memref<1x128xf32, #tpu.memory_space<vmem>>, %arg13: memref<1x128xf32, #tpu.memory_space<vmem>>, %arg14: memref<1x8x128xf32, #tpu.memory_space<vmem>>) attributes {dimension_semantics = [#tpu.dimension_semantics<parallel>], iteration_bounds = array<i64: 2>, scalar_prefetch = 0 : i64, scratch_operands = 0 : i64, tpu.core_type = #tpu.core_type<tc>, window_params = [{transform_indices = @transform_0, window_bounds = array<i64: 1, 8, 128>}, {pipeline_mode = #tpu.pipeline_mode<synchronous>, transform_indices = @transform_1, window_bounds = array<i64: 128, 384>}, {pipeline_mode = #tpu.pipeline_mode<synchronous>, transform_indices = @transform_2, window_bounds = array<i64: 1, 384>}, {pipeline_mode = #tpu.pipeline_mode<synchronous>, transform_indices = @transform_3, window_bounds = array<i64: 128, 128>}, {pipeline_mode = #tpu.pipeline_mode<synchronous>, transform_indices = @transform_4, window_bounds = array<i64: 1, 128>}, {pipeline_mode = #tpu.pipeline_mode<synchronous>, transform_indices = @transform_5, window_bounds = array<i64: 1, 128>}, {pipeline_mode = #tpu.pipeline_mode<synchronous>, transform_indices = @transform_6, window_bounds = array<i64: 1, 128>}, {pipeline_mode = #tpu.pipeline_mode<synchronous>, transform_indices = @transform_7, window_bounds = array<i64: 128, 128>}, {pipeline_mode = #tpu.pipeline_mode<synchronous>, transform_indices = @transform_8, window_bounds = array<i64: 1, 128>}, {pipeline_mode = #tpu.pipeline_mode<synchronous>, transform_indices = @transform_9, window_bounds = array<i64: 128, 128>}, {pipeline_mode = #tpu.pipeline_mode<synchronous>, transform_indices = @transform_10, window_bounds = array<i64: 1, 128>}, {pipeline_mode = #tpu.pipeline_mode<synchronous>, transform_indices = @transform_11, window_bounds = array<i64: 1, 128>}, {pipeline_mode = #tpu.pipeline_mode<synchronous>, transform_indices = @transform_12, window_bounds = array<i64: 1, 128>}, {transform_indices = @transform_13, window_bounds = array<i64: 1, 8, 128>}]} {
    %c0 = arith.constant 0 : index
    %c0_0 = arith.constant 0 : index
    %0 = vector.load %arg3[%c0, %c0_0] : memref<1x384xf32, #tpu.memory_space<vmem>>, vector<1x384xf32>
    %c0_1 = arith.constant 0 : index
    %c0_2 = arith.constant 0 : index
    %1 = vector.load %arg5[%c0_1, %c0_2] : memref<1x128xf32, #tpu.memory_space<vmem>>, vector<1x128xf32>
    %c0_3 = arith.constant 0 : index
    %c0_4 = arith.constant 0 : index
    %2 = vector.load %arg6[%c0_3, %c0_4] : memref<1x128xf32, #tpu.memory_space<vmem>>, vector<1x128xf32>
    %c0_5 = arith.constant 0 : index
    %c0_6 = arith.constant 0 : index
    %3 = vector.load %arg7[%c0_5, %c0_6] : memref<1x128xf32, #tpu.memory_space<vmem>>, vector<1x128xf32>
    %c0_7 = arith.constant 0 : index
    %c0_8 = arith.constant 0 : index
    %4 = vector.load %arg9[%c0_7, %c0_8] : memref<1x128xf32, #tpu.memory_space<vmem>>, vector<1x128xf32>
    %c0_9 = arith.constant 0 : index
    %c0_10 = arith.constant 0 : index
    %5 = vector.load %arg11[%c0_9, %c0_10] : memref<1x128xf32, #tpu.memory_space<vmem>>, vector<1x128xf32>
    %c0_11 = arith.constant 0 : index
    %c0_12 = arith.constant 0 : index
    %6 = vector.load %arg12[%c0_11, %c0_12] : memref<1x128xf32, #tpu.memory_space<vmem>>, vector<1x128xf32>
    %c0_13 = arith.constant 0 : index
    %c0_14 = arith.constant 0 : index
    %7 = vector.load %arg13[%c0_13, %c0_14] : memref<1x128xf32, #tpu.memory_space<vmem>>, vector<1x128xf32>
    %8 = tpu.iota {dimensions = array<i32: 1>} : vector<8x128xi32>
    %c32_i32 = arith.constant 32 : i32
    %9 = vector.broadcast %c32_i32 : i32 to vector<8x128xi32>
    %10 = arith.cmpi slt, %8, %9 : vector<8x128xi32>
    %c0_15 = arith.constant 0 : index
    %c0_16 = arith.constant 0 : index
    %c0_17 = arith.constant 0 : index
    %11 = vector.load %arg1[%c0_15, %c0_16, %c0_17] : memref<1x8x128xf32, #tpu.memory_space<vmem>>, vector<1x8x128xf32>
    %12 = vector.shape_cast %11 : vector<1x8x128xf32> to vector<8x128xf32>
    %13 = arith.truncf %12 : vector<8x128xf32> to vector<8x128xbf16>
    %c0_18 = arith.constant 0 : index
    %c0_19 = arith.constant 0 : index
    %14 = vector.load %arg2[%c0_18, %c0_19] : memref<128x384xbf16, #tpu.memory_space<vmem>>, vector<128x384xbf16>
    %cst = arith.constant dense<0.000000e+00> : vector<8x384xf32>
    %15 = tpu.matmul %13, %14, %cst {dimension_numbers = #tpu.dot_dimension_numbers<[1], [0], [0], [1], [0, 0, 1, 1], [], []>} : vector<8x128xbf16>, vector<128x384xbf16>, vector<8x384xf32> -> vector<8x384xf32>
    %16 = vector.broadcast %0 : vector<1x384xf32> to vector<8x384xf32>
    %17 = arith.addf %15, %16 : vector<8x384xf32>
    %18 = vector.extract_strided_slice %17 {offsets = [0, 0], sizes = [8, 128], strides = [1, 1]} : vector<8x384xf32> to vector<8x128xf32>
    %19 = vector.shape_cast %18 : vector<8x128xf32> to vector<1x8x128xf32>
    %20 = arith.truncf %19 : vector<1x8x128xf32> to vector<1x8x128xbf16>
    %21 = vector.extract_strided_slice %17 {offsets = [0, 128], sizes = [8, 128], strides = [1, 1]} : vector<8x384xf32> to vector<8x128xf32>
    %22 = vector.shape_cast %21 : vector<8x128xf32> to vector<1x8x128xf32>
    %23 = arith.truncf %22 : vector<1x8x128xf32> to vector<1x8x128xbf16>
    %24 = vector.extract_strided_slice %17 {offsets = [0, 256], sizes = [8, 128], strides = [1, 1]} : vector<8x384xf32> to vector<8x128xf32>
    %25 = vector.shape_cast %24 : vector<8x128xf32> to vector<1x8x128xf32>
    %26 = arith.truncf %25 : vector<1x8x128xf32> to vector<1x8x128xbf16>
    %27 = vector.extract_strided_slice %20 {offsets = [0, 0, 0], sizes = [1, 8, 8], strides = [1, 1, 1]} : vector<1x8x128xbf16> to vector<1x8x8xbf16>
    %28 = vector.extract_strided_slice %23 {offsets = [0, 0, 0], sizes = [1, 8, 8], strides = [1, 1, 1]} : vector<1x8x128xbf16> to vector<1x8x8xbf16>
    %29 = vector.extract_strided_slice %26 {offsets = [0, 0, 0], sizes = [1, 8, 8], strides = [1, 1, 1]} : vector<1x8x128xbf16> to vector<1x8x8xbf16>
    "tpu.trace_start"() <{level = 10 : i32, message = "bqd,bkd->bqk"}> : () -> ()
    %cst_20 = arith.constant dense<0.000000e+00> : vector<1x8x8xf32>
    %30 = tpu.matmul %27, %28, %cst_20 {dimension_numbers = #tpu.dot_dimension_numbers<[2], [2], [1], [1], [0, 0, 0, 1, 1, 1], [0], [0]>} : vector<1x8x8xbf16>, vector<1x8x8xbf16>, vector<1x8x8xf32> -> vector<1x8x8xf32>
    "tpu.trace_stop"() : () -> ()
    %cst_21 = arith.constant dense<0xFF800000> : vector<1x8xf32>
    %31 = vector.multi_reduction <maximumf>, %30, %cst_21 [2] : vector<1x8x8xf32> to vector<1x8xf32>
    %32 = vector.shape_cast %31 : vector<1x8xf32> to vector<1x8x1xf32>
    %33 = vector.broadcast %32 : vector<1x8x1xf32> to vector<1x8x8xf32>
    %34 = arith.subf %30, %33 : vector<1x8x8xf32>
    %35 = math.exp %34 : vector<1x8x8xf32>
    %cst_22 = arith.constant dense<0.000000e+00> : vector<1x8xf32>
    %36 = vector.multi_reduction <add>, %35, %cst_22 [2] : vector<1x8x8xf32> to vector<1x8xf32>
    %37 = vector.shape_cast %36 : vector<1x8xf32> to vector<1x8x1xf32>
    %38 = tpu.reciprocal %37 {approx = true} : vector<1x8x1xf32> -> vector<1x8x1xf32>
    %39 = vector.broadcast %38 : vector<1x8x1xf32> to vector<1x8x8xf32>
    %40 = arith.mulf %35, %39 : vector<1x8x8xf32>
    %41 = arith.truncf %40 : vector<1x8x8xf32> to vector<1x8x8xbf16>
    "tpu.trace_start"() <{level = 10 : i32, message = "bqk,bkd->bqd"}> : () -> ()
    %cst_23 = arith.constant dense<0.000000e+00> : vector<1x8x8xf32>
    %42 = tpu.matmul %41, %29, %cst_23 {dimension_numbers = #tpu.dot_dimension_numbers<[2], [1], [1], [2], [0, 0, 0, 1, 1, 2], [0], [0]>} : vector<1x8x8xbf16>, vector<1x8x8xbf16>, vector<1x8x8xf32> -> vector<1x8x8xf32>
    "tpu.trace_stop"() : () -> ()
    %43 = vector.shape_cast %42 : vector<1x8x8xf32> to vector<8x8xf32>
    %44 = arith.truncf %43 : vector<8x8xf32> to vector<8x8xbf16>
    %45 = vector.extract_strided_slice %20 {offsets = [0, 0, 8], sizes = [1, 8, 8], strides = [1, 1, 1]} : vector<1x8x128xbf16> to vector<1x8x8xbf16>
    %46 = vector.extract_strided_slice %23 {offsets = [0, 0, 8], sizes = [1, 8, 8], strides = [1, 1, 1]} : vector<1x8x128xbf16> to vector<1x8x8xbf16>
    %47 = vector.extract_strided_slice %26 {offsets = [0, 0, 8], sizes = [1, 8, 8], strides = [1, 1, 1]} : vector<1x8x128xbf16> to vector<1x8x8xbf16>
    "tpu.trace_start"() <{level = 10 : i32, message = "bqd,bkd->bqk"}> : () -> ()
    %cst_24 = arith.constant dense<0.000000e+00> : vector<1x8x8xf32>
    %48 = tpu.matmul %45, %46, %cst_24 {dimension_numbers = #tpu.dot_dimension_numbers<[2], [2], [1], [1], [0, 0, 0, 1, 1, 1], [0], [0]>} : vector<1x8x8xbf16>, vector<1x8x8xbf16>, vector<1x8x8xf32> -> vector<1x8x8xf32>
    "tpu.trace_stop"() : () -> ()
    %cst_25 = arith.constant dense<0xFF800000> : vector<1x8xf32>
    %49 = vector.multi_reduction <maximumf>, %48, %cst_25 [2] : vector<1x8x8xf32> to vector<1x8xf32>
    %50 = vector.shape_cast %49 : vector<1x8xf32> to vector<1x8x1xf32>
    %51 = vector.broadcast %50 : vector<1x8x1xf32> to vector<1x8x8xf32>
    %52 = arith.subf %48, %51 : vector<1x8x8xf32>
    %53 = math.exp %52 : vector<1x8x8xf32>
    %cst_26 = arith.constant dense<0.000000e+00> : vector<1x8xf32>
    %54 = vector.multi_reduction <add>, %53, %cst_26 [2] : vector<1x8x8xf32> to vector<1x8xf32>
    %55 = vector.shape_cast %54 : vector<1x8xf32> to vector<1x8x1xf32>
    %56 = tpu.reciprocal %55 {approx = true} : vector<1x8x1xf32> -> vector<1x8x1xf32>
    %57 = vector.broadcast %56 : vector<1x8x1xf32> to vector<1x8x8xf32>
    %58 = arith.mulf %53, %57 : vector<1x8x8xf32>
    %59 = arith.truncf %58 : vector<1x8x8xf32> to vector<1x8x8xbf16>
    "tpu.trace_start"() <{level = 10 : i32, message = "bqk,bkd->bqd"}> : () -> ()
    %cst_27 = arith.constant dense<0.000000e+00> : vector<1x8x8xf32>
    %60 = tpu.matmul %59, %47, %cst_27 {dimension_numbers = #tpu.dot_dimension_numbers<[2], [1], [1], [2], [0, 0, 0, 1, 1, 2], [0], [0]>} : vector<1x8x8xbf16>, vector<1x8x8xbf16>, vector<1x8x8xf32> -> vector<1x8x8xf32>
    "tpu.trace_stop"() : () -> ()
    %61 = vector.shape_cast %60 : vector<1x8x8xf32> to vector<8x8xf32>
    %62 = arith.truncf %61 : vector<8x8xf32> to vector<8x8xbf16>
    %63 = vector.extract_strided_slice %20 {offsets = [0, 0, 16], sizes = [1, 8, 8], strides = [1, 1, 1]} : vector<1x8x128xbf16> to vector<1x8x8xbf16>
    %64 = vector.extract_strided_slice %23 {offsets = [0, 0, 16], sizes = [1, 8, 8], strides = [1, 1, 1]} : vector<1x8x128xbf16> to vector<1x8x8xbf16>
    %65 = vector.extract_strided_slice %26 {offsets = [0, 0, 16], sizes = [1, 8, 8], strides = [1, 1, 1]} : vector<1x8x128xbf16> to vector<1x8x8xbf16>
    "tpu.trace_start"() <{level = 10 : i32, message = "bqd,bkd->bqk"}> : () -> ()
    %cst_28 = arith.constant dense<0.000000e+00> : vector<1x8x8xf32>
    %66 = tpu.matmul %63, %64, %cst_28 {dimension_numbers = #tpu.dot_dimension_numbers<[2], [2], [1], [1], [0, 0, 0, 1, 1, 1], [0], [0]>} : vector<1x8x8xbf16>, vector<1x8x8xbf16>, vector<1x8x8xf32> -> vector<1x8x8xf32>
    "tpu.trace_stop"() : () -> ()
    %cst_29 = arith.constant dense<0xFF800000> : vector<1x8xf32>
    %67 = vector.multi_reduction <maximumf>, %66, %cst_29 [2] : vector<1x8x8xf32> to vector<1x8xf32>
    %68 = vector.shape_cast %67 : vector<1x8xf32> to vector<1x8x1xf32>
    %69 = vector.broadcast %68 : vector<1x8x1xf32> to vector<1x8x8xf32>
    %70 = arith.subf %66, %69 : vector<1x8x8xf32>
    %71 = math.exp %70 : vector<1x8x8xf32>
    %cst_30 = arith.constant dense<0.000000e+00> : vector<1x8xf32>
    %72 = vector.multi_reduction <add>, %71, %cst_30 [2] : vector<1x8x8xf32> to vector<1x8xf32>
    %73 = vector.shape_cast %72 : vector<1x8xf32> to vector<1x8x1xf32>
    %74 = tpu.reciprocal %73 {approx = true} : vector<1x8x1xf32> -> vector<1x8x1xf32>
    %75 = vector.broadcast %74 : vector<1x8x1xf32> to vector<1x8x8xf32>
    %76 = arith.mulf %71, %75 : vector<1x8x8xf32>
    %77 = arith.truncf %76 : vector<1x8x8xf32> to vector<1x8x8xbf16>
    "tpu.trace_start"() <{level = 10 : i32, message = "bqk,bkd->bqd"}> : () -> ()
    %cst_31 = arith.constant dense<0.000000e+00> : vector<1x8x8xf32>
    %78 = tpu.matmul %77, %65, %cst_31 {dimension_numbers = #tpu.dot_dimension_numbers<[2], [1], [1], [2], [0, 0, 0, 1, 1, 2], [0], [0]>} : vector<1x8x8xbf16>, vector<1x8x8xbf16>, vector<1x8x8xf32> -> vector<1x8x8xf32>
    "tpu.trace_stop"() : () -> ()
    %79 = vector.shape_cast %78 : vector<1x8x8xf32> to vector<8x8xf32>
    %80 = arith.truncf %79 : vector<8x8xf32> to vector<8x8xbf16>
    %81 = vector.extract_strided_slice %20 {offsets = [0, 0, 24], sizes = [1, 8, 8], strides = [1, 1, 1]} : vector<1x8x128xbf16> to vector<1x8x8xbf16>
    %82 = vector.extract_strided_slice %23 {offsets = [0, 0, 24], sizes = [1, 8, 8], strides = [1, 1, 1]} : vector<1x8x128xbf16> to vector<1x8x8xbf16>
    %83 = vector.extract_strided_slice %26 {offsets = [0, 0, 24], sizes = [1, 8, 8], strides = [1, 1, 1]} : vector<1x8x128xbf16> to vector<1x8x8xbf16>
    "tpu.trace_start"() <{level = 10 : i32, message = "bqd,bkd->bqk"}> : () -> ()
    %cst_32 = arith.constant dense<0.000000e+00> : vector<1x8x8xf32>
    %84 = tpu.matmul %81, %82, %cst_32 {dimension_numbers = #tpu.dot_dimension_numbers<[2], [2], [1], [1], [0, 0, 0, 1, 1, 1], [0], [0]>} : vector<1x8x8xbf16>, vector<1x8x8xbf16>, vector<1x8x8xf32> -> vector<1x8x8xf32>
    "tpu.trace_stop"() : () -> ()
    %cst_33 = arith.constant dense<0xFF800000> : vector<1x8xf32>
    %85 = vector.multi_reduction <maximumf>, %84, %cst_33 [2] : vector<1x8x8xf32> to vector<1x8xf32>
    %86 = vector.shape_cast %85 : vector<1x8xf32> to vector<1x8x1xf32>
    %87 = vector.broadcast %86 : vector<1x8x1xf32> to vector<1x8x8xf32>
    %88 = arith.subf %84, %87 : vector<1x8x8xf32>
    %89 = math.exp %88 : vector<1x8x8xf32>
    %cst_34 = arith.constant dense<0.000000e+00> : vector<1x8xf32>
    %90 = vector.multi_reduction <add>, %89, %cst_34 [2] : vector<1x8x8xf32> to vector<1x8xf32>
    %91 = vector.shape_cast %90 : vector<1x8xf32> to vector<1x8x1xf32>
    %92 = tpu.reciprocal %91 {approx = true} : vector<1x8x1xf32> -> vector<1x8x1xf32>
    %93 = vector.broadcast %92 : vector<1x8x1xf32> to vector<1x8x8xf32>
    %94 = arith.mulf %89, %93 : vector<1x8x8xf32>
    %95 = arith.truncf %94 : vector<1x8x8xf32> to vector<1x8x8xbf16>
    "tpu.trace_start"() <{level = 10 : i32, message = "bqk,bkd->bqd"}> : () -> ()
    %cst_35 = arith.constant dense<0.000000e+00> : vector<1x8x8xf32>
    %96 = tpu.matmul %95, %83, %cst_35 {dimension_numbers = #tpu.dot_dimension_numbers<[2], [1], [1], [2], [0, 0, 0, 1, 1, 2], [0], [0]>} : vector<1x8x8xbf16>, vector<1x8x8xbf16>, vector<1x8x8xf32> -> vector<1x8x8xf32>
    "tpu.trace_stop"() : () -> ()
    %97 = vector.shape_cast %96 : vector<1x8x8xf32> to vector<8x8xf32>
    %98 = arith.truncf %97 : vector<8x8xf32> to vector<8x8xbf16>
    %cst_36 = arith.constant 0.000000e+00 : bf16
    %99 = vector.broadcast %cst_36 : bf16 to vector<8x96xbf16>
    %100 = tpu.concatenate %44, %62, %80, %98, %99 in 1 : vector<8x8xbf16>, vector<8x8xbf16>, vector<8x8xbf16>, vector<8x8xbf16>, vector<8x96xbf16> -> vector<8x128xbf16>
    %c0_37 = arith.constant 0 : index
    %c0_38 = arith.constant 0 : index
    %101 = vector.load %arg4[%c0_37, %c0_38] : memref<128x128xbf16, #tpu.memory_space<vmem>>, vector<128x128xbf16>
    %cst_39 = arith.constant dense<0.000000e+00> : vector<8x128xf32>
    %102 = tpu.matmul %100, %101, %cst_39 {dimension_numbers = #tpu.dot_dimension_numbers<[1], [0], [0], [1], [0, 0, 1, 1], [], []>} : vector<8x128xbf16>, vector<128x128xbf16>, vector<8x128xf32> -> vector<8x128xf32>
    %103 = vector.broadcast %1 : vector<1x128xf32> to vector<8x128xf32>
    %104 = arith.addf %102, %103 : vector<8x128xf32>
    %105 = arith.addf %12, %104 : vector<8x128xf32>
    %cst_40 = arith.constant dense<0.000000e+00> : vector<8xf32>
    %106 = vector.multi_reduction <add>, %105, %cst_40 [1] : vector<8x128xf32> to vector<8xf32>
    %107 = vector.shape_cast %106 : vector<8xf32> to vector<8x1xf32>
    %cst_41 = arith.constant 3.125000e-02 : f32
    %108 = vector.broadcast %cst_41 : f32 to vector<8x1xf32>
    %109 = arith.mulf %107, %108 : vector<8x1xf32>
    %110 = vector.broadcast %109 : vector<8x1xf32> to vector<8x128xf32>
    %111 = arith.subf %105, %110 : vector<8x128xf32>
    %cst_42 = arith.constant 0.000000e+00 : f32
    %112 = vector.broadcast %cst_42 : f32 to vector<8x128xf32>
    %113 = arith.select %10, %111, %112 : vector<8x128xi1>, vector<8x128xf32>
    %114 = arith.mulf %113, %113 : vector<8x128xf32>
    %cst_43 = arith.constant dense<0.000000e+00> : vector<8xf32>
    %115 = vector.multi_reduction <add>, %114, %cst_43 [1] : vector<8x128xf32> to vector<8xf32>
    %116 = vector.shape_cast %115 : vector<8xf32> to vector<8x1xf32>
    %cst_44 = arith.constant 3.125000e-02 : f32
    %117 = vector.broadcast %cst_44 : f32 to vector<8x1xf32>
    %118 = arith.mulf %116, %117 : vector<8x1xf32>
    %cst_45 = arith.constant 9.99999974E-6 : f32
    %119 = vector.broadcast %cst_45 : f32 to vector<8x1xf32>
    %120 = arith.addf %118, %119 : vector<8x1xf32>
    %121 = math.rsqrt %120 : vector<8x1xf32>
    %122 = vector.broadcast %121 : vector<8x1xf32> to vector<8x128xf32>
    %123 = arith.mulf %113, %122 : vector<8x128xf32>
    %124 = vector.broadcast %2 : vector<1x128xf32> to vector<8x128xf32>
    %125 = arith.mulf %123, %124 : vector<8x128xf32>
    %126 = vector.broadcast %3 : vector<1x128xf32> to vector<8x128xf32>
    %127 = arith.addf %125, %126 : vector<8x128xf32>
    %128 = arith.truncf %127 : vector<8x128xf32> to vector<8x128xbf16>
    %c0_46 = arith.constant 0 : index
    %c0_47 = arith.constant 0 : index
    %129 = vector.load %arg8[%c0_46, %c0_47] : memref<128x128xbf16, #tpu.memory_space<vmem>>, vector<128x128xbf16>
    %cst_48 = arith.constant dense<0.000000e+00> : vector<8x128xf32>
    %130 = tpu.matmul %128, %129, %cst_48 {dimension_numbers = #tpu.dot_dimension_numbers<[1], [0], [0], [1], [0, 0, 1, 1], [], []>} : vector<8x128xbf16>, vector<128x128xbf16>, vector<8x128xf32> -> vector<8x128xf32>
    %131 = vector.broadcast %4 : vector<1x128xf32> to vector<8x128xf32>
    %132 = arith.addf %130, %131 : vector<8x128xf32>
    %cst_49 = arith.constant 5.000000e-01 : f32
    %133 = vector.broadcast %cst_49 : f32 to vector<8x128xf32>
    %134 = arith.mulf %133, %132 : vector<8x128xf32>
    %cst_50 = arith.constant 4.471500e-02 : f32
    %135 = vector.broadcast %cst_50 : f32 to vector<8x128xf32>
    %136 = arith.mulf %135, %132 : vector<8x128xf32>
    %137 = arith.mulf %136, %132 : vector<8x128xf32>
    %138 = arith.mulf %137, %132 : vector<8x128xf32>
    %139 = arith.addf %132, %138 : vector<8x128xf32>
    %cst_51 = arith.constant 0.797884583 : f32
    %140 = vector.broadcast %cst_51 : f32 to vector<8x128xf32>
    %141 = arith.mulf %140, %139 : vector<8x128xf32>
    %142 = math.tanh %141 : vector<8x128xf32>
    %cst_52 = arith.constant 1.000000e+00 : f32
    %143 = vector.broadcast %cst_52 : f32 to vector<8x128xf32>
    %144 = arith.addf %143, %142 : vector<8x128xf32>
    %145 = arith.mulf %134, %144 : vector<8x128xf32>
    %146 = arith.truncf %145 : vector<8x128xf32> to vector<8x128xbf16>
    %c0_53 = arith.constant 0 : index
    %c0_54 = arith.constant 0 : index
    %147 = vector.load %arg10[%c0_53, %c0_54] : memref<128x128xbf16, #tpu.memory_space<vmem>>, vector<128x128xbf16>
    %cst_55 = arith.constant dense<0.000000e+00> : vector<8x128xf32>
    %148 = tpu.matmul %146, %147, %cst_55 {dimension_numbers = #tpu.dot_dimension_numbers<[1], [0], [0], [1], [0, 0, 1, 1], [], []>} : vector<8x128xbf16>, vector<128x128xbf16>, vector<8x128xf32> -> vector<8x128xf32>
    %149 = vector.broadcast %5 : vector<1x128xf32> to vector<8x128xf32>
    %150 = arith.addf %148, %149 : vector<8x128xf32>
    %151 = arith.addf %127, %150 : vector<8x128xf32>
    %cst_56 = arith.constant dense<0.000000e+00> : vector<8xf32>
    %152 = vector.multi_reduction <add>, %151, %cst_56 [1] : vector<8x128xf32> to vector<8xf32>
    %153 = vector.shape_cast %152 : vector<8xf32> to vector<8x1xf32>
    %cst_57 = arith.constant 3.125000e-02 : f32
    %154 = vector.broadcast %cst_57 : f32 to vector<8x1xf32>
    %155 = arith.mulf %153, %154 : vector<8x1xf32>
    %156 = vector.broadcast %155 : vector<8x1xf32> to vector<8x128xf32>
    %157 = arith.subf %151, %156 : vector<8x128xf32>
    %cst_58 = arith.constant 0.000000e+00 : f32
    %158 = vector.broadcast %cst_58 : f32 to vector<8x128xf32>
    %159 = arith.select %10, %157, %158 : vector<8x128xi1>, vector<8x128xf32>
    %160 = arith.mulf %159, %159 : vector<8x128xf32>
    %cst_59 = arith.constant dense<0.000000e+00> : vector<8xf32>
    %161 = vector.multi_reduction <add>, %160, %cst_59 [1] : vector<8x128xf32> to vector<8xf32>
    %162 = vector.shape_cast %161 : vector<8xf32> to vector<8x1xf32>
    %cst_60 = arith.constant 3.125000e-02 : f32
    %163 = vector.broadcast %cst_60 : f32 to vector<8x1xf32>
    %164 = arith.mulf %162, %163 : vector<8x1xf32>
    %cst_61 = arith.constant 9.99999974E-6 : f32
    %165 = vector.broadcast %cst_61 : f32 to vector<8x1xf32>
    %166 = arith.addf %164, %165 : vector<8x1xf32>
    %167 = math.rsqrt %166 : vector<8x1xf32>
    %168 = vector.broadcast %167 : vector<8x1xf32> to vector<8x128xf32>
    %169 = arith.mulf %159, %168 : vector<8x128xf32>
    %170 = vector.broadcast %6 : vector<1x128xf32> to vector<8x128xf32>
    %171 = arith.mulf %169, %170 : vector<8x128xf32>
    %172 = vector.broadcast %7 : vector<1x128xf32> to vector<8x128xf32>
    %173 = arith.addf %171, %172 : vector<8x128xf32>
    %174 = vector.shape_cast %173 : vector<8x128xf32> to vector<1x8x128xf32>
    %c0_62 = arith.constant 0 : index
    %c0_63 = arith.constant 0 : index
    %c0_64 = arith.constant 0 : index
    %175 = vector.load %arg14[%c0_62, %c0_63, %c0_64] : memref<1x8x128xf32, #tpu.memory_space<vmem>>, vector<1x8x128xf32>
    tpu.vector_store %arg14[%c0_62, %c0_63, %c0_64], %174 {strides = array<i32>} : memref<1x8x128xf32, #tpu.memory_space<vmem>>, vector<1x8x128xf32>,
    return
  }
  func.func @transform_0(%arg0: i32) -> (i32, i32, i32) {
    %c0_i32 = arith.constant 0 : i32
    %c0_i32_0 = arith.constant 0 : i32
    %c0_i32_1 = arith.constant 0 : i32
    return %arg0, %c0_i32, %c0_i32_0 : i32, i32, i32
  }
  func.func @transform_1(%arg0: i32) -> (i32, i32) {
    %c0_i32 = arith.constant 0 : i32
    %c0_i32_0 = arith.constant 0 : i32
    %c0_i32_1 = arith.constant 0 : i32
    return %c0_i32, %c0_i32_0 : i32, i32
  }
  func.func @transform_2(%arg0: i32) -> (i32, i32) {
    %c0_i32 = arith.constant 0 : i32
    %c0_i32_0 = arith.constant 0 : i32
    %c0_i32_1 = arith.constant 0 : i32
    return %c0_i32, %c0_i32_0 : i32, i32
  }
  func.func @transform_3(%arg0: i32) -> (i32, i32) {
    %c0_i32 = arith.constant 0 : i32
    %c0_i32_0 = arith.constant 0 : i32
    %c0_i32_1 = arith.constant 0 : i32
    return %c0_i32, %c0_i32_0 : i32, i32
  }
  func.func @transform_4(%arg0: i32) -> (i32, i32) {
    %c0_i32 = arith.constant 0 : i32
    %c0_i32_0 = arith.constant 0 : i32
    %c0_i32_1 = arith.constant 0 : i32
    return %c0_i32, %c0_i32_0 : i32, i32
  }
  func.func @transform_5(%arg0: i32) -> (i32, i32) {
    %c0_i32 = arith.constant 0 : i32
    %c0_i32_0 = arith.constant 0 : i32
    %c0_i32_1 = arith.constant 0 : i32
    return %c0_i32, %c0_i32_0 : i32, i32
  }
  func.func @transform_6(%arg0: i32) -> (i32, i32) {
    %c0_i32 = arith.constant 0 : i32
    %c0_i32_0 = arith.constant 0 : i32
    %c0_i32_1 = arith.constant 0 : i32
    return %c0_i32, %c0_i32_0 : i32, i32
  }
  func.func @transform_7(%arg0: i32) -> (i32, i32) {
    %c0_i32 = arith.constant 0 : i32
    %c0_i32_0 = arith.constant 0 : i32
    %c0_i32_1 = arith.constant 0 : i32
    return %c0_i32, %c0_i32_0 : i32, i32
  }
  func.func @transform_8(%arg0: i32) -> (i32, i32) {
    %c0_i32 = arith.constant 0 : i32
    %c0_i32_0 = arith.constant 0 : i32
    %c0_i32_1 = arith.constant 0 : i32
    return %c0_i32, %c0_i32_0 : i32, i32
  }
  func.func @transform_9(%arg0: i32) -> (i32, i32) {
    %c0_i32 = arith.constant 0 : i32
    %c0_i32_0 = arith.constant 0 : i32
    %c0_i32_1 = arith.constant 0 : i32
    return %c0_i32, %c0_i32_0 : i32, i32
  }
  func.func @transform_10(%arg0: i32) -> (i32, i32) {
    %c0_i32 = arith.constant 0 : i32
    %c0_i32_0 = arith.constant 0 : i32
    %c0_i32_1 = arith.constant 0 : i32
    return %c0_i32, %c0_i32_0 : i32, i32
  }
  func.func @transform_11(%arg0: i32) -> (i32, i32) {
    %c0_i32 = arith.constant 0 : i32
    %c0_i32_0 = arith.constant 0 : i32
    %c0_i32_1 = arith.constant 0 : i32
    return %c0_i32, %c0_i32_0 : i32, i32
  }
  func.func @transform_12(%arg0: i32) -> (i32, i32) {
    %c0_i32 = arith.constant 0 : i32
    %c0_i32_0 = arith.constant 0 : i32
    %c0_i32_1 = arith.constant 0 : i32
    return %c0_i32, %c0_i32_0 : i32, i32
  }
  func.func @transform_13(%arg0: i32) -> (i32, i32, i32) {
    %c0_i32 = arith.constant 0 : i32
    %c0_i32_0 = arith.constant 0 : i32
    %c0_i32_1 = arith.constant 0 : i32
    return %arg0, %c0_i32, %c0_i32_0 : i32, i32, i32
  }
}

</mosaic_0001>

<bundles_post_ra>
// kernel: tpu_custom_call.1
= control target key start
LH: loop header
LB: loop body
LE: loop exit
PB: predicated region body
PF: predicated region fallthrough
CT: control target
= control target key end

     0   :  { %s2860_s0 = inlined_call_operand.hbm [shape: f32[2,8,128], index: 0, kind: input, shape index: {}]   ;;  %s2861_s1 = inlined_call_operand.hbm [shape: bf16[128,384], index: 1, kind: input, shape index: {}]   ;;  %s2862_s2 = inlined_call_operand.vmem [shape: f32[1,384], index: 2, kind: input, shape index: {}]   ;;  %s2863_s3 = inlined_call_operand.hbm [shape: bf16[128,128], index: 3, kind: input, shape index: {}]   ;;  %s2864_s4 = inlined_call_operand.vmem [shape: f32[1,128], index: 4, kind: input, shape index: {}]   ;;  %s2865_s5 = inlined_call_operand.vmem [shape: f32[1,128], index: 5, kind: input, shape index: {}]   ;;  %s2866_s6 = inlined_call_operand.vmem [shape: f32[1,128], index: 6, kind: input, shape index: {}]   ;;  %s2867_s7 = inlined_call_operand.hbm [shape: bf16[128,128], index: 7, kind: input, shape index: {}]   ;;  %s2868_s8 = inlined_call_operand.vmem [shape: f32[1,128], index: 8, kind: input, shape index: {}]   ;;  %s2869_s9 = inlined_call_operand.hbm [shape: bf16[128,128], index: 9, kind: input, shape index: {}]   ;;  %s2870_s10 = inlined_call_operand.vmem [shape: f32[1,128], index: 10, kind: input, shape index: {}]   ;;  %s2871_s11 = inlined_call_operand.vmem [shape: f32[1,128], index: 11, kind: input, shape index: {}]   ;;  %s2872_s12 = inlined_call_operand.vmem [shape: f32[1,128], index: 12, kind: input, shape index: {}]   ;;  %s2873_s13 = inlined_call_operand.hbm [shape: f32[2,8,128], index: 13, kind: output, shape index: {}]  }
   0x1   :  { %2882 = sst [smem:[#allocation20_spill]] %s2861_s1 }
   0x2   :  { %2883 = sst [smem:[#allocation21_spill]] %s2863_s3 }
   0x3   :  { %2884 = sst [smem:[#allocation22_spill]] %s2867_s7 }
   0x4   :  { %2885 = sst [smem:[#allocation23_spill]] %s2869_s9 }
   0x5   :  { %18 = vsyncpa [#allocation3], 0 }
   0x6   :  { %20 = vsyncpa [#allocation3 + $0x1], 0 }
   0x7   :  { %21 = vsyncpa [#allocation6], 0 }
   0x8   :  { %22 = vsyncpa [#allocation9], 0 }
   0x9   :  { %23 = vsyncpa [#allocation4], 0 }
   0xa   :  { %25 = vsyncpa [#allocation4 + $0x1], 0  ;;  %s2508_s25 = smov 0   ;;  %s2510_s26 = smov 0  }
   0xb   :  { %s2512_s27 = smov 0   ;;  %s2514_s28 = smov 0  }
   0xc LB: > { %2886 = sst [smem:[#allocation16_spill]] %s2413_s27  ;;  %s2419_s29 = smov [#allocation5]   ;;  %s2417_s28 = sphi %s2514_s28, %s2911_s28   ;;  %s2413_s27 = sphi %s2512_s27, %s2913_s27   ;;  %s2409_s26 = sphi %s2510_s26, %s2915_s26   ;;  %s2405_s25 = sphi %s2508_s25, %s2914_s25  }
   0xd   : > { %2887 = sst [smem:[#allocation17_spill]] %s2417_s28  ;;  %s352_s30 = sshll.u32 %s2419_s29, 4  ;;  %s353_s30 = int_to_ptr.vmem [resolvable:$true] %s352_s30 }
   0xe   : > { %s2529_s14 = sadd.s32 4294967295, %s2417_s28   ;;  %p1772_p0 = scmp.ge.s32.totalorder %s2417_s28, 1 }
   0xf   : > { %p2875_p1 = scmp.eq.s32.totalorder %s2529_s14, 0  ;;  %p340_p2 = scmp.lt.s32.totalorder %s2417_s28, 3 }
  0x10   : > { %s2420_s17 = smov [#allocation8]   ;;  %s2421_s19 = smov [#allocation7]  }
  0x11   : > { %p2534_p3 = pnand %p1772_p0, %p340_p2  ;;  %s390_s18 = sshll.u32 %s2420_s17, 4  ;;  %s2547_s18 = int_to_ptr.vmem [resolvable:$true] %s390_s18 }
  0x12   : > { %s2549_s20 = sshll.u32 %s2421_s19, 4  ;;  %s2224_s21 = scalar_lea.vmem %s353_s30, 3072  ;;  %s369_s20 = int_to_ptr.vmem [resolvable:$true] %s2549_s20 }
  0x13   : > { %s2888_s15 = scalar_select %p2534_p3, 1, 0 }
  0x14   : > { %p2055_p5 = pneg %p2534_p3  ;;  %p2225_p8 = scmp.ne.s32.totalorder %s353_s30, %s2224_s21 }
  0x15   : > { %p2232_p11 = scmp.lt.s32.totalorder %s353_s30, %s353_s30  ;;  %p2233_p12 = scmp.lt.s32.totalorder %s2224_s21, %s2224_s21 }
  0x16   : > { %p2543_p6 = pnand %p2055_p5, %p2875_p1 }
  0x17   : > { %p2234_p13 = por %p2233_p12, %p2232_p11 }
  0x18   : > { %p2215_p7 = pneg %p2543_p6 }
  0x1a   : > { %p2227_p9 = pnand %p2225_p8, %p2215_p7 }
  0x1c   : > { %p2228_p10 = pneg %p2227_p9 }
  0x1e   : > { %p2235_p0 = pnand %p2234_p13, %p2228_p10 }
  0x20   : > { %2238 = shalt.err (!%p2235_p0)
}
  0x21   : > { %s2422_s22 = smov 192   ;;  %s2423_s23 = smov 12  }
  0x22   : > { %s2890_s1 = sld [smem:[#allocation20_spill]]  ;;  %s2250_s17 = scalar_lea.vmem %s2547_s18, 1024 }
  0x23   : > { %p2251_p2 = scmp.ne.s32.totalorder %s2547_s18, %s2250_s17  ;;  %p2258_p9 = scmp.lt.s32.totalorder %s2547_s18, %s2547_s18 }
  0x24   : > { %p2259_p10 = scmp.lt.s32.totalorder %s2250_s17, %s2250_s17 }
  0x25   : > { %p2253_p5 = pnand %p2251_p2, %p2215_p7 }
  0x26   : > { %p2260_p11 = por %p2259_p10, %p2258_p9 }
  0x27   : > { %p2254_p8 = pneg %p2253_p5 }
  0x28   : > { %2058 = dma.hbm_to_vmem [thread:$0]  (!%p2543_p6), %s2890_s1, 3072, %s353_s30, [#allocation6], %s2422_s22, %s2422_s22, %s2423_s23  }
  0x29   : > { %p2261_p12 = pnand %p2260_p11, %p2254_p8 }
  0x2b   : > { %2264 = shalt.err (!%p2261_p12)
}
  0x2c   : > { %s2424_s19 = smov 64   ;;  %s2425_s21 = smov 4  }
  0x2d   : > { %s2891_s7 = sld [smem:[#allocation22_spill]]  ;;  %s2276_s23 = scalar_lea.vmem %s369_s20, 1024 }
  0x2e   : > { %p2277_p13 = scmp.ne.s32.totalorder %s369_s20, %s2276_s23  ;;  %p2284_p5 = scmp.lt.s32.totalorder %s369_s20, %s369_s20 }
  0x2f   : > { %p2285_p8 = scmp.lt.s32.totalorder %s2276_s23, %s2276_s23 }
  0x30   : > { %p2279_p0 = pnand %p2277_p13, %p2215_p7 }
  0x31   : > { %p2286_p9 = por %p2285_p8, %p2284_p5 }
  0x32   : > { %p2280_p2 = pneg %p2279_p0 }
  0x33   : > { %2064 = dma.hbm_to_vmem [thread:$0]  (!%p2543_p6), %s2891_s7, 1024, %s2547_s18, [#allocation9], %s2424_s19, %s2424_s19, %s2425_s21  }
  0x34   : > { %p2287_p10 = pnand %p2286_p9, %p2280_p2 }
  0x36   : > { %2290 = shalt.err (!%p2287_p10)
}
  0x37   : > { %s2892_s3 = sld [smem:[#allocation21_spill]]  ;;  %s2426_s18 = smov [#allocation10]  }
  0x38   : > { %s406_s17 = sshll.u32 %s2426_s18, 4  ;;  %s407_s17 = int_to_ptr.vmem [resolvable:$true] %s406_s17 }
  0x39   : > { %s2302_s30 = scalar_lea.vmem %s407_s17, 1024  ;;  %p2310_p0 = scmp.lt.s32.totalorder %s407_s17, %s407_s17 }
  0x3a   : > { %p2303_p11 = scmp.ne.s32.totalorder %s407_s17, %s2302_s30  ;;  %p2311_p5 = scmp.lt.s32.totalorder %s2302_s30, %s2302_s30 }
  0x3c   : > { %p2305_p12 = pnand %p2303_p11, %p2215_p7  ;;  %p2312_p2 = por %p2311_p5, %p2310_p0 }
  0x3d   : > { %2061 = dma.hbm_to_vmem [thread:$0]  (!%p2543_p6), %s2892_s3, 1024, %s369_s20, [#allocation6], %s2424_s19, %s2424_s19, %s2425_s21  }
  0x3e   : > { %p2306_p13 = pneg %p2305_p12 }
  0x40   : > { %p2313_p8 = pnand %p2312_p2, %p2306_p13 }
  0x42   : > { %2316 = shalt.err (!%p2313_p8)
}
  0x43   : > { %s2893_s9 = sld [smem:[#allocation23_spill]]  ;;  %s1771_s20 = sadd.s32 4294967294, %s2417_s28  }
  0x44   : > { %s2593_s16 = sadd.s32 1, %s2417_s28   ;;  %s38_s29 = sadd.s32 1, %s2413_s27 }
  0x45   : > { %2894 = sst [smem:[#allocation18_spill]] %s2593_s16  ;;  %s35_s24 = ssub.s32 %s2417_s28, %s2593_s16 }
  0x46   : > { %p36_p7 = scmp.eq.s32.totalorder %s35_s24, 0  ;;  %p45_p9 = scmp.ne.s32.totalorder %s2413_s27, %s2409_s26 }
  0x47   : > { %p46_p10 = scmp.eq.s32.totalorder %s2417_s28, 0  ;;  %p51_p11 = scmp.ne.s32.totalorder %s2409_s26, %s2405_s25 }
  0x48   : > { %s2604_s18 = scalar_select %p36_p7, %s2413_s27, %s38_s29  }
  0x49   : > { %2067 = dma.hbm_to_vmem [thread:$0]  (!%p2543_p6), %s2893_s9, 1024, %s407_s17, [#allocation9], %s2424_s19, %s2424_s19, %s2425_s21  }
  0x4a   : > { %2895 = sst [smem:[#allocation19_spill]] %s2604_s18  ;;  %p2606_p12 = por %p46_p10, %p45_p9 }
  0x4b   : > { %p2612_p6 = por %p2875_p1, %p51_p11  ;;  %p327_p13 = scmp.eq.s32.totalorder %s2529_s14, 1 }
  0x4c   : > { %p333_p0 = scmp.eq.s32.totalorder %s1771_s20, 1  ;;  %p2080_p5 = scmp.lt.s32.totalorder %s2417_s28, 2 }
  0x4d   : > { %s2897_s19 = scalar_select %p2612_p6, 1, 0 }
  0x4e   : > { %s429_s21 = sand.u32 1, %s2413_s27   ;;  %p2619_p2 = por %p327_p13, %p45_p9 }
  0x4f   : > { %p2623_p8 = por %p333_p0, %p51_p11  ;;  %s1778_s23 = sshll.u32 %s429_s21, 3 }
  0x50   : > { %s2898_s17 = scalar_select %p2619_p2, 1, 0 }
  0x51   : > { %s2899_s22 = scalar_select %p2623_p8, 1, 0 }
  0x52   : > { %s1779_s24 = sshll.u32 %s2417_s28, 7  ;;  %s433_s20 = scalar_lea.vmem [#allocation2], %s1778_s23 }
  0x53   : > { %s2631_s3 = scalar_lea.hbm %s2860_s0, %s1779_s24  ;;  %s440_s7 = sshll.u32 %s433_s20, 4  ;;  %s441_s7 = int_to_ptr.vmem [resolvable:$true] %s440_s7 }
  0x54   : > { %p2635_p7 = pnand %p2080_p5, %p2606_p12  ;;  %s430_s18 = scalar_lea.sflag [#allocation3], %s429_s21 }
  0x55   : > { %s2317_s27 = scalar_lea.hbm %s2631_s3, 128  ;;  %s2322_s29 = scalar_lea.hbm %s2860_s0, 256 }
  0x56   : > { %p2318_p9 = scmp.ne.s32.totalorder %s2631_s3, %s2317_s27  ;;  %p2319_p10 = pneg %p2635_p7 }
  0x57   : > { %p2323_p0 = scmp.lt.s32.totalorder %s2631_s3, %s2860_s0  ;;  %p2324_p12 = scmp.lt.s32.totalorder %s2322_s29, %s2317_s27 }
  0x58   : > { %p2320_p11 = pnand %p2319_p10, %p2318_p9 }
  0x59   : > { %p2325_p5 = por %p2324_p12, %p2323_p0 }
  0x5a   : > { %p2321_p13 = pneg %p2320_p11 }
  0x5c   : > { %p2326_p4 = pnand %p2325_p5, %p2321_p13 }
  0x5e   : > { %2329 = shalt.err (!%p2326_p4)
}
  0x5f   : > { %s2330_s30 = scalar_lea.vmem %s441_s7, 128  ;;  %s2427_s21 = smov [#allocation2]  }
  0x60   : > { %p2331_p1 = scmp.ne.s32.totalorder %s441_s7, %s2330_s30  ;;  %s2335_s16 = sshll.u32 %s2427_s21, 4  ;;  %s2336_s16 = int_to_ptr.vmem [resolvable:$false] %s2335_s16 }
  0x61   : > { %s2337_s28 = scalar_lea.vmem %s2336_s16, 256  ;;  %p2338_p9 = scmp.lt.s32.totalorder %s441_s7, %s2336_s16 }
  0x62   : > { %p2333_p8 = pnand %p2331_p1, %p2319_p10  ;;  %p2339_p11 = scmp.lt.s32.totalorder %s2337_s28, %s2330_s30 }
  0x64   : > { %p2334_p2 = pneg %p2333_p8  ;;  %p2340_p6 = por %p2339_p11, %p2338_p9 }
  0x66   : > { %p2341_p3 = pnand %p2340_p6, %p2334_p2 }
  0x68   : > { %2344 = shalt.err (!%p2341_p3)
}
  0x69   : > { %2071 = dma.hbm_to_vmem [thread:$0]  (!%p2635_p7), %s2631_s3, 128, %s441_s7, %s430_s18  }
  0x6a   : > { %p2901_p13 = scmp.ne.s32.totalorder %s2888_s15, 0 }
  0x6b   : > { %s2656_s27 = sand.u32 (!%p2901_p13), 1, %s2409_s26   ;;  %p2902_p1 = scmp.ne.s32.totalorder (!%p2901_p13), %s2897_s19, 0 }
  0x6c   : > { %449 = sbr.rel (%p2901_p13) target bundleno = 2966 (0xb96), region = 72  ;;  %s1781_s1 = sshll.u32 (!%p2901_p13), %s2656_s27, 3 }
  0x6d   : > { %s452_s16 = scalar_lea.sflag (!%p2901_p13), [#allocation3], %s2656_s27  ;;  %s2662_s28 = scalar_lea.vmem (!%p2901_p13), [#allocation2], %s1781_s1 }
  0x71   : > { %2388 = dma.done.wait (%p2902_p1), %s452_s16, 128  }
  0x72   : > { %2390 = vsyncadd (%p2902_p1), %s452_s16, 4294967168  ;;  %p2903_p3 = scmp.eq.s32.totalorder %s2529_s14, 0 }
  0x74   : > { %2392 = dma.done.wait (%p2903_p3), [#allocation6], 4096   ;;  %p2904_p4 = pmov %p2903_p3 }
  0x75   : > { %p2905_p6 = pmov %p2903_p3 }
  0x76   : > { %2394 = vsyncadd (%p2904_p4), [#allocation6], 4294963200 }
  0x77   : > { %2396 = dma.done.wait (%p2905_p6), [#allocation9], 2048   ;;  %p2906_p2 = pmov %p2903_p3 }
  0x78   : > { %v2428_v0 = vmov 0   ;;  %v2429_v1 = vmov 0.0   ;;  %v2135_v2 = vld [vmem:[#allocation5 + $0xac] ss:$12 sps:$4 sm:$0xff]   ;;  %v2137_v3 = vld [vmem:[#allocation5 + $0xa8] ss:$12 sps:$4 sm:$0xff]   ;;  %v523_v28 = vlaneseq }
  0x79   : > { %2398 = vsyncadd (%p2906_p2), [#allocation9], 4294965248  ;;  %736 = vmatprep.mubr.bf16.mxu0 %v2428_v0  ;;  %1907 = vmatprep.subr.bf16.mxu1 %v2429_v1  ;;  %v2138_v4 = vld [vmem:[#allocation5 + $0x94] ss:$12 sps:$4 sm:$0xff]   ;;  %v2140_v5 = vld [vmem:[#allocation5 + $0x90] ss:$12 sps:$4 sm:$0xff]  }
  0x7a   : > { %704 = vmatprep.subr.bf16.mxu0 %v2135_v2  ;;  %v2141_v6 = vld [vmem:[#allocation5 + $0x7c] ss:$12 sps:$4 sm:$0xff]   ;;  %v2143_v7 = vld [vmem:[#allocation5 + $0x78] ss:$12 sps:$4 sm:$0xff]   ;;  %v2146_v9 = vld [vmem:[#allocation5 + $0x60] ss:$12 sps:$4 sm:$0xff]  }
  0x7b   : > { %705 = vmatpush1.bf16.msra.mxu0 %v2137_v3  ;;  %v2144_v8 = vld [vmem:[#allocation5 + $0x64] ss:$12 sps:$4 sm:$0xff]   ;;  %v2147_v11 = vld [vmem:[#allocation5 + $0x4c] ss:$12 sps:$4 sm:$0xff]   ;;  %v2149_v13 = vld [vmem:[#allocation5 + $0x48] ss:$12 sps:$4 sm:$0xff]  }
  0x7c   : > { %706 = vmatprep.subr.bf16.mxu0 %v2138_v4  ;;  %v2159_v10 = vld [vmem:[#allocation5 + $0xb0] ss:$12 sps:$4 sm:$0xff]   ;;  %v2160_v12 = vld [vmem:[#allocation5 + $0x98] ss:$12 sps:$4 sm:$0xff]   ;;  %v2150_v14 = vld [vmem:[#allocation5 + $0x34] ss:$12 sps:$4 sm:$0xff]  }
  0x7d   : > { %1908 = vmatpush3.bf16.msra.mxu1 %v2159_v10  ;;  %v2152_v15 = vld [vmem:[#allocation5 + $0x30] ss:$12 sps:$4 sm:$0xff]   ;;  %v2161_v16 = vld [vmem:[#allocation5 + $0x80] ss:$12 sps:$4 sm:$0xff]   ;;  %v2162_v18 = vld [vmem:[#allocation5 + $0x68] ss:$12 sps:$4 sm:$0xff]  }
  0x7e   : > { %1909 = vmatprep.subr.bf16.mxu1 %v2429_v1  ;;  %v2153_v17 = vld [vmem:[#allocation5 + $0x1c] ss:$12 sps:$4 sm:$0xff]   ;;  %v2155_v19 = vld [vmem:[#allocation5 + $0x18] ss:$12 sps:$4 sm:$0xff]   ;;  %v2158_v22 = vld [vmem:[#allocation5] ss:$12 sps:$4 sm:$0xff]  }
  0x7f   : > { %707 = vmatpush1.bf16.msra.mxu0 %v2140_v5  ;;  %v2156_v20 = vld [vmem:[#allocation5 + $0x4] ss:$12 sps:$4 sm:$0xff]   ;;  %v2165_v26 = vld [vmem:[#allocation5 + $0x20] ss:$12 sps:$4 sm:$0xff]   ;;  %v2166_v27 = vld [vmem:[#allocation5 + $0x8] ss:$12 sps:$4 sm:$0xff]  }
  0x80   : > { %708 = vmatprep.subr.bf16.mxu0 %v2141_v6  ;;  %v2163_v21 = vld [vmem:[#allocation5 + $0x50] ss:$12 sps:$4 sm:$0xff]   ;;  %v2164_v24 = vld [vmem:[#allocation5 + $0x38] ss:$12 sps:$4 sm:$0xff]   ;;  %vm2430_vm0 = vmmov 0   ;;  %v562_v29 = vshrl.u32 %v523_v28, 7 }
  0x81   : > { %1910 = vmatpush3.bf16.msra.mxu1 %v2160_v12  ;;  %v2681_v23 = vld [vmem:[%s2662_s28] sm:$0xff]  ;;  %1923 = vmatprep.mubr.msk.bf16.mxu1 %vm2430_vm0, %v2429_v1  ;;  %vm788_vm1 = vcmask 64512   ;;  %s2431_s9 = smov 120   ;;  %s2432_s15 = smov 112   ;;  %vm850_vm2 = vcmask 1043456   ;;  %vm1243_vm3 = vcmask 130048  }
  0x82   : > { %1911 = vmatprep.subr.bf16.mxu1 %v2429_v1  ;;  %v527_v25 = vpack.c.bf16 %v2681_v23, %v2681_v23  ;;  %v567_v30 = vsub.s32 1, %v562_v29  ;;  %v563_v31 = vsub.s32 0, %v562_v29  ;;  %v515_v32 = vld [vmem:[%s2862_s2] sm:$0x7]  ;;  %s2433_s18 = smov 104   ;;  %v571_v44 = vsub.s32 2, %v562_v29 }
  0x83   : > { %709 = vmatpush1.bf16.msra.mxu0 %v2143_v7  ;;  %s2434_s19 = smov 8   ;;  %s2435_s24 = smov 16   ;;  %vm1246_vm4 = vcmask 195584   ;;  %vm1249_vm5 = vcmask 261120  }
  0x84   : > { %710 = vmatprep.subr.bf16.mxu0 %v2144_v8  ;;  %v568_v33 = vrot.slane %v515_v32, %v567_v30  ;;  %v564_v35 = vrot.slane %v515_v32, %v563_v31  ;;  %v572_v45 = vrot.slane %v515_v32, %v571_v44  ;;  %s2436_s29 = smov 24   ;;  %s1852_s23 = sshll.u32 %s2529_s14, 7 }
  0x85   : > { %1912 = vmatpush3.bf16.msra.mxu1 %v2161_v16  ;;  %s513_s20 = scalar_lea.vmem [#allocation11], %s1781_s1  ;;  %s1661_s28 = scalar_lea.hbm %s2873_s13, %s1852_s23 }
  0x86   : > { %1913 = vmatprep.subr.bf16.mxu1 %v2429_v1  ;;  %s1663_s30 = sshll.u32 %s513_s20, 4  ;;  %s1650_s3 = scalar_lea.sflag [#allocation4], %s2656_s27  ;;  %s1664_s30 = int_to_ptr.vmem [resolvable:$true] %s1663_s30 }
  0x87   : > { %711 = vmatpush1.bf16.msra.mxu0 %v2146_v9  ;;  %s2345_s7 = scalar_lea.vmem %s1664_s30, 128  ;;  %p2907_p7 = scmp.ne.s32.totalorder %s2898_s17, 0 }
  0x88   : > { %712 = vmatprep.subr.bf16.mxu0 %v2147_v11  ;;  %p2346_p8 = scmp.ne.s32.totalorder %s1664_s30, %s2345_s7 }
  0x89   : > { %1914 = vmatpush3.bf16.msra.mxu1 %v2162_v18 }
  0x8a   : > { %1915 = vmatprep.subr.bf16.mxu1 %v2429_v1  ;;  %p2347_p10 = pnand %p2346_p8, %p2907_p7 }
  0x8b   : > { %713 = vmatpush1.bf16.msra.mxu0 %v2149_v13 }
  0x8c   : > { %714 = vmatprep.subr.bf16.mxu0 %v2150_v14  ;;  %p2348_p0 = pneg %p2347_p10 }
  0x8d   : > { %1916 = vmatpush3.bf16.msra.mxu1 %v2163_v21 }
  0x8e   : > { %1917 = vmatprep.subr.bf16.mxu1 %v2429_v1 }
  0x8f   : > { %715 = vmatpush1.bf16.msra.mxu0 %v2152_v15 }
  0x90   : > { %716 = vmatprep.subr.bf16.mxu0 %v2153_v17 }
  0x91   : > { %1918 = vmatpush3.bf16.msra.mxu1 %v2164_v24 }
  0x92   : > { %1919 = vmatprep.subr.bf16.mxu1 %v2429_v1 }
  0x93   : > { %717 = vmatpush1.bf16.msra.mxu0 %v2155_v19 }
  0x94   : > { %718 = vmatprep.subr.bf16.mxu0 %v2156_v20 }
  0x95   : > { %1920 = vmatpush3.bf16.msra.mxu1 %v2165_v26 }
  0x96   : > { %1921 = vmatprep.subr.bf16.mxu1 %v2429_v1 }
  0x97   : > { %719 = vmatpush1.bf16.msra.mxu0 %v2158_v22 }
  0x98   : > { %1951 = vmatprep.subr.bf16.mxu0 %v2429_v1 }
  0x99   : > { %1922 = vmatpush3.bf16.msra.mxu1 %v2166_v27 }
  0x9a   : > { %737 = vmatmul.mubr.bf16.vlgmr.msra.gmra.mxu0 %v527_v25  ;;  %1927 = vmatprep.subr.bf16.mxu1 %v2429_v1 }
  0x9b   : > { %1953 = vmatprep.mubr.msk.bf16.mxu0 %vm2430_vm0, %v2429_v1 }
  0x9c   : > { %1924 = vmatmul.mubr.bf16.vlgmr.msra.gmra.mxu1 %v527_v25 }
  0x9d   : > { %1929 = vmatprep.mubr.msk.bf16.mxu1 %vm2430_vm0, %v2429_v1 }
 0x15a   : > { %v738_v34 = vpop.f32.mrf.mxu0 }
 0x15b   : > { %v739_v39 = vadd.f32 %v738_v34, %v564_v35 }
 0x15c   : > { %v740_v36 = vpop.f32.mrf.mxu0  ;;  %v779_v46 = vpop.f32.mrf.mxu1 }
 0x15d   : > { %v741_v37 = vadd.f32 %v740_v36, %v568_v33  ;;  %v785_v43 = vpack.c.bf16 %v739_v39, %v739_v39  ;;  %v780_v47 = vadd.f32 %v779_v46, %v572_v45 }
 0x15e   : > { %v742_v38 = vpop.f32.mrf.mxu0  ;;  %v1925_v48 = vpop.f32.mrf.mxu1 }
 0x15f   : > { %v786_v40 = vpack.c.bf16 %v741_v37, %v741_v37  ;;  %v2711_v49 = vpack.c.bf16 %v780_v47, %v780_v47 }
 0x160   : > { %v743_v41 = vpop.f32.mrf.mxu0  ;;  %v782_v50 = vpop.f32.mrf.mxu1 }
 0x161   : > { %899 = vrot.lane.b32.xlu1 %v786_v40, %s2431_s9  ;;  %v793_v42 = vsel %vm788_vm1, %v786_v40, 0  ;;  %v852_v51 = vsel %vm850_vm2, %v2711_v49, 0 }
 0x162   : > { %1928 = vmatpush3.bf16.xpose.msra.mxu1 %v793_v42  ;;  %v1926_v52 = vpop.f32.mrf.mxu1 }
 0x163   : > { %1933 = vmatprep.subr.bf16.mxu1 %v2429_v1 }
 0x165   : > { %896 = vrot.lane.b32.xlu1 %v785_v43, %s2431_s9 }
 0x169   : > { %1009 = vrot.lane.b32.xlu1 %v785_v43, %s2432_s15  ;;  %1930 = vmatmul.mubr.msk.bf16.vlgmr.msra.gmra.mxu1 %vm788_vm1, %v785_v43 }
 0x16a   : > { %1935 = vmatprep.mubr.msk.bf16.mxu1 %vm2430_vm0, %v2429_v1  ;;  %1934 = vmatpush3.bf16.msra.mxu1 %v852_v51 }
 0x16b   : > { %1939 = vmatprep.subr.bf16.mxu1 %v2429_v1 }
 0x16d   : > { %1122 = vrot.lane.b32.xlu1 %v786_v40, %s2433_s18 }
 0x171   : > { %1120 = vrot.lane.b32.xlu1 %v785_v43, %s2433_s18 }
 0x1d3   : > { %v900_v63 = vpop.permute.xlu1 %899 }
 0x1d4   : > { %v905_v11 = vsel %vm788_vm1, %v900_v63, 0 }
 0x1d7   : > { %v897_v0 = vpop.permute.xlu1 %896 }
 0x1db   : > { %v1010_v3 = vpop.permute.xlu1 %1009 }
 0x1df   : > { %v1123_v6 = vpop.permute.xlu1 %1122 }
 0x1e0   : > { %v1128_v7 = vsel %vm788_vm1, %v1123_v6, 0  ;;  %v2169_v6 = vld [vmem:[#allocation7 + $0x28] sm:$0xff]  }
 0x1e3   : > { %v1121_v12 = vpop.permute.xlu1 %1120 }
 0x229   : > { %v829_v53 = vpop.f32.mrf.mxu1 }
 0x22a   : > { %v835_v54 = vsel %vm788_vm1, %v829_v53, -inf }
 0x22b   : > { %836 = vmax.xlane.f32.xlu0 %v835_v54  ;;  %v1931_v55 = vpop.f32.mrf.mxu1 }
 0x22d   : > { %v832_v56 = vpop.f32.mrf.mxu1 }
 0x22f   : > { %v1932_v57 = vpop.f32.mrf.mxu1 }
 0x2b4   : > { %v837_v58 = vpop.xlane.xlu0 %836 }
 0x2b5   : > { %v838_v59 = vsub.f32 %v829_v53, %v837_v58 }
 0x2b7   : > { %v839_v60 = vmul.f32 1.442695, %v838_v59 }
 0x2b9   : > { %2191 = vpow2.f32 %v839_v60 }
 0x2c6   : > { %v2192_v61 = vpop.eup %2191 }
 0x2c7   : > { %v841_v62 = vsel %vm788_vm1, %v2192_v61, 0.0 }
 0x2c8   : > { %842 = vadd.xlane.f32.xlu0 %v841_v62 }
 0x2de   : > { %1011 = vrot.lane.b32.xlu0 %v786_v40, %s2432_s15 }
 0x351   : > { %v843_v2 = vpop.xlane.xlu0 %842 }
 0x352   : > { %2193 = vrcp.f32 %v843_v2 }
 0x355   : > { %v1012_v4 = vpop.permute.xlu0 %1011 }
 0x356   : > { %v1017_v5 = vsel %vm788_vm1, %v1012_v4, 0  ;;  %v2167_v4 = vld [vmem:[#allocation7 + $0x38] sm:$0xff]  }
 0x357   : > { %1952 = vmatpush3.bf16.xpose.msra.mxu0 %v1017_v5  ;;  %v2168_v5 = vld [vmem:[#allocation7 + $0x30] sm:$0xff]  }
 0x358   : > { %1963 = vmatprep.subr.bf16.mxu0 %v2429_v1 }
 0x35e   : > { %1954 = vmatmul.mubr.msk.bf16.vlgmr.msra.gmra.mxu0 %vm788_vm1, %v1010_v3 }
 0x35f   : > { %v2194_v8 = vpop.eup %2193  ;;  %1964 = vmatpush3.bf16.xpose.msra.mxu0 %v1128_v7  ;;  %1965 = vmatprep.mubr.msk.bf16.mxu0 %vm2430_vm0, %v2429_v1  ;;  %v2170_v7 = vld [vmem:[#allocation7 + $0x20] sm:$0xff]  }
 0x360   : > { %v845_v9 = vmul.f32 %v2194_v8, %v2192_v61  ;;  %1975 = vmatprep.subr.bf16.mxu0 %v2429_v1  ;;  %v2171_v8 = vld [vmem:[#allocation7 + $0x18] sm:$0xff]  }
 0x362   : > { %v846_v10 = vpack.c.bf16 %v845_v9, %v845_v9  ;;  %v2172_v9 = vld [vmem:[#allocation7 + $0x10] sm:$0xff]  }
 0x364   : > { %1936 = vmatmul.mubr.msk.bf16.vlgmr.msra.gmra.mxu1 %vm788_vm1, %v846_v10  ;;  %v2173_v10 = vld [vmem:[#allocation7 + $0x8] sm:$0xff]  }
 0x365   : > { %1940 = vmatpush3.bf16.xpose.msra.mxu1 %v905_v11  ;;  %1941 = vmatprep.mubr.msk.bf16.mxu1 %vm2430_vm0, %v2429_v1 }
 0x366   : > { %1966 = vmatmul.mubr.msk.bf16.vlgmr.msra.gmra.mxu0 %vm788_vm1, %v1121_v12  ;;  %1945 = vmatprep.subr.bf16.mxu1 %v2429_v1  ;;  %v2174_v12 = vld [vmem:[#allocation7] sm:$0xff]  }
 0x367   : > { %1991 = vmatprep.mubr.msk.bf16.mxu0 %vm2430_vm0, %v2429_v1  ;;  %1976 = vmatpush3.bf16.msra.mxu0 %v2167_v4  ;;  %v2185_v4 = vld [vmem:[#allocation10 + $0x28] sm:$0xff]  }
 0x368   : > { %1977 = vmatprep.subr.bf16.mxu0 %v2429_v1 }
 0x36b   : > { %1978 = vmatpush3.bf16.msra.mxu0 %v2168_v5  ;;  %v2186_v5 = vld [vmem:[#allocation10 + $0x20] sm:$0xff]  }
 0x36c   : > { %1942 = vmatmul.mubr.msk.bf16.vlgmr.msra.gmra.mxu1 %vm788_vm1, %v897_v0  ;;  %1979 = vmatprep.subr.bf16.mxu0 %v2429_v1 }
 0x36d   : > { %1947 = vmatprep.mubr.msk.bf16.mxu1 %vm2430_vm0, %v2429_v1 }
 0x36f   : > { %1980 = vmatpush3.bf16.msra.mxu0 %v2169_v6  ;;  %v2187_v6 = vld [vmem:[#allocation10 + $0x18] sm:$0xff]  }
 0x370   : > { %1981 = vmatprep.subr.bf16.mxu0 %v2429_v1 }
 0x373   : > { %1982 = vmatpush3.bf16.msra.mxu0 %v2170_v7  ;;  %v2188_v7 = vld [vmem:[#allocation10 + $0x10] sm:$0xff]  }
 0x374   : > { %1983 = vmatprep.subr.bf16.mxu0 %v2429_v1 }
 0x377   : > { %1984 = vmatpush3.bf16.msra.mxu0 %v2171_v8  ;;  %v2189_v8 = vld [vmem:[#allocation10 + $0x8] sm:$0xff]  }
 0x378   : > { %1985 = vmatprep.subr.bf16.mxu0 %v2429_v1 }
 0x37b   : > { %1986 = vmatpush3.bf16.msra.mxu0 %v2172_v9  ;;  %v2190_v9 = vld [vmem:[#allocation10] sm:$0xff]  }
 0x37c   : > { %1987 = vmatprep.subr.bf16.mxu0 %v2429_v1 }
 0x37f   : > { %1988 = vmatpush3.bf16.msra.mxu0 %v2173_v10  ;;  %v1831_v10 = vld [vmem:[%s2868_s8] ss:$0 sm:$0xff] }
 0x380   : > { %1989 = vmatprep.subr.bf16.mxu0 %v2429_v1 }
 0x383   : > { %1990 = vmatpush3.bf16.msra.mxu0 %v2174_v12 }
 0x384   : > { %2015 = vmatprep.subr.bf16.mxu0 %v2429_v1 }
 0x41e   : > { %v1053_v13 = vpop.f32.mrf.mxu0 }
 0x41f   : > { %v1059_v14 = vsel %vm788_vm1, %v1053_v13, -inf }
 0x420   : > { %1060 = vmax.xlane.f32.xlu0 %v1059_v14  ;;  %v1955_v15 = vpop.f32.mrf.mxu0 }
 0x422   : > { %v1056_v16 = vpop.f32.mrf.mxu0 }
 0x424   : > { %v2738_v17 = vpop.f32.mrf.mxu1  ;;  %v1956_v18 = vpop.f32.mrf.mxu0 }
 0x426   : > { %v1937_v19 = vpop.f32.mrf.mxu1  ;;  %v1164_v20 = vpop.f32.mrf.mxu0 }
 0x427   : > { %v1170_v32 = vsel %vm788_vm1, %v1164_v20, -inf }
 0x428   : > { %v891_v21 = vpop.f32.mrf.mxu1  ;;  %v1967_v22 = vpop.f32.mrf.mxu0 }
 0x42a   : > { %v1938_v24 = vpop.f32.mrf.mxu1  ;;  %v1167_v25 = vpop.f32.mrf.mxu0 }
 0x42c   : > { %v941_v26 = vpop.f32.mrf.mxu1  ;;  %v1968_v27 = vpop.f32.mrf.mxu0 }
 0x42d   : > { %v947_v29 = vsel %vm788_vm1, %v941_v26, -inf }
 0x42e   : > { %948 = vmax.xlane.f32.xlu1 %v947_v29  ;;  %v1943_v30 = vpop.f32.mrf.mxu1 }
 0x430   : > { %v944_v31 = vpop.f32.mrf.mxu1 }
 0x431   : > { %v894_v31 = vpack.c.bf16 %v2738_v17, %v2738_v17 }
 0x432   : > { %1171 = vmax.xlane.f32.xlu1 %v1170_v32  ;;  %v1944_v33 = vpop.f32.mrf.mxu1 }
 0x4a9   : > { %v1061_v34 = vpop.xlane.xlu0 %1060 }
 0x4aa   : > { %v1062_v35 = vsub.f32 %v1053_v13, %v1061_v34 }
 0x4ac   : > { %v1063_v36 = vmul.f32 1.442695, %v1062_v35 }
 0x4ae   : > { %2195 = vpow2.f32 %v1063_v36 }
 0x4b7   : > { %v949_v37 = vpop.xlane.xlu1 %948 }
 0x4b8   : > { %v950_v38 = vsub.f32 %v941_v26, %v949_v37  ;;  %v1819_v37 = vld [vmem:[%s2864_s4] ss:$0 sm:$0xff] }
 0x4ba   : > { %v951_v43 = vmul.f32 1.442695, %v950_v38 }
 0x4bb   : > { %v2196_v39 = vpop.eup %2195  ;;  %v1172_v40 = vpop.xlane.xlu1 %1171 }
 0x4bc   : > { %v1173_v41 = vsub.f32 %v1164_v20, %v1172_v40  ;;  %v1065_v42 = vsel %vm788_vm1, %v2196_v39, 0.0 }
 0x4bd   : > { %1066 = vadd.xlane.f32.xlu0 %v1065_v42 }
 0x4be   : > { %v1174_v44 = vmul.f32 1.442695, %v1173_v41 }
 0x4c0   : > { %2197 = vpow2.f32 %v1174_v44  ;;  %v2176_v44 = vld [vmem:[#allocation8 + $0x30] sm:$0xff]  }
 0x4c1   : > { %2199 = vpow2.f32 %v951_v43  ;;  %v2175_v43 = vld [vmem:[#allocation8 + $0x38] sm:$0xff]  }
 0x4cd   : > { %v2198_v45 = vpop.eup %2197 }
 0x4ce   : > { %v1176_v46 = vsel %vm788_vm1, %v2198_v45, 0.0  ;;  %v2200_v47 = vpop.eup %2199 }
 0x4cf   : > { %1177 = vadd.xlane.f32.xlu1 %v1176_v46  ;;  %v953_v48 = vsel %vm788_vm1, %v2200_v47, 0.0 }
 0x4d3   : > { %960 = vrot.lane.b32.xlu0 %v2711_v49, %s2431_s9  ;;  %954 = vadd.xlane.f32.xlu1 %v953_v48  ;;  %s2437_s9 = smov [#allocation11]  }
 0x4e4   : > { %1071 = vrot.lane.b32.xlu1 %v2711_v49, %s2432_s15  ;;  %s2349_s15 = sshll.u32 %s2437_s9, 4  ;;  %s2350_s15 = int_to_ptr.vmem [resolvable:$false] %s2349_s15 }
 0x4e5   : > { %s2351_s14 = scalar_lea.vmem %s2350_s15, 256  ;;  %p2352_p12 = scmp.lt.s32.totalorder %s1664_s30, %s2350_s15 }
 0x4e6   : > { %p2353_p5 = scmp.lt.s32.totalorder %s2351_s14, %s2345_s7 }
 0x4e8   : > { %1182 = vrot.lane.b32.xlu1 %v2711_v49, %s2433_s18  ;;  %p2354_p9 = por %p2353_p5, %p2352_p12 }
 0x4ea   : > { %p2355_p11 = pnand %p2354_p9, %p2348_p0 }
 0x546   : > { %v1067_v50 = vpop.xlane.xlu0 %1066 }
 0x54a   : > { %v961_v51 = vpop.permute.xlu0 %960 }
 0x54b   : > { %v966_v52 = vsel %vm850_vm2, %v961_v51, 0  ;;  %v2177_v51 = vld [vmem:[#allocation8 + $0x28] sm:$0xff]  }
 0x54c   : > { %1946 = vmatpush3.bf16.msra.mxu1 %v966_v52  ;;  %v2178_v52 = vld [vmem:[#allocation8 + $0x20] sm:$0xff]  }
 0x54d   : > { %1957 = vmatprep.subr.bf16.mxu1 %v2429_v1 }
 0x558   : > { %v1178_v53 = vpop.xlane.xlu1 %1177 }
 0x55c   : > { %v955_v54 = vpop.xlane.xlu1 %954 }
 0x55d   : > { %2201 = vrcp.f32 %v955_v54  ;;  %v2181_v54 = vld [vmem:[#allocation8 + $0x8] sm:$0xff]  }
 0x55e   : > { %2203 = vrcp.f32 %v1067_v50 }
 0x55f   : > { %2205 = vrcp.f32 %v1178_v53  ;;  %v2179_v53 = vld [vmem:[#allocation8 + $0x18] sm:$0xff]  }
 0x560   : > { %v1072_v57 = vpop.permute.xlu1 %1071 }
 0x561   : > { %v1077_v60 = vsel %vm850_vm2, %v1072_v57, 0 }
 0x564   : > { %v1183_v61 = vpop.permute.xlu1 %1182 }
 0x565   : > { %v1188_v0 = vsel %vm850_vm2, %v1183_v61, 0  ;;  %v1830_v61 = vld [vmem:[%s2866_s6] ss:$0 sm:$0xff] }
 0x56a   : > { %v2202_v55 = vpop.eup %2201 }
 0x56b   : > { %v957_v56 = vmul.f32 %v2202_v55, %v2200_v47  ;;  %v2204_v59 = vpop.eup %2203  ;;  %v2182_v55 = vld [vmem:[#allocation8] sm:$0xff]  }
 0x56c   : > { %v1069_v49 = vmul.f32 %v2204_v59, %v2196_v39  ;;  %v2206_v63 = vpop.eup %2205 }
 0x56d   : > { %v958_v58 = vpack.c.bf16 %v957_v56, %v957_v56  ;;  %v1180_v2 = vmul.f32 %v2206_v63, %v2198_v45  ;;  %v2786_v45 = vand.u32 127, %v523_v28  ;;  %v2180_v28 = vld [vmem:[#allocation8 + $0x10] sm:$0xff]  }
 0x56e   : > { %v1070_v62 = vpack.c.bf16 %v1069_v49, %v1069_v49 }
 0x56f   : > { %1948 = vmatmul.mubr.msk.bf16.vlgmr.msra.gmra.mxu1 %vm788_vm1, %v958_v58  ;;  %v1181_v3 = vpack.c.bf16 %v1180_v2, %v1180_v2  ;;  %vm525_vm6 = vcmp.lt.s32.totalorder %v2786_v45, 32  ;;  %v2183_v2 = vld [vmem:[#allocation10 + $0x38] sm:$0xff]  }
 0x570   : > { %1958 = vmatpush3.bf16.msra.mxu1 %v1077_v60  ;;  %1959 = vmatprep.mubr.msk.bf16.mxu1 %vm2430_vm0, %v2429_v1  ;;  %v1829_v60 = vld [vmem:[%s2865_s5] ss:$0 sm:$0xff] }
 0x571   : > { %1969 = vmatprep.subr.bf16.mxu1 %v2429_v1 }
 0x577   : > { %1960 = vmatmul.mubr.msk.bf16.vlgmr.msra.gmra.mxu1 %vm788_vm1, %v1070_v62 }
 0x578   : > { %1970 = vmatpush3.bf16.msra.mxu1 %v1188_v0  ;;  %1971 = vmatprep.mubr.msk.bf16.mxu1 %vm2430_vm0, %v2429_v1 }
 0x579   : > { %1995 = vmatprep.subr.bf16.mxu1 %v2429_v1 }
 0x57f   : > { %1972 = vmatmul.mubr.msk.bf16.vlgmr.msra.gmra.mxu1 %vm788_vm1, %v1181_v3  ;;  %v2184_v3 = vld [vmem:[#allocation10 + $0x30] sm:$0xff]  }
 0x580   : > { %2011 = vmatprep.mubr.msk.bf16.mxu1 %vm2430_vm0, %v2429_v1  ;;  %1996 = vmatpush3.bf16.msra.mxu1 %v2175_v43  ;;  %v1849_v43 = vld [vmem:[%s2871_s11] ss:$0 sm:$0xff] }
 0x581   : > { %1997 = vmatprep.subr.bf16.mxu1 %v2429_v1 }
 0x584   : > { %1998 = vmatpush3.bf16.msra.mxu1 %v2176_v44 }
 0x585   : > { %1999 = vmatprep.subr.bf16.mxu1 %v2429_v1 }
 0x588   : > { %2000 = vmatpush3.bf16.msra.mxu1 %v2177_v51 }
 0x589   : > { %2001 = vmatprep.subr.bf16.mxu1 %v2429_v1 }
 0x58c   : > { %2002 = vmatpush3.bf16.msra.mxu1 %v2178_v52 }
 0x58d   : > { %2003 = vmatprep.subr.bf16.mxu1 %v2429_v1 }
 0x590   : > { %2004 = vmatpush3.bf16.msra.mxu1 %v2179_v53 }
 0x591   : > { %2005 = vmatprep.subr.bf16.mxu1 %v2429_v1 }
 0x594   : > { %2006 = vmatpush3.bf16.msra.mxu1 %v2180_v28 }
 0x595   : > { %2007 = vmatprep.subr.bf16.mxu1 %v2429_v1 }
 0x598   : > { %2008 = vmatpush3.bf16.msra.mxu1 %v2181_v54 }
 0x599   : > { %2009 = vmatprep.subr.bf16.mxu1 %v2429_v1 }
 0x59c   : > { %2010 = vmatpush3.bf16.msra.mxu1 %v2182_v55 }
 0x62f   : > { %v1002_v11 = vpop.f32.mrf.mxu1 }
 0x630   : > { %v1008_v13 = vpack.c.bf16 %v1002_v11, %v1002_v11 }
 0x631   : > { %v1949_v14 = vpop.f32.mrf.mxu1 }
 0x632   : > { %1232 = vrot.lane.b32.xlu0 %v1008_v13, %s2434_s19 }
 0x633   : > { %v1005_v15 = vpop.f32.mrf.mxu1 }
 0x635   : > { %v1950_v16 = vpop.f32.mrf.mxu1 }
 0x637   : > { %v1113_v18 = vpop.f32.mrf.mxu1 }
 0x638   : > { %v1119_v19 = vpack.c.bf16 %v1113_v18, %v1113_v18 }
 0x639   : > { %v1961_v20 = vpop.f32.mrf.mxu1 }
 0x63a   : > { %1235 = vrot.lane.b32.xlu1 %v1119_v19, %s2435_s24 }
 0x63b   : > { %v1116_v21 = vpop.f32.mrf.mxu1 }
 0x63d   : > { %v1962_v22 = vpop.f32.mrf.mxu1 }
 0x63f   : > { %v1224_v24 = vpop.f32.mrf.mxu1 }
 0x640   : > { %v1230_v25 = vpack.c.bf16 %v1224_v24, %v1224_v24 }
 0x641   : > { %v1973_v26 = vpop.f32.mrf.mxu1 }
 0x642   : > { %1238 = vrot.lane.b32.xlu0 %v1230_v25, %s2436_s29 }
 0x643   : > { %v1227_v27 = vpop.f32.mrf.mxu1 }
 0x644   : > { %v1840_v27 = vld [vmem:[%s2870_s10] ss:$0 sm:$0xff] }
 0x645   : > { %v1974_v29 = vpop.f32.mrf.mxu1 }
 0x6a4   : > { %v1233_v30 = vpop.permute.xlu0 %1232 }
 0x6a5   : > { %v1242_v33 = vsel %vm788_vm1, %v894_v31, %v1233_v30 }
 0x6ac   : > { %v1236_v32 = vpop.permute.xlu1 %1235 }
 0x6ad   : > { %v1245_v34 = vsel %vm1243_vm3, %v1242_v33, %v1236_v32 }
 0x6b4   : > { %v1239_v35 = vpop.permute.xlu0 %1238 }
 0x6b5   : > { %v1248_v36 = vsel %vm1246_vm4, %v1245_v34, %v1239_v35 }
 0x6b6   : > { %1992 = vmatmul.mubr.msk.bf16.vlgmr.msra.gmra.mxu0 %vm1249_vm5, %v1248_v36 }
 0x6b7   : > { %2031 = vmatprep.mubr.msk.bf16.mxu0 %vm2430_vm0, %v2429_v1  ;;  %2016 = vmatpush3.bf16.msra.mxu0 %v2183_v2 }
 0x6b8   : > { %2017 = vmatprep.subr.bf16.mxu0 %v2429_v1 }
 0x6bb   : > { %2018 = vmatpush3.bf16.msra.mxu0 %v2184_v3 }
 0x6bc   : > { %2019 = vmatprep.subr.bf16.mxu0 %v2429_v1 }
 0x6bf   : > { %2020 = vmatpush3.bf16.msra.mxu0 %v2185_v4 }
 0x6c0   : > { %2021 = vmatprep.subr.bf16.mxu0 %v2429_v1 }
 0x6c3   : > { %2022 = vmatpush3.bf16.msra.mxu0 %v2186_v5 }
 0x6c4   : > { %2023 = vmatprep.subr.bf16.mxu0 %v2429_v1 }
 0x6c7   : > { %2024 = vmatpush3.bf16.msra.mxu0 %v2187_v6 }
 0x6c8   : > { %2025 = vmatprep.subr.bf16.mxu0 %v2429_v1 }
 0x6cb   : > { %2026 = vmatpush3.bf16.msra.mxu0 %v2188_v7 }
 0x6cc   : > { %2027 = vmatprep.subr.bf16.mxu0 %v2429_v1 }
 0x6cf   : > { %2028 = vmatpush3.bf16.msra.mxu0 %v2189_v8 }
 0x6d0   : > { %2029 = vmatprep.subr.bf16.mxu0 %v2429_v1 }
 0x6d3   : > { %2030 = vmatpush3.bf16.msra.mxu0 %v2190_v9 }
 0x776   : > { %v1357_v38 = vpop.f32.mrf.mxu0 }
 0x777   : > { %v1358_v39 = vadd.f32 %v1819_v37, %v1357_v38 }
 0x778   : > { %v1993_v17 = vpop.f32.mrf.mxu0 }
 0x779   : > { %v1363_v40 = vadd.f32 %v1358_v39, %v2681_v23 }
 0x77a   : > { %v1360_v41 = vpop.f32.mrf.mxu0 }
 0x77b   : > { %1364 = vadd.xlane.f32.xlu1 %v1363_v40 }
 0x77c   : > { %v1994_v42 = vpop.f32.mrf.mxu0 }
 0x804   : > { %v1365_v46 = vpop.xlane.xlu1 %1364 }
 0x805   : > { %v1366_v47 = vmul.f32 0.03125, %v1365_v46  ;;  %v1850_v46 = vld [vmem:[%s2872_s12] ss:$0 sm:$0xff] }
 0x807   : > { %v1367_v48 = vsub.f32 %v1363_v40, %v1366_v47 }
 0x809   : > { %v1368_v23 = vsel %vm525_vm6, %v1367_v48, 0.0 }
 0x80a   : > { %v1369_v50 = vmul.f32 %v1368_v23, %v1368_v23 }
 0x80c   : > { %1370 = vadd.xlane.f32.xlu0 %v1369_v50 }
 0x895   : > { %v1371_v56 = vpop.xlane.xlu0 %1370 }
 0x896   : > { %v1372_v57 = vmul.f32 0.03125, %v1371_v56 }
 0x898   : > { %v1373_v58 = vadd.f32 1e-05, %v1372_v57 }
 0x89a   : > { %2207 = vrsqrt.f32 %v1373_v58 }
 0x8a7   : > { %v2208_v59 = vpop.eup %2207 }
 0x8a8   : > { %v1375_v49 = vmul.f32 %v2208_v59, %v1368_v23 }
 0x8aa   : > { %v1382_v62 = vmul.f32 %v1829_v60, %v1375_v49 }
 0x8ac   : > { %v1389_v63 = vadd.f32 %v1830_v61, %v1382_v62 }
 0x8ae   : > { %v1390_v0 = vpack.c.bf16 %v1389_v63, %v1389_v63 }
 0x8b0   : > { %2012 = vmatmul.mubr.bf16.vlgmr.msra.gmra.mxu1 %v1390_v0 }
 0x970   : > { %v1495_v11 = vpop.f32.mrf.mxu1 }
 0x971   : > { %v1496_v12 = vadd.f32 %v1831_v10, %v1495_v11 }
 0x972   : > { %v2013_v13 = vpop.f32.mrf.mxu1 }
 0x973   : > { %v1502_v14 = vmul.f32 0.044715, %v1496_v12  ;;  %v1501_v24 = vmul.f32 0.5, %v1496_v12 }
 0x974   : > { %v1498_v15 = vpop.f32.mrf.mxu1 }
 0x975   : > { %v1503_v16 = vmul.f32 %v1502_v14, %v1496_v12 }
 0x976   : > { %v2014_v18 = vpop.f32.mrf.mxu1 }
 0x977   : > { %v1504_v19 = vmul.f32 %v1503_v16, %v1496_v12 }
 0x979   : > { %v1505_v20 = vadd.f32 %v1504_v19, %v1496_v12 }
 0x97b   : > { %v1506_v21 = vmul.f32 0.7978846, %v1505_v20 }
 0x97d   : > { %2209 = vtanh.f32 %v1506_v21 }
 0x98a   : > { %v2210_v22 = vpop.eup %2209 }
 0x98b   : > { %v1508_v25 = vadd.f32 1.0, %v2210_v22 }
 0x98d   : > { %v1509_v1 = vmul.f32 %v1508_v25, %v1501_v24 }
 0x98f   : > { %v1510_v26 = vpack.c.bf16 %v1509_v1, %v1509_v1 }
 0x991   : > { %2032 = vmatmul.mubr.bf16.vlgmr.msra.gmra.mxu0 %v1510_v26 }
 0xa51   : > { %v1615_v29 = vpop.f32.mrf.mxu0 }
 0xa52   : > { %v1616_v30 = vadd.f32 %v1840_v27, %v1615_v29 }
 0xa53   : > { %v2033_v31 = vpop.f32.mrf.mxu0 }
 0xa54   : > { %v1621_v32 = vadd.f32 %v1616_v30, %v1389_v63 }
 0xa55   : > { %v1618_v33 = vpop.f32.mrf.mxu0 }
 0xa56   : > { %1622 = vadd.xlane.f32.xlu0 %v1621_v32 }
 0xa57   : > { %v2034_v34 = vpop.f32.mrf.mxu0 }
 0xadf   : > { %v1623_v35 = vpop.xlane.xlu0 %1622 }
 0xae0   : > { %v1624_v36 = vmul.f32 0.03125, %v1623_v35 }
 0xae2   : > { %v1625_v37 = vsub.f32 %v1621_v32, %v1624_v36 }
 0xae4   : > { %v1626_v38 = vsel %vm525_vm6, %v1625_v37, 0.0 }
 0xae5   : > { %v1627_v39 = vmul.f32 %v1626_v38, %v1626_v38 }
 0xae7   : > { %1628 = vadd.xlane.f32.xlu1 %v1627_v39 }
 0xb70   : > { %v1629_v17 = vpop.xlane.xlu1 %1628 }
 0xb71   : > { %v1630_v40 = vmul.f32 0.03125, %v1629_v17 }
 0xb73   : > { %v1631_v41 = vadd.f32 1e-05, %v1630_v40 }
 0xb75   : > { %2211 = vrsqrt.f32 %v1631_v41 }
 0xb82   : > { %v2212_v42 = vpop.eup %2211 }
 0xb83   : > { %v1633_v44 = vmul.f32 %v2212_v42, %v1626_v38 }
 0xb85   : > { %v1640_v45 = vmul.f32 %v1849_v43, %v1633_v44 }
 0xb87   : > { %v1647_v47 = vadd.f32 %v1850_v46, %v1640_v45 }
 0xb89   : > { %1648 = vst [vmem:[%s513_s20] sm:$0xff] %v1647_v47 }
 0xb8a   : > { %2358 = shalt.err (!%p2355_p11)
}
 0xb8b   : > { %s2359_s1 = scalar_lea.hbm %s1661_s28, 128  ;;  %s2363_s19 = scalar_lea.hbm %s2873_s13, 256 }
 0xb8c   : > { %p2360_p13 = scmp.ne.s32.totalorder %s1661_s28, %s2359_s1  ;;  %p2364_p4 = scmp.lt.s32.totalorder %s1661_s28, %s2873_s13 }
 0xb8d   : > { %p2365_p6 = scmp.lt.s32.totalorder %s2363_s19, %s2359_s1 }
 0xb8e   : > { %p2361_p1 = pnand %p2360_p13, %p2907_p7 }
 0xb8f   : > { %p2366_p2 = por %p2365_p6, %p2364_p4 }
 0xb90   : > { %p2362_p3 = pneg %p2361_p1 }
 0xb92   : > { %p2367_p8 = pnand %p2366_p2, %p2362_p3 }
 0xb94   : > { %2370 = shalt.err (!%p2367_p8)
}
 0xb95   : > { %2053 = dma.vmem_to_hbm [thread:$0]  (%p2907_p7), %s1664_s30, 128, %s1661_s28, %s1650_s3  }
 0xb96 PF: > { %s2908_s23 = sld [smem:[#allocation17_spill]]  ;;  %s1675_s20 = sand.u32 1, %s2405_s25  }
 0xb97   : > { %p2909_p10 = scmp.ne.s32.totalorder %s2899_s22, 0  ;;  %s1676_s21 = scalar_lea.sflag [#allocation4], %s1675_s20 }
 0xb9c   : > { %p2910_p0 = scmp.ge.s32.totalorder %s2908_s23, 2 }
 0xb9e   : > { %p2073_p12 = pnand %p2910_p0, %p2909_p10 }
 0xba0   : > { %p2074_p5 = pneg %p2073_p12 }
 0xba2   : > { %2400 = dma.done.wait (%p2074_p5), %s1676_s21, 128  }
 0xba3   : > { %2402 = vsyncadd (%p2074_p5), %s1676_s21, 4294967168  ;;  %s2911_s28 = sld [smem:[#allocation18_spill]]  ;;  %s2914_s25 = smov %s2409_s26 }
 0xba4   : > { %s2912_s16 = sld [smem:[#allocation16_spill]] }
 0xba5   : > { %s2913_s27 = sld [smem:[#allocation19_spill]] }
 0xba9   : > { %p28_p9 = scmp.ge.s32.totalorder %s2911_s28, 4  }
 0xbaa   : > { %s2915_s26 = smov %s2912_s16 }
 0xbab   :  { %30 = sbr.rel (!%p28_p9) target bundleno = 12 (0xc), region = 133 }
 0xbb0   :  { %1681 = vsyncpa [#allocation3], 1 }
 0xbb1   :  { %1683 = vsyncpa [#allocation3 + $0x1], 1 }
 0xbb2   :  { %1684 = vsyncpa [#allocation6], 1 }
 0xbb3   :  { %1685 = vsyncpa [#allocation9], 1 }
 0xbb4   :  { %1686 = vsyncpa [#allocation4], 1 }
 0xbb5   :  { %1688 = vsyncpa [#allocation4 + $0x1], 1 }

// kernel: tpu_custom_call.1
= control target key start
LH: loop header
LB: loop body
LE: loop exit
PB: predicated region body
PF: predicated region fallthrough
CT: control target
= control target key end

     0   :  { %s2860_s0 = inlined_call_operand.hbm [shape: f32[2,8,128], index: 0, kind: input, shape index: {}]   ;;  %s2861_s1 = inlined_call_operand.hbm [shape: bf16[128,384], index: 1, kind: input, shape index: {}]   ;;  %s2862_s2 = inlined_call_operand.vmem [shape: f32[1,384], index: 2, kind: input, shape index: {}]   ;;  %s2863_s3 = inlined_call_operand.hbm [shape: bf16[128,128], index: 3, kind: input, shape index: {}]   ;;  %s2864_s4 = inlined_call_operand.vmem [shape: f32[1,128], index: 4, kind: input, shape index: {}]   ;;  %s2865_s5 = inlined_call_operand.vmem [shape: f32[1,128], index: 5, kind: input, shape index: {}]   ;;  %s2866_s6 = inlined_call_operand.vmem [shape: f32[1,128], index: 6, kind: input, shape index: {}]   ;;  %s2867_s7 = inlined_call_operand.hbm [shape: bf16[128,128], index: 7, kind: input, shape index: {}]   ;;  %s2868_s8 = inlined_call_operand.vmem [shape: f32[1,128], index: 8, kind: input, shape index: {}]   ;;  %s2869_s9 = inlined_call_operand.hbm [shape: bf16[128,128], index: 9, kind: input, shape index: {}]   ;;  %s2870_s10 = inlined_call_operand.vmem [shape: f32[1,128], index: 10, kind: input, shape index: {}]   ;;  %s2871_s11 = inlined_call_operand.vmem [shape: f32[1,128], index: 11, kind: input, shape index: {}]   ;;  %s2872_s12 = inlined_call_operand.vmem [shape: f32[1,128], index: 12, kind: input, shape index: {}]   ;;  %s2873_s13 = inlined_call_operand.hbm [shape: f32[2,8,128], index: 13, kind: output, shape index: {}]  }
   0x1   :  { %2882 = sst [smem:[#allocation20_spill]] %s2861_s1 }
   0x2   :  { %2883 = sst [smem:[#allocation21_spill]] %s2863_s3 }
   0x3   :  { %2884 = sst [smem:[#allocation22_spill]] %s2867_s7 }
   0x4   :  { %2885 = sst [smem:[#allocation23_spill]] %s2869_s9 }
   0x5   :  { %18 = vsyncpa [#allocation3], 0 }
   0x6   :  { %20 = vsyncpa [#allocation3 + $0x1], 0 }
   0x7   :  { %21 = vsyncpa [#allocation6], 0 }
   0x8   :  { %22 = vsyncpa [#allocation9], 0 }
   0x9   :  { %23 = vsyncpa [#allocation4], 0 }
   0xa   :  { %25 = vsyncpa [#allocation4 + $0x1], 0  ;;  %s2508_s25 = smov 0   ;;  %s2510_s26 = smov 0  }
   0xb   :  { %s2512_s27 = smov 0   ;;  %s2514_s28 = smov 0  }
   0xc LB: > { %2886 = sst [smem:[#allocation16_spill]] %s2413_s27  ;;  %s2419_s29 = smov [#allocation5]   ;;  %s2417_s28 = sphi %s2514_s28, %s2911_s28   ;;  %s2413_s27 = sphi %s2512_s27, %s2913_s27   ;;  %s2409_s26 = sphi %s2510_s26, %s2915_s26   ;;  %s2405_s25 = sphi %s2508_s25, %s2914_s25  }
   0xd   : > { %2887 = sst [smem:[#allocation17_spill]] %s2417_s28  ;;  %s352_s30 = sshll.u32 %s2419_s29, 4  ;;  %s353_s30 = int_to_ptr.vmem [resolvable:$true] %s352_s30 }
   0xe   : > { %s2529_s14 = sadd.s32 4294967295, %s2417_s28   ;;  %p1772_p0 = scmp.ge.s32.totalorder %s2417_s28, 1 }
   0xf   : > { %p2875_p1 = scmp.eq.s32.totalorder %s2529_s14, 0  ;;  %p340_p2 = scmp.lt.s32.totalorder %s2417_s28, 3 }
  0x10   : > { %s2420_s17 = smov [#allocation8]   ;;  %s2421_s19 = smov [#allocation7]  }
  0x11   : > { %p2534_p3 = pnand %p1772_p0, %p340_p2  ;;  %s390_s18 = sshll.u32 %s2420_s17, 4  ;;  %s2547_s18 = int_to_ptr.vmem [resolvable:$true] %s390_s18 }
  0x12   : > { %s2549_s20 = sshll.u32 %s2421_s19, 4  ;;  %s2224_s21 = scalar_lea.vmem %s353_s30, 3072  ;;  %s369_s20 = int_to_ptr.vmem [resolvable:$true] %s2549_s20 }
  0x13   : > { %s2888_s15 = scalar_select %p2534_p3, 1, 0 }
  0x14   : > { %p2055_p5 = pneg %p2534_p3  ;;  %p2225_p8 = scmp.ne.s32.totalorder %s353_s30, %s2224_s21 }
  0x15   : > { %p2232_p11 = scmp.lt.s32.totalorder %s353_s30, %s353_s30  ;;  %p2233_p12 = scmp.lt.s32.totalorder %s2224_s21, %s2224_s21 }
  0x16   : > { %p2543_p6 = pnand %p2055_p5, %p2875_p1 }
  0x17   : > { %p2234_p13 = por %p2233_p12, %p2232_p11 }
  0x18   : > { %p2215_p7 = pneg %p2543_p6 }
  0x1a   : > { %p2227_p9 = pnand %p2225_p8, %p2215_p7 }
  0x1c   : > { %p2228_p10 = pneg %p2227_p9 }
  0x1e   : > { %p2235_p0 = pnand %p2234_p13, %p2228_p10 }
  0x20   : > { %2238 = shalt.err (!%p2235_p0)
}
  0x21   : > { %s2422_s22 = smov 192   ;;  %s2423_s23 = smov 12  }
  0x22   : > { %s2890_s1 = sld [smem:[#allocation20_spill]]  ;;  %s2250_s17 = scalar_lea.vmem %s2547_s18, 1024 }
  0x23   : > { %p2251_p2 = scmp.ne.s32.totalorder %s2547_s18, %s2250_s17  ;;  %p2258_p9 = scmp.lt.s32.totalorder %s2547_s18, %s2547_s18 }
  0x24   : > { %p2259_p10 = scmp.lt.s32.totalorder %s2250_s17, %s2250_s17 }
  0x25   : > { %p2253_p5 = pnand %p2251_p2, %p2215_p7 }
  0x26   : > { %p2260_p11 = por %p2259_p10, %p2258_p9 }
  0x27   : > { %p2254_p8 = pneg %p2253_p5 }
  0x28   : > { %2058 = dma.hbm_to_vmem [thread:$0]  (!%p2543_p6), %s2890_s1, 3072, %s353_s30, [#allocation6], %s2422_s22, %s2422_s22, %s2423_s23  }
  0x29   : > { %p2261_p12 = pnand %p2260_p11, %p2254_p8 }
  0x2b   : > { %2264 = shalt.err (!%p2261_p12)
}
  0x2c   : > { %s2424_s19 = smov 64   ;;  %s2425_s21 = smov 4  }
  0x2d   : > { %s2891_s7 = sld [smem:[#allocation22_spill]]  ;;  %s2276_s23 = scalar_lea.vmem %s369_s20, 1024 }
  0x2e   : > { %p2277_p13 = scmp.ne.s32.totalorder %s369_s20, %s2276_s23  ;;  %p2284_p5 = scmp.lt.s32.totalorder %s369_s20, %s369_s20 }
  0x2f   : > { %p2285_p8 = scmp.lt.s32.totalorder %s2276_s23, %s2276_s23 }
  0x30   : > { %p2279_p0 = pnand %p2277_p13, %p2215_p7 }
  0x31   : > { %p2286_p9 = por %p2285_p8, %p2284_p5 }
  0x32   : > { %p2280_p2 = pneg %p2279_p0 }
  0x33   : > { %2064 = dma.hbm_to_vmem [thread:$0]  (!%p2543_p6), %s2891_s7, 1024, %s2547_s18, [#allocation9], %s2424_s19, %s2424_s19, %s2425_s21  }
  0x34   : > { %p2287_p10 = pnand %p2286_p9, %p2280_p2 }
  0x36   : > { %2290 = shalt.err (!%p2287_p10)
}
  0x37   : > { %s2892_s3 = sld [smem:[#allocation21_spill]]  ;;  %s2426_s18 = smov [#allocation10]  }
  0x38   : > { %s406_s17 = sshll.u32 %s2426_s18, 4  ;;  %s407_s17 = int_to_ptr.vmem [resolvable:$true] %s406_s17 }
  0x39   : > { %s2302_s30 = scalar_lea.vmem %s407_s17, 1024  ;;  %p2310_p0 = scmp.lt.s32.totalorder %s407_s17, %s407_s17 }
  0x3a   : > { %p2303_p11 = scmp.ne.s32.totalorder %s407_s17, %s2302_s30  ;;  %p2311_p5 = scmp.lt.s32.totalorder %s2302_s30, %s2302_s30 }
  0x3c   : > { %p2305_p12 = pnand %p2303_p11, %p2215_p7  ;;  %p2312_p2 = por %p2311_p5, %p2310_p0 }
  0x3d   : > { %2061 = dma.hbm_to_vmem [thread:$0]  (!%p2543_p6), %s2892_s3, 1024, %s369_s20, [#allocation6], %s2424_s19, %s2424_s19, %s2425_s21  }
  0x3e   : > { %p2306_p13 = pneg %p2305_p12 }
  0x40   : > { %p2313_p8 = pnand %p2312_p2, %p2306_p13 }
  0x42   : > { %2316 = shalt.err (!%p2313_p8)
}
  0x43   : > { %s2893_s9 = sld [smem:[#allocation23_spill]]  ;;  %s1771_s20 = sadd.s32 4294967294, %s2417_s28  }
  0x44   : > { %s2593_s16 = sadd.s32 1, %s2417_s28   ;;  %s38_s29 = sadd.s32 1, %s2413_s27 }
  0x45   : > { %2894 = sst [smem:[#allocation18_spill]] %s2593_s16  ;;  %s35_s24 = ssub.s32 %s2417_s28, %s2593_s16 }
  0x46   : > { %p36_p7 = scmp.eq.s32.totalorder %s35_s24, 0  ;;  %p45_p9 = scmp.ne.s32.totalorder %s2413_s27, %s2409_s26 }
  0x47   : > { %p46_p10 = scmp.eq.s32.totalorder %s2417_s28, 0  ;;  %p51_p11 = scmp.ne.s32.totalorder %s2409_s26, %s2405_s25 }
  0x48   : > { %s2604_s18 = scalar_select %p36_p7, %s2413_s27, %s38_s29  }
  0x49   : > { %2067 = dma.hbm_to_vmem [thread:$0]  (!%p2543_p6), %s2893_s9, 1024, %s407_s17, [#allocation9], %s2424_s19, %s2424_s19, %s2425_s21  }
  0x4a   : > { %2895 = sst [smem:[#allocation19_spill]] %s2604_s18  ;;  %p2606_p12 = por %p46_p10, %p45_p9 }
  0x4b   : > { %p2612_p6 = por %p2875_p1, %p51_p11  ;;  %p327_p13 = scmp.eq.s32.totalorder %s2529_s14, 1 }
  0x4c   : > { %p333_p0 = scmp.eq.s32.totalorder %s1771_s20, 1  ;;  %p2080_p5 = scmp.lt.s32.totalorder %s2417_s28, 2 }
  0x4d   : > { %s2897_s19 = scalar_select %p2612_p6, 1, 0 }
  0x4e   : > { %s429_s21 = sand.u32 1, %s2413_s27   ;;  %p2619_p2 = por %p327_p13, %p45_p9 }
  0x4f   : > { %p2623_p8 = por %p333_p0, %p51_p11  ;;  %s1778_s23 = sshll.u32 %s429_s21, 3 }
  0x50   : > { %s2898_s17 = scalar_select %p2619_p2, 1, 0 }
  0x51   : > { %s2899_s22 = scalar_select %p2623_p8, 1, 0 }
  0x52   : > { %s1779_s24 = sshll.u32 %s2417_s28, 7  ;;  %s433_s20 = scalar_lea.vmem [#allocation2], %s1778_s23 }
  0x53   : > { %s2631_s3 = scalar_lea.hbm %s2860_s0, %s1779_s24  ;;  %s440_s7 = sshll.u32 %s433_s20, 4  ;;  %s441_s7 = int_to_ptr.vmem [resolvable:$true] %s440_s7 }
  0x54   : > { %p2635_p7 = pnand %p2080_p5, %p2606_p12  ;;  %s430_s18 = scalar_lea.sflag [#allocation3], %s429_s21 }
  0x55   : > { %s2317_s27 = scalar_lea.hbm %s2631_s3, 128  ;;  %s2322_s29 = scalar_lea.hbm %s2860_s0, 256 }
  0x56   : > { %p2318_p9 = scmp.ne.s32.totalorder %s2631_s3, %s2317_s27  ;;  %p2319_p10 = pneg %p2635_p7 }
  0x57   : > { %p2323_p0 = scmp.lt.s32.totalorder %s2631_s3, %s2860_s0  ;;  %p2324_p12 = scmp.lt.s32.totalorder %s2322_s29, %s2317_s27 }
  0x58   : > { %p2320_p11 = pnand %p2319_p10, %p2318_p9 }
  0x59   : > { %p2325_p5 = por %p2324_p12, %p2323_p0 }
  0x5a   : > { %p2321_p13 = pneg %p2320_p11 }
  0x5c   : > { %p2326_p4 = pnand %p2325_p5, %p2321_p13 }
  0x5e   : > { %2329 = shalt.err (!%p2326_p4)
}
  0x5f   : > { %s2330_s30 = scalar_lea.vmem %s441_s7, 128  ;;  %s2427_s21 = smov [#allocation2]  }
  0x60   : > { %p2331_p1 = scmp.ne.s32.totalorder %s441_s7, %s2330_s30  ;;  %s2335_s16 = sshll.u32 %s2427_s21, 4  ;;  %s2336_s16 = int_to_ptr.vmem [resolvable:$false] %s2335_s16 }
  0x61   : > { %s2337_s28 = scalar_lea.vmem %s2336_s16, 256  ;;  %p2338_p9 = scmp.lt.s32.totalorder %s441_s7, %s2336_s16 }
  0x62   : > { %p2333_p8 = pnand %p2331_p1, %p2319_p10  ;;  %p2339_p11 = scmp.lt.s32.totalorder %s2337_s28, %s2330_s30 }
  0x64   : > { %p2334_p2 = pneg %p2333_p8  ;;  %p2340_p6 = por %p2339_p11, %p2338_p9 }
  0x66   : > { %p2341_p3 = pnand %p2340_p6, %p2334_p2 }
  0x68   : > { %2344 = shalt.err (!%p2341_p3)
}
  0x69   : > { %2071 = dma.hbm_to_vmem [thread:$0]  (!%p2635_p7), %s2631_s3, 128, %s441_s7, %s430_s18  }
  0x6a   : > { %p2901_p13 = scmp.ne.s32.totalorder %s2888_s15, 0 }
  0x6b   : > { %s2656_s27 = sand.u32 (!%p2901_p13), 1, %s2409_s26   ;;  %p2902_p1 = scmp.ne.s32.totalorder (!%p2901_p13), %s2897_s19, 0 }
  0x6c   : > { %449 = sbr.rel (%p2901_p13) target bundleno = 2966 (0xb96), region = 72  ;;  %s1781_s1 = sshll.u32 (!%p2901_p13), %s2656_s27, 3 }
  0x6d   : > { %s452_s16 = scalar_lea.sflag (!%p2901_p13), [#allocation3], %s2656_s27  ;;  %s2662_s28 = scalar_lea.vmem (!%p2901_p13), [#allocation2], %s1781_s1 }
  0x71   : > { %2388 = dma.done.wait (%p2902_p1), %s452_s16, 128  }
  0x72   : > { %2390 = vsyncadd (%p2902_p1), %s452_s16, 4294967168  ;;  %p2903_p3 = scmp.eq.s32.totalorder %s2529_s14, 0 }
  0x74   : > { %2392 = dma.done.wait (%p2903_p3), [#allocation6], 4096   ;;  %p2904_p4 = pmov %p2903_p3 }
  0x75   : > { %p2905_p6 = pmov %p2903_p3 }
  0x76   : > { %2394 = vsyncadd (%p2904_p4), [#allocation6], 4294963200 }
  0x77   : > { %2396 = dma.done.wait (%p2905_p6), [#allocation9], 2048   ;;  %p2906_p2 = pmov %p2903_p3 }
  0x78   : > { %v2428_v0 = vmov 0   ;;  %v2429_v1 = vmov 0.0   ;;  %v2135_v2 = vld [vmem:[#allocation5 + $0xac] ss:$12 sps:$4 sm:$0xff]   ;;  %v2137_v3 = vld [vmem:[#allocation5 + $0xa8] ss:$12 sps:$4 sm:$0xff]   ;;  %v523_v28 = vlaneseq }
  0x79   : > { %2398 = vsyncadd (%p2906_p2), [#allocation9], 4294965248  ;;  %736 = vmatprep.mubr.bf16.mxu0 %v2428_v0  ;;  %1907 = vmatprep.subr.bf16.mxu1 %v2429_v1  ;;  %v2138_v4 = vld [vmem:[#allocation5 + $0x94] ss:$12 sps:$4 sm:$0xff]   ;;  %v2140_v5 = vld [vmem:[#allocation5 + $0x90] ss:$12 sps:$4 sm:$0xff]  }
  0x7a   : > { %704 = vmatprep.subr.bf16.mxu0 %v2135_v2  ;;  %v2141_v6 = vld [vmem:[#allocation5 + $0x7c] ss:$12 sps:$4 sm:$0xff]   ;;  %v2143_v7 = vld [vmem:[#allocation5 + $0x78] ss:$12 sps:$4 sm:$0xff]   ;;  %v2146_v9 = vld [vmem:[#allocation5 + $0x60] ss:$12 sps:$4 sm:$0xff]  }
  0x7b   : > { %705 = vmatpush1.bf16.msra.mxu0 %v2137_v3  ;;  %v2144_v8 = vld [vmem:[#allocation5 + $0x64] ss:$12 sps:$4 sm:$0xff]   ;;  %v2147_v11 = vld [vmem:[#allocation5 + $0x4c] ss:$12 sps:$4 sm:$0xff]   ;;  %v2149_v13 = vld [vmem:[#allocation5 + $0x48] ss:$12 sps:$4 sm:$0xff]  }
  0x7c   : > { %706 = vmatprep.subr.bf16.mxu0 %v2138_v4  ;;  %v2159_v10 = vld [vmem:[#allocation5 + $0xb0] ss:$12 sps:$4 sm:$0xff]   ;;  %v2160_v12 = vld [vmem:[#allocation5 + $0x98] ss:$12 sps:$4 sm:$0xff]   ;;  %v2150_v14 = vld [vmem:[#allocation5 + $0x34] ss:$12 sps:$4 sm:$0xff]  }
  0x7d   : > { %1908 = vmatpush3.bf16.msra.mxu1 %v2159_v10  ;;  %v2152_v15 = vld [vmem:[#allocation5 + $0x30] ss:$12 sps:$4 sm:$0xff]   ;;  %v2161_v16 = vld [vmem:[#allocation5 + $0x80] ss:$12 sps:$4 sm:$0xff]   ;;  %v2162_v18 = vld [vmem:[#allocation5 + $0x68] ss:$12 sps:$4 sm:$0xff]  }
  0x7e   : > { %1909 = vmatprep.subr.bf16.mxu1 %v2429_v1  ;;  %v2153_v17 = vld [vmem:[#allocation5 + $0x1c] ss:$12 sps:$4 sm:$0xff]   ;;  %v2155_v19 = vld [vmem:[#allocation5 + $0x18] ss:$12 sps:$4 sm:$0xff]   ;;  %v2158_v22 = vld [vmem:[#allocation5] ss:$12 sps:$4 sm:$0xff]  }
  0x7f   : > { %707 = vmatpush1.bf16.msra.mxu0 %v2140_v5  ;;  %v2156_v20 = vld [vmem:[#allocation5 + $0x4] ss:$12 sps:$4 sm:$0xff]   ;;  %v2165_v26 = vld [vmem:[#allocation5 + $0x20] ss:$12 sps:$4 sm:$0xff]   ;;  %v2166_v27 = vld [vmem:[#allocation5 + $0x8] ss:$12 sps:$4 sm:$0xff]  }
  0x80   : > { %708 = vmatprep.subr.bf16.mxu0 %v2141_v6  ;;  %v2163_v21 = vld [vmem:[#allocation5 + $0x50] ss:$12 sps:$4 sm:$0xff]   ;;  %v2164_v24 = vld [vmem:[#allocation5 + $0x38] ss:$12 sps:$4 sm:$0xff]   ;;  %vm2430_vm0 = vmmov 0   ;;  %v562_v29 = vshrl.u32 %v523_v28, 7 }
  0x81   : > { %1910 = vmatpush3.bf16.msra.mxu1 %v2160_v12  ;;  %v2681_v23 = vld [vmem:[%s2662_s28] sm:$0xff]  ;;  %1923 = vmatprep.mubr.msk.bf16.mxu1 %vm2430_vm0, %v2429_v1  ;;  %vm788_vm1 = vcmask 64512   ;;  %s2431_s9 = smov 120   ;;  %s2432_s15 = smov 112   ;;  %vm850_vm2 = vcmask 1043456   ;;  %vm1243_vm3 = vcmask 130048  }
  0x82   : > { %1911 = vmatprep.subr.bf16.mxu1 %v2429_v1  ;;  %v527_v25 = vpack.c.bf16 %v2681_v23, %v2681_v23  ;;  %v567_v30 = vsub.s32 1, %v562_v29  ;;  %v563_v31 = vsub.s32 0, %v562_v29  ;;  %v515_v32 = vld [vmem:[%s2862_s2] sm:$0x7]  ;;  %s2433_s18 = smov 104   ;;  %v571_v44 = vsub.s32 2, %v562_v29 }
  0x83   : > { %709 = vmatpush1.bf16.msra.mxu0 %v2143_v7  ;;  %s2434_s19 = smov 8   ;;  %s2435_s24 = smov 16   ;;  %vm1246_vm4 = vcmask 195584   ;;  %vm1249_vm5 = vcmask 261120  }
  0x84   : > { %710 = vmatprep.subr.bf16.mxu0 %v2144_v8  ;;  %v568_v33 = vrot.slane %v515_v32, %v567_v30  ;;  %v564_v35 = vrot.slane %v515_v32, %v563_v31  ;;  %v572_v45 = vrot.slane %v515_v32, %v571_v44  ;;  %s2436_s29 = smov 24   ;;  %s1852_s23 = sshll.u32 %s2529_s14, 7 }
  0x85   : > { %1912 = vmatpush3.bf16.msra.mxu1 %v2161_v16  ;;  %s513_s20 = scalar_lea.vmem [#allocation11], %s1781_s1  ;;  %s1661_s28 = scalar_lea.hbm %s2873_s13, %s1852_s23 }
  0x86   : > { %1913 = vmatprep.subr.bf16.mxu1 %v2429_v1  ;;  %s1663_s30 = sshll.u32 %s513_s20, 4  ;;  %s1650_s3 = scalar_lea.sflag [#allocation4], %s2656_s27  ;;  %s1664_s30 = int_to_ptr.vmem [resolvable:$true] %s1663_s30 }
  0x87   : > { %711 = vmatpush1.bf16.msra.mxu0 %v2146_v9  ;;  %s2345_s7 = scalar_lea.vmem %s1664_s30, 128  ;;  %p2907_p7 = scmp.ne.s32.totalorder %s2898_s17, 0 }
  0x88   : > { %712 = vmatprep.subr.bf16.mxu0 %v2147_v11  ;;  %p2346_p8 = scmp.ne.s32.totalorder %s1664_s30, %s2345_s7 }
  0x89   : > { %1914 = vmatpush3.bf16.msra.mxu1 %v2162_v18 }
  0x8a   : > { %1915 = vmatprep.subr.bf16.mxu1 %v2429_v1  ;;  %p2347_p10 = pnand %p2346_p8, %p2907_p7 }
  0x8b   : > { %713 = vmatpush1.bf16.msra.mxu0 %v2149_v13 }
  0x8c   : > { %714 = vmatprep.subr.bf16.mxu0 %v2150_v14  ;;  %p2348_p0 = pneg %p2347_p10 }
  0x8d   : > { %1916 = vmatpush3.bf16.msra.mxu1 %v2163_v21 }
  0x8e   : > { %1917 = vmatprep.subr.bf16.mxu1 %v2429_v1 }
  0x8f   : > { %715 = vmatpush1.bf16.msra.mxu0 %v2152_v15 }
  0x90   : > { %716 = vmatprep.subr.bf16.mxu0 %v2153_v17 }
  0x91   : > { %1918 = vmatpush3.bf16.msra.mxu1 %v2164_v24 }
  0x92   : > { %1919 = vmatprep.subr.bf16.mxu1 %v2429_v1 }
  0x93   : > { %717 = vmatpush1.bf16.msra.mxu0 %v2155_v19 }
  0x94   : > { %718 = vmatprep.subr.bf16.mxu0 %v2156_v20 }
  0x95   : > { %1920 = vmatpush3.bf16.msra.mxu1 %v2165_v26 }
  0x96   : > { %1921 = vmatprep.subr.bf16.mxu1 %v2429_v1 }
  0x97   : > { %719 = vmatpush1.bf16.msra.mxu0 %v2158_v22 }
  0x98   : > { %1951 = vmatprep.subr.bf16.mxu0 %v2429_v1 }
  0x99   : > { %1922 = vmatpush3.bf16.msra.mxu1 %v2166_v27 }
  0x9a   : > { %737 = vmatmul.mubr.bf16.vlgmr.msra.gmra.mxu0 %v527_v25  ;;  %1927 = vmatprep.subr.bf16.mxu1 %v2429_v1 }
  0x9b   : > { %1953 = vmatprep.mubr.msk.bf16.mxu0 %vm2430_vm0, %v2429_v1 }
  0x9c   : > { %1924 = vmatmul.mubr.bf16.vlgmr.msra.gmra.mxu1 %v527_v25 }
  0x9d   : > { %1929 = vmatprep.mubr.msk.bf16.mxu1 %vm2430_vm0, %v2429_v1 }
 0x15a   : > { %v738_v34 = vpop.f32.mrf.mxu0 }
 0x15b   : > { %v739_v39 = vadd.f32 %v738_v34, %v564_v35 }
 0x15c   : > { %v740_v36 = vpop.f32.mrf.mxu0  ;;  %v779_v46 = vpop.f32.mrf.mxu1 }
 0x15d   : > { %v741_v37 = vadd.f32 %v740_v36, %v568_v33  ;;  %v785_v43 = vpack.c.bf16 %v739_v39, %v739_v39  ;;  %v780_v47 = vadd.f32 %v779_v46, %v572_v45 }
 0x15e   : > { %v742_v38 = vpop.f32.mrf.mxu0  ;;  %v1925_v48 = vpop.f32.mrf.mxu1 }
 0x15f   : > { %v786_v40 = vpack.c.bf16 %v741_v37, %v741_v37  ;;  %v2711_v49 = vpack.c.bf16 %v780_v47, %v780_v47 }
 0x160   : > { %v743_v41 = vpop.f32.mrf.mxu0  ;;  %v782_v50 = vpop.f32.mrf.mxu1 }
 0x161   : > { %899 = vrot.lane.b32.xlu1 %v786_v40, %s2431_s9  ;;  %v793_v42 = vsel %vm788_vm1, %v786_v40, 0  ;;  %v852_v51 = vsel %vm850_vm2, %v2711_v49, 0 }
 0x162   : > { %1928 = vmatpush3.bf16.xpose.msra.mxu1 %v793_v42  ;;  %v1926_v52 = vpop.f32.mrf.mxu1 }
 0x163   : > { %1933 = vmatprep.subr.bf16.mxu1 %v2429_v1 }
 0x165   : > { %896 = vrot.lane.b32.xlu1 %v785_v43, %s2431_s9 }
 0x169   : > { %1009 = vrot.lane.b32.xlu1 %v785_v43, %s2432_s15  ;;  %1930 = vmatmul.mubr.msk.bf16.vlgmr.msra.gmra.mxu1 %vm788_vm1, %v785_v43 }
 0x16a   : > { %1935 = vmatprep.mubr.msk.bf16.mxu1 %vm2430_vm0, %v2429_v1  ;;  %1934 = vmatpush3.bf16.msra.mxu1 %v852_v51 }
 0x16b   : > { %1939 = vmatprep.subr.bf16.mxu1 %v2429_v1 }
 0x16d   : > { %1122 = vrot.lane.b32.xlu1 %v786_v40, %s2433_s18 }
 0x171   : > { %1120 = vrot.lane.b32.xlu1 %v785_v43, %s2433_s18 }
 0x1d3   : > { %v900_v63 = vpop.permute.xlu1 %899 }
 0x1d4   : > { %v905_v11 = vsel %vm788_vm1, %v900_v63, 0 }
 0x1d7   : > { %v897_v0 = vpop.permute.xlu1 %896 }
 0x1db   : > { %v1010_v3 = vpop.permute.xlu1 %1009 }
 0x1df   : > { %v1123_v6 = vpop.permute.xlu1 %1122 }
 0x1e0   : > { %v1128_v7 = vsel %vm788_vm1, %v1123_v6, 0  ;;  %v2169_v6 = vld [vmem:[#allocation7 + $0x28] sm:$0xff]  }
 0x1e3   : > { %v1121_v12 = vpop.permute.xlu1 %1120 }
 0x229   : > { %v829_v53 = vpop.f32.mrf.mxu1 }
 0x22a   : > { %v835_v54 = vsel %vm788_vm1, %v829_v53, -inf }
 0x22b   : > { %836 = vmax.xlane.f32.xlu0 %v835_v54  ;;  %v1931_v55 = vpop.f32.mrf.mxu1 }
 0x22d   : > { %v832_v56 = vpop.f32.mrf.mxu1 }
 0x22f   : > { %v1932_v57 = vpop.f32.mrf.mxu1 }
 0x2b4   : > { %v837_v58 = vpop.xlane.xlu0 %836 }
 0x2b5   : > { %v838_v59 = vsub.f32 %v829_v53, %v837_v58 }
 0x2b7   : > { %v839_v60 = vmul.f32 1.442695, %v838_v59 }
 0x2b9   : > { %2191 = vpow2.f32 %v839_v60 }
 0x2c6   : > { %v2192_v61 = vpop.eup %2191 }
 0x2c7   : > { %v841_v62 = vsel %vm788_vm1, %v2192_v61, 0.0 }
 0x2c8   : > { %842 = vadd.xlane.f32.xlu0 %v841_v62 }
 0x2de   : > { %1011 = vrot.lane.b32.xlu0 %v786_v40, %s2432_s15 }
 0x351   : > { %v843_v2 = vpop.xlane.xlu0 %842 }
 0x352   : > { %2193 = vrcp.f32 %v843_v2 }
 0x355   : > { %v1012_v4 = vpop.permute.xlu0 %1011 }
 0x356   : > { %v1017_v5 = vsel %vm788_vm1, %v1012_v4, 0  ;;  %v2167_v4 = vld [vmem:[#allocation7 + $0x38] sm:$0xff]  }
 0x357   : > { %1952 = vmatpush3.bf16.xpose.msra.mxu0 %v1017_v5  ;;  %v2168_v5 = vld [vmem:[#allocation7 + $0x30] sm:$0xff]  }
 0x358   : > { %1963 = vmatprep.subr.bf16.mxu0 %v2429_v1 }
 0x35e   : > { %1954 = vmatmul.mubr.msk.bf16.vlgmr.msra.gmra.mxu0 %vm788_vm1, %v1010_v3 }
 0x35f   : > { %v2194_v8 = vpop.eup %2193  ;;  %1964 = vmatpush3.bf16.xpose.msra.mxu0 %v1128_v7  ;;  %1965 = vmatprep.mubr.msk.bf16.mxu0 %vm2430_vm0, %v2429_v1  ;;  %v2170_v7 = vld [vmem:[#allocation7 + $0x20] sm:$0xff]  }
 0x360   : > { %v845_v9 = vmul.f32 %v2194_v8, %v2192_v61  ;;  %1975 = vmatprep.subr.bf16.mxu0 %v2429_v1  ;;  %v2171_v8 = vld [vmem:[#allocation7 + $0x18] sm:$0xff]  }
 0x362   : > { %v846_v10 = vpack.c.bf16 %v845_v9, %v845_v9  ;;  %v2172_v9 = vld [vmem:[#allocation7 + $0x10] sm:$0xff]  }
 0x364   : > { %1936 = vmatmul.mubr.msk.bf16.vlgmr.msra.gmra.mxu1 %vm788_vm1, %v846_v10  ;;  %v2173_v10 = vld [vmem:[#allocation7 + $0x8] sm:$0xff]  }
 0x365   : > { %1940 = vmatpush3.bf16.xpose.msra.mxu1 %v905_v11  ;;  %1941 = vmatprep.mubr.msk.bf16.mxu1 %vm2430_vm0, %v2429_v1 }
 0x366   : > { %1966 = vmatmul.mubr.msk.bf16.vlgmr.msra.gmra.mxu0 %vm788_vm1, %v1121_v12  ;;  %1945 = vmatprep.subr.bf16.mxu1 %v2429_v1  ;;  %v2174_v12 = vld [vmem:[#allocation7] sm:$0xff]  }
 0x367   : > { %1991 = vmatprep.mubr.msk.bf16.mxu0 %vm2430_vm0, %v2429_v1  ;;  %1976 = vmatpush3.bf16.msra.mxu0 %v2167_v4  ;;  %v2185_v4 = vld [vmem:[#allocation10 + $0x28] sm:$0xff]  }
 0x368   : > { %1977 = vmatprep.subr.bf16.mxu0 %v2429_v1 }
 0x36b   : > { %1978 = vmatpush3.bf16.msra.mxu0 %v2168_v5  ;;  %v2186_v5 = vld [vmem:[#allocation10 + $0x20] sm:$0xff]  }
 0x36c   : > { %1942 = vmatmul.mubr.msk.bf16.vlgmr.msra.gmra.mxu1 %vm788_vm1, %v897_v0  ;;  %1979 = vmatprep.subr.bf16.mxu0 %v2429_v1 }
 0x36d   : > { %1947 = vmatprep.mubr.msk.bf16.mxu1 %vm2430_vm0, %v2429_v1 }
 0x36f   : > { %1980 = vmatpush3.bf16.msra.mxu0 %v2169_v6  ;;  %v2187_v6 = vld [vmem:[#allocation10 + $0x18] sm:$0xff]  }
 0x370   : > { %1981 = vmatprep.subr.bf16.mxu0 %v2429_v1 }
 0x373   : > { %1982 = vmatpush3.bf16.msra.mxu0 %v2170_v7  ;;  %v2188_v7 = vld [vmem:[#allocation10 + $0x10] sm:$0xff]  }
 0x374   : > { %1983 = vmatprep.subr.bf16.mxu0 %v2429_v1 }
 0x377   : > { %1984 = vmatpush3.bf16.msra.mxu0 %v2171_v8  ;;  %v2189_v8 = vld [vmem:[#allocation10 + $0x8] sm:$0xff]  }
 0x378   : > { %1985 = vmatprep.subr.bf16.mxu0 %v2429_v1 }
 0x37b   : > { %1986 = vmatpush3.bf16.msra.mxu0 %v2172_v9  ;;  %v2190_v9 = vld [vmem:[#allocation10] sm:$0xff]  }
 0x37c   : > { %1987 = vmatprep.subr.bf16.mxu0 %v2429_v1 }
 0x37f   : > { %1988 = vmatpush3.bf16.msra.mxu0 %v2173_v10  ;;  %v1831_v10 = vld [vmem:[%s2868_s8] ss:$0 sm:$0xff] }
 0x380   : > { %1989 = vmatprep.subr.bf16.mxu0 %v2429_v1 }
 0x383   : > { %1990 = vmatpush3.bf16.msra.mxu0 %v2174_v12 }
 0x384   : > { %2015 = vmatprep.subr.bf16.mxu0 %v2429_v1 }
 0x41e   : > { %v1053_v13 = vpop.f32.mrf.mxu0 }
 0x41f   : > { %v1059_v14 = vsel %vm788_vm1, %v1053_v13, -inf }
 0x420   : > { %1060 = vmax.xlane.f32.xlu0 %v1059_v14  ;;  %v1955_v15 = vpop.f32.mrf.mxu0 }
 0x422   : > { %v1056_v16 = vpop.f32.mrf.mxu0 }
 0x424   : > { %v2738_v17 = vpop.f32.mrf.mxu1  ;;  %v1956_v18 = vpop.f32.mrf.mxu0 }
 0x426   : > { %v1937_v19 = vpop.f32.mrf.mxu1  ;;  %v1164_v20 = vpop.f32.mrf.mxu0 }
 0x427   : > { %v1170_v32 = vsel %vm788_vm1, %v1164_v20, -inf }
 0x428   : > { %v891_v21 = vpop.f32.mrf.mxu1  ;;  %v1967_v22 = vpop.f32.mrf.mxu0 }
 0x42a   : > { %v1938_v24 = vpop.f32.mrf.mxu1  ;;  %v1167_v25 = vpop.f32.mrf.mxu0 }
 0x42c   : > { %v941_v26 = vpop.f32.mrf.mxu1  ;;  %v1968_v27 = vpop.f32.mrf.mxu0 }
 0x42d   : > { %v947_v29 = vsel %vm788_vm1, %v941_v26, -inf }
 0x42e   : > { %948 = vmax.xlane.f32.xlu1 %v947_v29  ;;  %v1943_v30 = vpop.f32.mrf.mxu1 }
 0x430   : > { %v944_v31 = vpop.f32.mrf.mxu1 }
 0x431   : > { %v894_v31 = vpack.c.bf16 %v2738_v17, %v2738_v17 }
 0x432   : > { %1171 = vmax.xlane.f32.xlu1 %v1170_v32  ;;  %v1944_v33 = vpop.f32.mrf.mxu1 }
 0x4a9   : > { %v1061_v34 = vpop.xlane.xlu0 %1060 }
 0x4aa   : > { %v1062_v35 = vsub.f32 %v1053_v13, %v1061_v34 }
 0x4ac   : > { %v1063_v36 = vmul.f32 1.442695, %v1062_v35 }
 0x4ae   : > { %2195 = vpow2.f32 %v1063_v36 }
 0x4b7   : > { %v949_v37 = vpop.xlane.xlu1 %948 }
 0x4b8   : > { %v950_v38 = vsub.f32 %v941_v26, %v949_v37  ;;  %v1819_v37 = vld [vmem:[%s2864_s4] ss:$0 sm:$0xff] }
 0x4ba   : > { %v951_v43 = vmul.f32 1.442695, %v950_v38 }
 0x4bb   : > { %v2196_v39 = vpop.eup %2195  ;;  %v1172_v40 = vpop.xlane.xlu1 %1171 }
 0x4bc   : > { %v1173_v41 = vsub.f32 %v1164_v20, %v1172_v40  ;;  %v1065_v42 = vsel %vm788_vm1, %v2196_v39, 0.0 }
 0x4bd   : > { %1066 = vadd.xlane.f32.xlu0 %v1065_v42 }
 0x4be   : > { %v1174_v44 = vmul.f32 1.442695, %v1173_v41 }
 0x4c0   : > { %2197 = vpow2.f32 %v1174_v44  ;;  %v2176_v44 = vld [vmem:[#allocation8 + $0x30] sm:$0xff]  }
 0x4c1   : > { %2199 = vpow2.f32 %v951_v43  ;;  %v2175_v43 = vld [vmem:[#allocation8 + $0x38] sm:$0xff]  }
 0x4cd   : > { %v2198_v45 = vpop.eup %2197 }
 0x4ce   : > { %v1176_v46 = vsel %vm788_vm1, %v2198_v45, 0.0  ;;  %v2200_v47 = vpop.eup %2199 }
 0x4cf   : > { %1177 = vadd.xlane.f32.xlu1 %v1176_v46  ;;  %v953_v48 = vsel %vm788_vm1, %v2200_v47, 0.0 }
 0x4d3   : > { %960 = vrot.lane.b32.xlu0 %v2711_v49, %s2431_s9  ;;  %954 = vadd.xlane.f32.xlu1 %v953_v48  ;;  %s2437_s9 = smov [#allocation11]  }
 0x4e4   : > { %1071 = vrot.lane.b32.xlu1 %v2711_v49, %s2432_s15  ;;  %s2349_s15 = sshll.u32 %s2437_s9, 4  ;;  %s2350_s15 = int_to_ptr.vmem [resolvable:$false] %s2349_s15 }
 0x4e5   : > { %s2351_s14 = scalar_lea.vmem %s2350_s15, 256  ;;  %p2352_p12 = scmp.lt.s32.totalorder %s1664_s30, %s2350_s15 }
 0x4e6   : > { %p2353_p5 = scmp.lt.s32.totalorder %s2351_s14, %s2345_s7 }
 0x4e8   : > { %1182 = vrot.lane.b32.xlu1 %v2711_v49, %s2433_s18  ;;  %p2354_p9 = por %p2353_p5, %p2352_p12 }
 0x4ea   : > { %p2355_p11 = pnand %p2354_p9, %p2348_p0 }
 0x546   : > { %v1067_v50 = vpop.xlane.xlu0 %1066 }
 0x54a   : > { %v961_v51 = vpop.permute.xlu0 %960 }
 0x54b   : > { %v966_v52 = vsel %vm850_vm2, %v961_v51, 0  ;;  %v2177_v51 = vld [vmem:[#allocation8 + $0x28] sm:$0xff]  }
 0x54c   : > { %1946 = vmatpush3.bf16.msra.mxu1 %v966_v52  ;;  %v2178_v52 = vld [vmem:[#allocation8 + $0x20] sm:$0xff]  }
 0x54d   : > { %1957 = vmatprep.subr.bf16.mxu1 %v2429_v1 }
 0x558   : > { %v1178_v53 = vpop.xlane.xlu1 %1177 }
 0x55c   : > { %v955_v54 = vpop.xlane.xlu1 %954 }
 0x55d   : > { %2201 = vrcp.f32 %v955_v54  ;;  %v2181_v54 = vld [vmem:[#allocation8 + $0x8] sm:$0xff]  }
 0x55e   : > { %2203 = vrcp.f32 %v1067_v50 }
 0x55f   : > { %2205 = vrcp.f32 %v1178_v53  ;;  %v2179_v53 = vld [vmem:[#allocation8 + $0x18] sm:$0xff]  }
 0x560   : > { %v1072_v57 = vpop.permute.xlu1 %1071 }
 0x561   : > { %v1077_v60 = vsel %vm850_vm2, %v1072_v57, 0 }
 0x564   : > { %v1183_v61 = vpop.permute.xlu1 %1182 }
 0x565   : > { %v1188_v0 = vsel %vm850_vm2, %v1183_v61, 0  ;;  %v1830_v61 = vld [vmem:[%s2866_s6] ss:$0 sm:$0xff] }
 0x56a   : > { %v2202_v55 = vpop.eup %2201 }
 0x56b   : > { %v957_v56 = vmul.f32 %v2202_v55, %v2200_v47  ;;  %v2204_v59 = vpop.eup %2203  ;;  %v2182_v55 = vld [vmem:[#allocation8] sm:$0xff]  }
 0x56c   : > { %v1069_v49 = vmul.f32 %v2204_v59, %v2196_v39  ;;  %v2206_v63 = vpop.eup %2205 }
 0x56d   : > { %v958_v58 = vpack.c.bf16 %v957_v56, %v957_v56  ;;  %v1180_v2 = vmul.f32 %v2206_v63, %v2198_v45  ;;  %v2786_v45 = vand.u32 127, %v523_v28  ;;  %v2180_v28 = vld [vmem:[#allocation8 + $0x10] sm:$0xff]  }
 0x56e   : > { %v1070_v62 = vpack.c.bf16 %v1069_v49, %v1069_v49 }
 0x56f   : > { %1948 = vmatmul.mubr.msk.bf16.vlgmr.msra.gmra.mxu1 %vm788_vm1, %v958_v58  ;;  %v1181_v3 = vpack.c.bf16 %v1180_v2, %v1180_v2  ;;  %vm525_vm6 = vcmp.lt.s32.totalorder %v2786_v45, 32  ;;  %v2183_v2 = vld [vmem:[#allocation10 + $0x38] sm:$0xff]  }
 0x570   : > { %1958 = vmatpush3.bf16.msra.mxu1 %v1077_v60  ;;  %1959 = vmatprep.mubr.msk.bf16.mxu1 %vm2430_vm0, %v2429_v1  ;;  %v1829_v60 = vld [vmem:[%s2865_s5] ss:$0 sm:$0xff] }
 0x571   : > { %1969 = vmatprep.subr.bf16.mxu1 %v2429_v1 }
 0x577   : > { %1960 = vmatmul.mubr.msk.bf16.vlgmr.msra.gmra.mxu1 %vm788_vm1, %v1070_v62 }
 0x578   : > { %1970 = vmatpush3.bf16.msra.mxu1 %v1188_v0  ;;  %1971 = vmatprep.mubr.msk.bf16.mxu1 %vm2430_vm0, %v2429_v1 }
 0x579   : > { %1995 = vmatprep.subr.bf16.mxu1 %v2429_v1 }
 0x57f   : > { %1972 = vmatmul.mubr.msk.bf16.vlgmr.msra.gmra.mxu1 %vm788_vm1, %v1181_v3  ;;  %v2184_v3 = vld [vmem:[#allocation10 + $0x30] sm:$0xff]  }
 0x580   : > { %2011 = vmatprep.mubr.msk.bf16.mxu1 %vm2430_vm0, %v2429_v1  ;;  %1996 = vmatpush3.bf16.msra.mxu1 %v2175_v43  ;;  %v1849_v43 = vld [vmem:[%s2871_s11] ss:$0 sm:$0xff] }
 0x581   : > { %1997 = vmatprep.subr.bf16.mxu1 %v2429_v1 }
 0x584   : > { %1998 = vmatpush3.bf16.msra.mxu1 %v2176_v44 }
 0x585   : > { %1999 = vmatprep.subr.bf16.mxu1 %v2429_v1 }
 0x588   : > { %2000 = vmatpush3.bf16.msra.mxu1 %v2177_v51 }
 0x589   : > { %2001 = vmatprep.subr.bf16.mxu1 %v2429_v1 }
 0x58c   : > { %2002 = vmatpush3.bf16.msra.mxu1 %v2178_v52 }
 0x58d   : > { %2003 = vmatprep.subr.bf16.mxu1 %v2429_v1 }
 0x590   : > { %2004 = vmatpush3.bf16.msra.mxu1 %v2179_v53 }
 0x591   : > { %2005 = vmatprep.subr.bf16.mxu1 %v2429_v1 }
 0x594   : > { %2006 = vmatpush3.bf16.msra.mxu1 %v2180_v28 }
 0x595   : > { %2007 = vmatprep.subr.bf16.mxu1 %v2429_v1 }
 0x598   : > { %2008 = vmatpush3.bf16.msra.mxu1 %v2181_v54 }
 0x599   : > { %2009 = vmatprep.subr.bf16.mxu1 %v2429_v1 }
 0x59c   : > { %2010 = vmatpush3.bf16.msra.mxu1 %v2182_v55 }
 0x62f   : > { %v1002_v11 = vpop.f32.mrf.mxu1 }
 0x630   : > { %v1008_v13 = vpack.c.bf16 %v1002_v11, %v1002_v11 }
 0x631   : > { %v1949_v14 = vpop.f32.mrf.mxu1 }
 0x632   : > { %1232 = vrot.lane.b32.xlu0 %v1008_v13, %s2434_s19 }
 0x633   : > { %v1005_v15 = vpop.f32.mrf.mxu1 }
 0x635   : > { %v1950_v16 = vpop.f32.mrf.mxu1 }
 0x637   : > { %v1113_v18 = vpop.f32.mrf.mxu1 }
 0x638   : > { %v1119_v19 = vpack.c.bf16 %v1113_v18, %v1113_v18 }
 0x639   : > { %v1961_v20 = vpop.f32.mrf.mxu1 }
 0x63a   : > { %1235 = vrot.lane.b32.xlu1 %v1119_v19, %s2435_s24 }
 0x63b   : > { %v1116_v21 = vpop.f32.mrf.mxu1 }
 0x63d   : > { %v1962_v22 = vpop.f32.mrf.mxu1 }
 0x63f   : > { %v1224_v24 = vpop.f32.mrf.mxu1 }
 0x640   : > { %v1230_v25 = vpack.c.bf16 %v1224_v24, %v1224_v24 }
 0x641   : > { %v1973_v26 = vpop.f32.mrf.mxu1 }
 0x642   : > { %1238 = vrot.lane.b32.xlu0 %v1230_v25, %s2436_s29 }
 0x643   : > { %v1227_v27 = vpop.f32.mrf.mxu1 }
 0x644   : > { %v1840_v27 = vld [vmem:[%s2870_s10] ss:$0 sm:$0xff] }
 0x645   : > { %v1974_v29 = vpop.f32.mrf.mxu1 }
 0x6a4   : > { %v1233_v30 = vpop.permute.xlu0 %1232 }
 0x6a5   : > { %v1242_v33 = vsel %vm788_vm1, %v894_v31, %v1233_v30 }
 0x6ac   : > { %v1236_v32 = vpop.permute.xlu1 %1235 }
 0x6ad   : > { %v1245_v34 = vsel %vm1243_vm3, %v1242_v33, %v1236_v32 }
 0x6b4   : > { %v1239_v35 = vpop.permute.xlu0 %1238 }
 0x6b5   : > { %v1248_v36 = vsel %vm1246_vm4, %v1245_v34, %v1239_v35 }
 0x6b6   : > { %1992 = vmatmul.mubr.msk.bf16.vlgmr.msra.gmra.mxu0 %vm1249_vm5, %v1248_v36 }
 0x6b7   : > { %2031 = vmatprep.mubr.msk.bf16.mxu0 %vm2430_vm0, %v2429_v1  ;;  %2016 = vmatpush3.bf16.msra.mxu0 %v2183_v2 }
 0x6b8   : > { %2017 = vmatprep.subr.bf16.mxu0 %v2429_v1 }
 0x6bb   : > { %2018 = vmatpush3.bf16.msra.mxu0 %v2184_v3 }
 0x6bc   : > { %2019 = vmatprep.subr.bf16.mxu0 %v2429_v1 }
 0x6bf   : > { %2020 = vmatpush3.bf16.msra.mxu0 %v2185_v4 }
 0x6c0   : > { %2021 = vmatprep.subr.bf16.mxu0 %v2429_v1 }
 0x6c3   : > { %2022 = vmatpush3.bf16.msra.mxu0 %v2186_v5 }
 0x6c4   : > { %2023 = vmatprep.subr.bf16.mxu0 %v2429_v1 }
 0x6c7   : > { %2024 = vmatpush3.bf16.msra.mxu0 %v2187_v6 }
 0x6c8   : > { %2025 = vmatprep.subr.bf16.mxu0 %v2429_v1 }
 0x6cb   : > { %2026 = vmatpush3.bf16.msra.mxu0 %v2188_v7 }
 0x6cc   : > { %2027 = vmatprep.subr.bf16.mxu0 %v2429_v1 }
 0x6cf   : > { %2028 = vmatpush3.bf16.msra.mxu0 %v2189_v8 }
 0x6d0   : > { %2029 = vmatprep.subr.bf16.mxu0 %v2429_v1 }
 0x6d3   : > { %2030 = vmatpush3.bf16.msra.mxu0 %v2190_v9 }
 0x776   : > { %v1357_v38 = vpop.f32.mrf.mxu0 }
 0x777   : > { %v1358_v39 = vadd.f32 %v1819_v37, %v1357_v38 }
 0x778   : > { %v1993_v17 = vpop.f32.mrf.mxu0 }
 0x779   : > { %v1363_v40 = vadd.f32 %v1358_v39, %v2681_v23 }
 0x77a   : > { %v1360_v41 = vpop.f32.mrf.mxu0 }
 0x77b   : > { %1364 = vadd.xlane.f32.xlu1 %v1363_v40 }
 0x77c   : > { %v1994_v42 = vpop.f32.mrf.mxu0 }
 0x804   : > { %v1365_v46 = vpop.xlane.xlu1 %1364 }
 0x805   : > { %v1366_v47 = vmul.f32 0.03125, %v1365_v46  ;;  %v1850_v46 = vld [vmem:[%s2872_s12] ss:$0 sm:$0xff] }
 0x807   : > { %v1367_v48 = vsub.f32 %v1363_v40, %v1366_v47 }
 0x809   : > { %v1368_v23 = vsel %vm525_vm6, %v1367_v48, 0.0 }
 0x80a   : > { %v1369_v50 = vmul.f32 %v1368_v23, %v1368_v23 }
 0x80c   : > { %1370 = vadd.xlane.f32.xlu0 %v1369_v50 }
 0x895   : > { %v1371_v56 = vpop.xlane.xlu0 %1370 }
 0x896   : > { %v1372_v57 = vmul.f32 0.03125, %v1371_v56 }
 0x898   : > { %v1373_v58 = vadd.f32 1e-05, %v1372_v57 }
 0x89a   : > { %2207 = vrsqrt.f32 %v1373_v58 }
 0x8a7   : > { %v2208_v59 = vpop.eup %2207 }
 0x8a8   : > { %v1375_v49 = vmul.f32 %v2208_v59, %v1368_v23 }
 0x8aa   : > { %v1382_v62 = vmul.f32 %v1829_v60, %v1375_v49 }
 0x8ac   : > { %v1389_v63 = vadd.f32 %v1830_v61, %v1382_v62 }
 0x8ae   : > { %v1390_v0 = vpack.c.bf16 %v1389_v63, %v1389_v63 }
 0x8b0   : > { %2012 = vmatmul.mubr.bf16.vlgmr.msra.gmra.mxu1 %v1390_v0 }
 0x970   : > { %v1495_v11 = vpop.f32.mrf.mxu1 }
 0x971   : > { %v1496_v12 = vadd.f32 %v1831_v10, %v1495_v11 }
 0x972   : > { %v2013_v13 = vpop.f32.mrf.mxu1 }
 0x973   : > { %v1502_v14 = vmul.f32 0.044715, %v1496_v12  ;;  %v1501_v24 = vmul.f32 0.5, %v1496_v12 }
 0x974   : > { %v1498_v15 = vpop.f32.mrf.mxu1 }
 0x975   : > { %v1503_v16 = vmul.f32 %v1502_v14, %v1496_v12 }
 0x976   : > { %v2014_v18 = vpop.f32.mrf.mxu1 }
 0x977   : > { %v1504_v19 = vmul.f32 %v1503_v16, %v1496_v12 }
 0x979   : > { %v1505_v20 = vadd.f32 %v1504_v19, %v1496_v12 }
 0x97b   : > { %v1506_v21 = vmul.f32 0.7978846, %v1505_v20 }
 0x97d   : > { %2209 = vtanh.f32 %v1506_v21 }
 0x98a   : > { %v2210_v22 = vpop.eup %2209 }
 0x98b   : > { %v1508_v25 = vadd.f32 1.0, %v2210_v22 }
 0x98d   : > { %v1509_v1 = vmul.f32 %v1508_v25, %v1501_v24 }
 0x98f   : > { %v1510_v26 = vpack.c.bf16 %v1509_v1, %v1509_v1 }
 0x991   : > { %2032 = vmatmul.mubr.bf16.vlgmr.msra.gmra.mxu0 %v1510_v26 }
 0xa51   : > { %v1615_v29 = vpop.f32.mrf.mxu0 }
 0xa52   : > { %v1616_v30 = vadd.f32 %v1840_v27, %v1615_v29 }
 0xa53   : > { %v2033_v31 = vpop.f32.mrf.mxu0 }
 0xa54   : > { %v1621_v32 = vadd.f32 %v1616_v30, %v1389_v63 }
 0xa55   : > { %v1618_v33 = vpop.f32.mrf.mxu0 }
 0xa56   : > { %1622 = vadd.xlane.f32.xlu0 %v1621_v32 }
 0xa57   : > { %v2034_v34 = vpop.f32.mrf.mxu0 }
 0xadf   : > { %v1623_v35 = vpop.xlane.xlu0 %1622 }
 0xae0   : > { %v1624_v36 = vmul.f32 0.03125, %v1623_v35 }
 0xae2   : > { %v1625_v37 = vsub.f32 %v1621_v32, %v1624_v36 }
 0xae4   : > { %v1626_v38 = vsel %vm525_vm6, %v1625_v37, 0.0 }
 0xae5   : > { %v1627_v39 = vmul.f32 %v1626_v38, %v1626_v38 }
 0xae7   : > { %1628 = vadd.xlane.f32.xlu1 %v1627_v39 }
 0xb70   : > { %v1629_v17 = vpop.xlane.xlu1 %1628 }
 0xb71   : > { %v1630_v40 = vmul.f32 0.03125, %v1629_v17 }
 0xb73   : > { %v1631_v41 = vadd.f32 1e-05, %v1630_v40 }
 0xb75   : > { %2211 = vrsqrt.f32 %v1631_v41 }
 0xb82   : > { %v2212_v42 = vpop.eup %2211 }
 0xb83   : > { %v1633_v44 = vmul.f32 %v2212_v42, %v1626_v38 }
 0xb85   : > { %v1640_v45 = vmul.f32 %v1849_v43, %v1633_v44 }
 0xb87   : > { %v1647_v47 = vadd.f32 %v1850_v46, %v1640_v45 }
 0xb89   : > { %1648 = vst [vmem:[%s513_s20] sm:$0xff] %v1647_v47 }
 0xb8a   : > { %2358 = shalt.err (!%p2355_p11)
}
 0xb8b   : > { %s2359_s1 = scalar_lea.hbm %s1661_s28, 128  ;;  %s2363_s19 = scalar_lea.hbm %s2873_s13, 256 }
 0xb8c   : > { %p2360_p13 = scmp.ne.s32.totalorder %s1661_s28, %s2359_s1  ;;  %p2364_p4 = scmp.lt.s32.totalorder %s1661_s28, %s2873_s13 }
 0xb8d   : > { %p2365_p6 = scmp.lt.s32.totalorder %s2363_s19, %s2359_s1 }
 0xb8e   : > { %p2361_p1 = pnand %p2360_p13, %p2907_p7 }
 0xb8f   : > { %p2366_p2 = por %p2365_p6, %p2364_p4 }
 0xb90   : > { %p2362_p3 = pneg %p2361_p1 }
 0xb92   : > { %p2367_p8 = pnand %p2366_p2, %p2362_p3 }
 0xb94   : > { %2370 = shalt.err (!%p2367_p8)
}
 0xb95   : > { %2053 = dma.vmem_to_hbm [thread:$0]  (%p2907_p7), %s1664_s30, 128, %s1661_s28, %s1650_s3  }
 0xb96 PF: > { %s2908_s23 = sld [smem:[#allocation17_spill]]  ;;  %s1675_s20 = sand.u32 1, %s2405_s25  }
 0xb97   : > { %p2909_p10 = scmp.ne.s32.totalorder %s2899_s22, 0  ;;  %s1676_s21 = scalar_lea.sflag [#allocation4], %s1675_s20 }
 0xb9c   : > { %p2910_p0 = scmp.ge.s32.totalorder %s2908_s23, 2 }
 0xb9e   : > { %p2073_p12 = pnand %p2910_p0, %p2909_p10 }
 0xba0   : > { %p2074_p5 = pneg %p2073_p12 }
 0xba2   : > { %2400 = dma.done.wait (%p2074_p5), %s1676_s21, 128  }
 0xba3   : > { %2402 = vsyncadd (%p2074_p5), %s1676_s21, 4294967168  ;;  %s2911_s28 = sld [smem:[#allocation18_spill]]  ;;  %s2914_s25 = smov %s2409_s26 }
 0xba4   : > { %s2912_s16 = sld [smem:[#allocation16_spill]] }
 0xba5   : > { %s2913_s27 = sld [smem:[#allocation19_spill]] }
 0xba9   : > { %p28_p9 = scmp.ge.s32.totalorder %s2911_s28, 4  }
 0xbaa   : > { %s2915_s26 = smov %s2912_s16 }
 0xbab   :  { %30 = sbr.rel (!%p28_p9) target bundleno = 12 (0xc), region = 133 }
 0xbb0   :  { %1681 = vsyncpa [#allocation3], 1 }
 0xbb1   :  { %1683 = vsyncpa [#allocation3 + $0x1], 1 }
 0xbb2   :  { %1684 = vsyncpa [#allocation6], 1 }
 0xbb3   :  { %1685 = vsyncpa [#allocation9], 1 }
 0xbb4   :  { %1686 = vsyncpa [#allocation4], 1 }
 0xbb5   :  { %1688 = vsyncpa [#allocation4 + $0x1], 1 }

</bundles_post_ra>
